<compile_context>
chip_gen: v7x
topology: tpu7x:2x2x1
jax: 0.10.0
libtpu: 0.0.40
codegen_flags: <defaults>
</compile_context>

<pallas_src>
import math

import jax
import jax.numpy as jnp
from jax.experimental import pallas as pl
from jax.experimental.pallas import tpu as pltpu

# ----------------------------- toy configuration -----------------------------
B, S = 2, 8                  # batch, sequence length
BS = B * S
VOCAB = 128                  # toy vocab (lane-dense); real ~128k
HIDDEN = 128                 # stands in for embedding_size = 1536
NUM_HEADS = 2                # real deberta-v2-xlarge: 24
HEAD_DIM = HIDDEN // NUM_HEADS
FFN = 4 * HIDDEN
NUM_LAYERS = 2               # real: 24
NUM_LABELS = 8               # number_of_labels
LABELS_PAD = 128             # lane-dense padded logits slab (sliced in wrapper)
BOTTLENECK = 128             # stands in for bottleneck_value = 256
QKV = 3 * HIDDEN             # fused Q|K|V projection width (head-minor per block)
LN_EPS = 1e-7                # DeBERTa LayerNorm eps
IGNORE_INDEX = -100          # nn.CrossEntropyLoss default ignore_index
SCALE = 1.0 / math.sqrt(HEAD_DIM)


def _layer_norm(x, gamma, beta):
    # statistics kept in float32
    mean = jnp.mean(x, axis=-1, keepdims=True)
    var = jnp.mean((x - mean) ** 2, axis=-1, keepdims=True)
    return (x - mean) * jax.lax.rsqrt(var + LN_EPS) * gamma + beta


# ------------------------------ fused forward kernel ------------------------------
def fused_forward_kernel(
    # token inputs
    ids_ref, bias_ref, valid_ref, labels_ref,
    # embedding / classifier params (constant block index -> fetched once)
    emb_ref, eg_ref, eb_ref, cw_ref, cb_ref,
    # stacked per-layer params (block = one layer slice, pipelined per grid step)
    wqkv_ref, bqkv_ref, wo_ref, bo_ref,
    a1dw_ref, a1db_ref, a1uw_ref, a1ub_ref, ln1g_ref, ln1b_ref,
    wi_ref, bi_ref, wf_ref, bf_ref,
    a2dw_ref, a2db_ref, a2uw_ref, a2ub_ref, ln2g_ref, ln2b_ref,
    # outputs
    logits_ref, loss_ref,
    # scratch: hidden-state slab resident in VMEM across all layers
    h_ref,
):
    li = pl.program_id(0)

    # ---------------- grid step 0: embeddings -> LayerNorm ----------------
    @pl.when(li == 0)
    def _embed():
        ids = ids_ref[...]                                           # [BS, 1] int32
        vocab_iota = jax.lax.broadcasted_iota(jnp.int32, (BS, VOCAB), 1)
        # TODO(synk): at real vocab (~128k) replace the one-hot matmul with a
        #             scalar-prefetch / DMA row gather of the embedding table.
        onehot = (ids == vocab_iota).astype(jnp.bfloat16)            # direct bool->bf16
        x = jnp.dot(onehot, emb_ref[...], preferred_element_type=jnp.float32)
        h_ref[...] = _layer_norm(x, eg_ref[...], eb_ref[...])
        # NOTE: logits / loss are written only at the last grid step (outputs are
        # fully overwritten there; constant index_map -> single HBM writeback).

    # ---------------- encoder layer `li` (every grid step) ----------------
    x = h_ref[...]                                                   # [BS, H] f32
    xb = x.astype(jnp.bfloat16)
    attn_bias = bias_ref[...]                                        # [B, S] key-mask bias

    # --- self-attention: one fused QKV GEMM (full MXU width), fused bias ---
    qkv = jnp.dot(xb, wqkv_ref[0], preferred_element_type=jnp.float32) + bqkv_ref[0]
    # qkv columns: [ Q(head-minor, H) | K(H) | V(H) ]

    scores = []
    v_heads = []
    for h in range(NUM_HEADS):  # tiny static unroll; only the small score/ctx
        lo, hi = h * HEAD_DIM, (h + 1) * HEAD_DIM
        qh = qkv[:, lo:hi].reshape(B, S, HEAD_DIM).astype(jnp.bfloat16)
        kh = qkv[:, HIDDEN + lo:HIDDEN + hi].reshape(B, S, HEAD_DIM).astype(jnp.bfloat16)
        vh = qkv[:, 2 * HIDDEN + lo:2 * HIDDEN + hi].reshape(B, S, HEAD_DIM).astype(jnp.bfloat16)
        v_heads.append(vh)
        scores.append(jnp.einsum('bqd,bkd->bqk', qh, kh,
                                 preferred_element_type=jnp.float32))

    # head-stacked scores: softmax + mask run ONCE over [NH, B, S, S]
    s_all = jnp.stack(scores, axis=0) * SCALE
    s_all = s_all + attn_bias[None, :, None, :]                      # mask keys, once/layer
    s_all = s_all - jnp.max(s_all, axis=-1, keepdims=True)
    p_all = jnp.exp(s_all)
    p_all = (p_all * pl.reciprocal(jnp.sum(p_all, axis=-1, keepdims=True),
                                   approx=True)).astype(jnp.bfloat16)

    # per-head context, concatenated back to [BS, HIDDEN] -> ONE output projection
    ctx = jnp.concatenate(
        [jnp.einsum('bqk,bkd->bqd', p_all[h], v_heads[h],
                    preferred_element_type=jnp.float32)
         for h in range(NUM_HEADS)],
        axis=-1).reshape(BS, HIDDEN)
    attn = jnp.dot(ctx.astype(jnp.bfloat16), wo_ref[0],
                   preferred_element_type=jnp.float32) + bo_ref[0]

    # adapter #1 (bottleneck down -> gelu -> up), residual inside adapter
    ad1 = jax.nn.gelu(
        jnp.dot(attn.astype(jnp.bfloat16), a1dw_ref[0],
                preferred_element_type=jnp.float32) + a1db_ref[0],
        approximate=True)
    ad1 = jnp.dot(ad1.astype(jnp.bfloat16), a1uw_ref[0],
                  preferred_element_type=jnp.float32) + a1ub_ref[0]
    attn = attn + ad1
    x1 = _layer_norm(x + attn, ln1g_ref[0], ln1b_ref[0])

    # feed-forward + adapter #2
    hff = jax.nn.gelu(
        jnp.dot(x1.astype(jnp.bfloat16), wi_ref[0],
                preferred_element_type=jnp.float32) + bi_ref[0],
        approximate=True)
    ff = jnp.dot(hff.astype(jnp.bfloat16), wf_ref[0],
                 preferred_element_type=jnp.float32) + bf_ref[0]
    ad2 = jax.nn.gelu(
        jnp.dot(ff.astype(jnp.bfloat16), a2dw_ref[0],
                preferred_element_type=jnp.float32) + a2db_ref[0],
        approximate=True)
    ad2 = jnp.dot(ad2.astype(jnp.bfloat16), a2uw_ref[0],
                  preferred_element_type=jnp.float32) + a2ub_ref[0]
    ff = ff + ad2
    out = _layer_norm(x1 + ff, ln2g_ref[0], ln2b_ref[0])
    h_ref[...] = out

    # -------------- last grid step: classifier + masked token CE loss --------------
    @pl.when(li == NUM_LAYERS - 1)
    def _classify():
        # TODO(synk): nn.Dropout(p=0.1) treated as identity (eval / deterministic).
        logits = jnp.dot(out.astype(jnp.bfloat16), cw_ref[...],
                         preferred_element_type=jnp.float32) + cb_ref[...]
        logits_ref[...] = logits                     # [BS, 128] lane-dense store

        col = jax.lax.broadcasted_iota(jnp.int32, (BS, LABELS_PAD), 1)
        lm = jnp.where(col < NUM_LABELS, logits, jnp.float32(-1e9))  # kill pad cols
        lmax = jnp.max(lm, axis=-1, keepdims=True)
        lse = jnp.log(jnp.sum(jnp.exp(lm - lmax), axis=-1, keepdims=True)) + lmax
        logp = lm - lse

        labels = labels_ref[...]                                     # [BS, 1] int32
        valid_in = valid_ref[...]                                    # [BS, 1] f32
        active = jnp.where(valid_in == 1.0, labels, IGNORE_INDEX)
        onehot = (active == col).astype(jnp.float32)  # ignore_index never matches
        per_tok = -jnp.sum(onehot * logp, axis=-1, keepdims=True)    # [BS, 1]
        is_valid = (active != IGNORE_INDEX).astype(jnp.float32)
        # TODO(synk): PyTorch CrossEntropyLoss returns NaN when every token is
        #             ignored; max(.,1) guards the fully-masked corner case.
        denom = jnp.maximum(jnp.sum(is_valid), 1.0)
        loss_ref[0, 0] = jnp.sum(per_tok * is_valid) / denom


# ----------------------------------- BlockSpec helpers -----------------------------------
def _full(shape):
    zeros = (0,) * len(shape)
    return pl.BlockSpec(tuple(shape), lambda l, _z=zeros: _z)


def _layer(shape):
    block = (1,) + tuple(int(d) for d in shape[1:])
    zeros = (0,) * (len(shape) - 1)
    return pl.BlockSpec(block, lambda l, _z=zeros: (l,) + _z)


# ----------------------------------- params -----------------------------------
def init_params(key):
    def dense_w(k, fan_in, fan_out):
        return (jax.random.normal(k, (fan_in, fan_out), jnp.float32) * 0.02
                ).astype(jnp.bfloat16)

    def zeros_b(fan_out):
        return jnp.zeros((1, fan_out), jnp.float32)

    keys = jax.random.split(key, 2 + NUM_LAYERS)
    emb = dense_w(keys[0], VOCAB, HIDDEN)

    layers = []
    for li in range(NUM_LAYERS):
        lk = jax.random.split(keys[1 + li], 10)
        wq = dense_w(lk[0], HIDDEN, HIDDEN)
        wk = dense_w(lk[1], HIDDEN, HIDDEN)
        wv = dense_w(lk[2], HIDDEN, HIDDEN)
        wqkv = jnp.concatenate([wq, wk, wv], axis=1)          # [H, 3H] fused QKV
        wo = dense_w(lk[3], HIDDEN, HIDDEN)
        a1dw = dense_w(lk[4], HIDDEN, BOTTLENECK)
        a1uw = dense_w(lk[5], BOTTLENECK, HIDDEN)
        wi = dense_w(lk[6], HIDDEN, FFN)
        wf = dense_w(lk[7], FFN, HIDDEN)
        a2dw = dense_w(lk[8], HIDDEN, BOTTLENECK)
        a2uw = dense_w(lk[9], BOTTLENECK, HIDDEN)
        layers.append(dict(
            wqkv=wqkv, bqkv=zeros_b(QKV),
            wo=wo, bo=zeros_b(HIDDEN),
            a1dw=a1dw, a1db=zeros_b(BOTTLENECK),
            a1uw=a1uw, a1ub=zeros_b(HIDDEN),
            ln1g=jnp.ones((1, HIDDEN), jnp.float32), ln1b=zeros_b(HIDDEN),
            wi=wi, bi=zeros_b(FFN),
            wf=wf, bf=zeros_b(HIDDEN),
            a2dw=a2dw, a2db=zeros_b(BOTTLENECK),
            a2uw=a2uw, a2ub=zeros_b(HIDDEN),
            ln2g=jnp.ones((1, HIDDEN), jnp.float32), ln2b=zeros_b(HIDDEN),
        ))
    stacked = {k: jnp.stack([lyr[k] for lyr in layers]) for k in layers[0]}

    cls_key = jax.random.split(keys[-1], 1)[0]
    cls_w_real = jax.random.normal(cls_key, (HIDDEN, NUM_LABELS), jnp.float32) * 0.02
    cls_w = (jnp.zeros((HIDDEN, LABELS_PAD), jnp.float32)
             .at[:, :NUM_LABELS].set(cls_w_real).astype(jnp.bfloat16))
    cls_b = jnp.zeros((1, LABELS_PAD), jnp.float32)

    return dict(
        emb=emb,
        emb_ln_g=jnp.ones((1, HIDDEN), jnp.float32),
        emb_ln_b=jnp.zeros((1, HIDDEN), jnp.float32),
        cls_w=cls_w, cls_b=cls_b,
        layers=stacked,
    )


# ----------------------------------- wrapper -----------------------------------
@jax.jit
def custom_bert_forward(ids, mask, labels, params):
    ids2 = ids.reshape(BS, 1).astype(jnp.int32)
    labels2 = labels.reshape(BS, 1).astype(jnp.int32)
    mask_f = mask.astype(jnp.float32)
    attn_bias = (1.0 - mask_f) * -1e9          # [B, S] additive key mask, built once
    valid2 = mask_f.reshape(BS, 1)

    lw = params['layers']
    in_specs = [
        _full((BS, 1)),                # ids
        _full((B, S)),                 # attention key-mask bias
        _full((BS, 1)),                # valid-token mask (float)
        _full((BS, 1)),                # labels
        _full((VOCAB, HIDDEN)),        # embedding table (bf16)
        _full((1, HIDDEN)),            # emb LN gamma
        _full((1, HIDDEN)),            # emb LN beta
        _full((HIDDEN, LABELS_PAD)),   # classifier W (bf16, lane-padded)
        _full((1, LABELS_PAD)),        # classifier b
        # stacked per-layer parameters (one layer slice per grid step)
        _layer(lw['wqkv'].shape), _layer(lw['bqkv'].shape),
        _layer(lw['wo'].shape), _layer(lw['bo'].shape),
        _layer(lw['a1dw'].shape), _layer(lw['a1db'].shape),
        _layer(lw['a1uw'].shape), _layer(lw['a1ub'].shape),
        _layer(lw['ln1g'].shape), _layer(lw['ln1b'].shape),
        _layer(lw['wi'].shape), _layer(lw['bi'].shape),
        _layer(lw['wf'].shape), _layer(lw['bf'].shape),
        _layer(lw['a2dw'].shape), _layer(lw['a2db'].shape),
        _layer(lw['a2uw'].shape), _layer(lw['a2ub'].shape),
        _layer(lw['ln2g'].shape), _layer(lw['ln2b'].shape),
    ]
    out_specs = (
        pl.BlockSpec((BS, LABELS_PAD), lambda l: (0, 0)),                 # logits (VMEM)
        pl.BlockSpec(memory_space=pltpu.MemorySpace.SMEM),                # scalar loss
    )
    grid_spec = pltpu.PrefetchScalarGridSpec(
        num_scalar_prefetch=0,
        grid=(NUM_LAYERS,),
        in_specs=in_specs,
        out_specs=out_specs,
        scratch_shapes=[pltpu.VMEM((BS, HIDDEN), jnp.float32)],           # resident hidden
    )

    # TODO(synk): at real scale set vmem_limit_bytes explicitly and add a
    #             leading "parallel" token-row grid axis (v7x second TC).
    logits_pad, loss = pl.pallas_call(
        fused_forward_kernel,
        grid_spec=grid_spec,
        out_shape=(jax.ShapeDtypeStruct((BS, LABELS_PAD), jnp.float32),
                   jax.ShapeDtypeStruct((1, 1), jnp.float32)),
        compiler_params=pltpu.CompilerParams(
            dimension_semantics=("arbitrary",)),   # layers are sequential (carry in VMEM)
    )(ids2, attn_bias, valid2, labels2,
      params['emb'], params['emb_ln_g'], params['emb_ln_b'],
      params['cls_w'], params['cls_b'],
      lw['wqkv'], lw['bqkv'], lw['wo'], lw['bo'],
      lw['a1dw'], lw['a1db'], lw['a1uw'], lw['a1ub'], lw['ln1g'], lw['ln1b'],
      lw['wi'], lw['bi'], lw['wf'], lw['bf'],
      lw['a2dw'], lw['a2db'], lw['a2uw'], lw['a2ub'], lw['ln2g'], lw['ln2b'])

    logits = logits_pad[:, :NUM_LABELS].reshape(B, S, NUM_LABELS)
    return {'logits': logits, 'loss': loss[0, 0]}


if __name__ == "__main__":
    key = jax.random.PRNGKey(0)
    k_ids, k_mask, k_lbl, k_param = jax.random.split(key, 4)

    ids = jax.random.randint(k_ids, (B, S), 0, VOCAB, dtype=jnp.int32)
    mask = (jax.random.uniform(k_mask, (B, S)) > 0.3).astype(jnp.int32)
    mask = mask.at[:, 0].set(1)      # guarantee at least one active token per row
    labels = jax.random.randint(k_lbl, (B, S), 0, NUM_LABELS, dtype=jnp.int32)

    params = init_params(k_param)

    out = custom_bert_forward(ids, mask, labels, params)
    jax.block_until_ready(out)

    assert out['logits'].shape == (B, S, NUM_LABELS)
    assert out['loss'].shape == ()
    assert bool(jnp.isfinite(out['loss']))
    print("KERNEL_OK")
</pallas_src>

<mosaic_0001>
module attributes {stable_mosaic.version = 11 : i64} {
  func.func @fused_forward_kernel(%arg0: i32, %arg1: memref<16x1xi32, #tpu.memory_space<vmem>>, %arg2: memref<2x8xf32, #tpu.memory_space<vmem>>, %arg3: memref<16x1xf32, #tpu.memory_space<vmem>>, %arg4: memref<16x1xi32, #tpu.memory_space<vmem>>, %arg5: memref<128x128xbf16, #tpu.memory_space<vmem>>, %arg6: memref<1x128xf32, #tpu.memory_space<vmem>>, %arg7: memref<1x128xf32, #tpu.memory_space<vmem>>, %arg8: memref<128x128xbf16, #tpu.memory_space<vmem>>, %arg9: memref<1x128xf32, #tpu.memory_space<vmem>>, %arg10: memref<1x128x384xbf16, #tpu.memory_space<vmem>>, %arg11: memref<1x1x384xf32, #tpu.memory_space<vmem>>, %arg12: memref<1x128x128xbf16, #tpu.memory_space<vmem>>, %arg13: memref<1x1x128xf32, #tpu.memory_space<vmem>>, %arg14: memref<1x128x128xbf16, #tpu.memory_space<vmem>>, %arg15: memref<1x1x128xf32, #tpu.memory_space<vmem>>, %arg16: memref<1x128x128xbf16, #tpu.memory_space<vmem>>, %arg17: memref<1x1x128xf32, #tpu.memory_space<vmem>>, %arg18: memref<1x1x128xf32, #tpu.memory_space<vmem>>, %arg19: memref<1x1x128xf32, #tpu.memory_space<vmem>>, %arg20: memref<1x128x512xbf16, #tpu.memory_space<vmem>>, %arg21: memref<1x1x512xf32, #tpu.memory_space<vmem>>, %arg22: memref<1x512x128xbf16, #tpu.memory_space<vmem>>, %arg23: memref<1x1x128xf32, #tpu.memory_space<vmem>>, %arg24: memref<1x128x128xbf16, #tpu.memory_space<vmem>>, %arg25: memref<1x1x128xf32, #tpu.memory_space<vmem>>, %arg26: memref<1x128x128xbf16, #tpu.memory_space<vmem>>, %arg27: memref<1x1x128xf32, #tpu.memory_space<vmem>>, %arg28: memref<1x1x128xf32, #tpu.memory_space<vmem>>, %arg29: memref<1x1x128xf32, #tpu.memory_space<vmem>>, %arg30: memref<16x128xf32, #tpu.memory_space<vmem>>, %arg31: memref<1x1xf32, #tpu.memory_space<smem>>, %arg32: memref<16x128xf32, #tpu.memory_space<vmem>>) attributes {dimension_semantics = [#tpu.dimension_semantics<arbitrary>], iteration_bounds = array<i64: 2>, scalar_prefetch = 0 : i64, scratch_operands = 1 : i64, tpu.core_type = #tpu.core_type<tc>, window_params = [{pipeline_mode = #tpu.pipeline_mode<synchronous>, transform_indices = @transform_0, window_bounds = array<i64: 16, 1>}, {pipeline_mode = #tpu.pipeline_mode<synchronous>, transform_indices = @transform_1, window_bounds = array<i64: 2, 8>}, {pipeline_mode = #tpu.pipeline_mode<synchronous>, transform_indices = @transform_2, window_bounds = array<i64: 16, 1>}, {pipeline_mode = #tpu.pipeline_mode<synchronous>, transform_indices = @transform_3, window_bounds = array<i64: 16, 1>}, {pipeline_mode = #tpu.pipeline_mode<synchronous>, transform_indices = @transform_4, window_bounds = array<i64: 128, 128>}, {pipeline_mode = #tpu.pipeline_mode<synchronous>, transform_indices = @transform_5, window_bounds = array<i64: 1, 128>}, {pipeline_mode = #tpu.pipeline_mode<synchronous>, transform_indices = @transform_6, window_bounds = array<i64: 1, 128>}, {pipeline_mode = #tpu.pipeline_mode<synchronous>, transform_indices = @transform_7, window_bounds = array<i64: 128, 128>}, {pipeline_mode = #tpu.pipeline_mode<synchronous>, transform_indices = @transform_8, window_bounds = array<i64: 1, 128>}, {transform_indices = @transform_9, window_bounds = array<i64: 1, 128, 384>}, {transform_indices = @transform_10, window_bounds = array<i64: 1, 1, 384>}, {transform_indices = @transform_11, window_bounds = array<i64: 1, 128, 128>}, {transform_indices = @transform_12, window_bounds = array<i64: 1, 1, 128>}, {transform_indices = @transform_13, window_bounds = array<i64: 1, 128, 128>}, {transform_indices = @transform_14, window_bounds = array<i64: 1, 1, 128>}, {transform_indices = @transform_15, window_bounds = array<i64: 1, 128, 128>}, {transform_indices = @transform_16, window_bounds = array<i64: 1, 1, 128>}, {transform_indices = @transform_17, window_bounds = array<i64: 1, 1, 128>}, {transform_indices = @transform_18, window_bounds = array<i64: 1, 1, 128>}, {transform_indices = @transform_19, window_bounds = array<i64: 1, 128, 512>}, {transform_indices = @transform_20, window_bounds = array<i64: 1, 1, 512>}, {transform_indices = @transform_21, window_bounds = array<i64: 1, 512, 128>}, {transform_indices = @transform_22, window_bounds = array<i64: 1, 1, 128>}, {transform_indices = @transform_23, window_bounds = array<i64: 1, 128, 128>}, {transform_indices = @transform_24, window_bounds = array<i64: 1, 1, 128>}, {transform_indices = @transform_25, window_bounds = array<i64: 1, 128, 128>}, {transform_indices = @transform_26, window_bounds = array<i64: 1, 1, 128>}, {transform_indices = @transform_27, window_bounds = array<i64: 1, 1, 128>}, {transform_indices = @transform_28, window_bounds = array<i64: 1, 1, 128>}, {pipeline_mode = #tpu.pipeline_mode<synchronous>, transform_indices = @transform_29, window_bounds = array<i64: 16, 128>}, {transform_indices = @transform_30, window_bounds = array<i64: 1, 1>}]} {
    %c0_i32 = arith.constant 0 : i32
    %0 = arith.cmpi eq, %arg0, %c0_i32 : i32
    %1 = arith.extui %0 : i1 to i32
    %c0_i32_0 = arith.constant 0 : i32
    %2 = arith.cmpi ne, %1, %c0_i32_0 : i32
    scf.if %2 {
      %c0_103 = arith.constant 0 : index
      %c0_104 = arith.constant 0 : index
      %215 = vector.load %arg1[%c0_103, %c0_104] : memref<16x1xi32, #tpu.memory_space<vmem>>, vector<16x1xi32>
      %216 = tpu.iota {dimensions = array<i32: 1>} : vector<16x128xi32>
      %217 = vector.broadcast %215 : vector<16x1xi32> to vector<16x128xi32>
      %218 = arith.cmpi eq, %217, %216 : vector<16x128xi32>
      %219 = arith.extui %218 : vector<16x128xi1> to vector<16x128xi32>
      %220 = arith.sitofp %219 : vector<16x128xi32> to vector<16x128xf32>
      %221 = arith.truncf %220 : vector<16x128xf32> to vector<16x128xbf16>
      %c0_105 = arith.constant 0 : index
      %c0_106 = arith.constant 0 : index
      %222 = vector.load %arg5[%c0_105, %c0_106] : memref<128x128xbf16, #tpu.memory_space<vmem>>, vector<128x128xbf16>
      %cst_107 = arith.constant dense<0.000000e+00> : vector<16x128xf32>
      %223 = tpu.matmul %221, %222, %cst_107 {dimension_numbers = #tpu.dot_dimension_numbers<[1], [0], [0], [1], [0, 0, 1, 1], [], []>} : vector<16x128xbf16>, vector<128x128xbf16>, vector<16x128xf32> -> vector<16x128xf32>
      %c0_108 = arith.constant 0 : index
      %c0_109 = arith.constant 0 : index
      %224 = vector.load %arg6[%c0_108, %c0_109] : memref<1x128xf32, #tpu.memory_space<vmem>>, vector<1x128xf32>
      %c0_110 = arith.constant 0 : index
      %c0_111 = arith.constant 0 : index
      %225 = vector.load %arg7[%c0_110, %c0_111] : memref<1x128xf32, #tpu.memory_space<vmem>>, vector<1x128xf32>
      %cst_112 = arith.constant dense<0.000000e+00> : vector<16xf32>
      %226 = vector.multi_reduction <add>, %223, %cst_112 [1] : vector<16x128xf32> to vector<16xf32>
      %227 = vector.shape_cast %226 : vector<16xf32> to vector<16x1xf32>
      %cst_113 = arith.constant 1.280000e+02 : f32
      %228 = vector.broadcast %cst_113 : f32 to vector<16x1xf32>
      %229 = arith.divf %227, %228 : vector<16x1xf32>
      %230 = vector.broadcast %229 : vector<16x1xf32> to vector<16x128xf32>
      %231 = arith.subf %223, %230 : vector<16x128xf32>
      %232 = arith.mulf %231, %231 : vector<16x128xf32>
      %cst_114 = arith.constant dense<0.000000e+00> : vector<16xf32>
      %233 = vector.multi_reduction <add>, %232, %cst_114 [1] : vector<16x128xf32> to vector<16xf32>
      %234 = vector.shape_cast %233 : vector<16xf32> to vector<16x1xf32>
      %cst_115 = arith.constant 1.280000e+02 : f32
      %235 = vector.broadcast %cst_115 : f32 to vector<16x1xf32>
      %236 = arith.divf %234, %235 : vector<16x1xf32>
      %237 = vector.broadcast %229 : vector<16x1xf32> to vector<16x128xf32>
      %238 = arith.subf %223, %237 : vector<16x128xf32>
      %cst_116 = arith.constant 1.000000e-07 : f32
      %239 = vector.broadcast %cst_116 : f32 to vector<16x1xf32>
      %240 = arith.addf %236, %239 : vector<16x1xf32>
      %241 = math.rsqrt %240 : vector<16x1xf32>
      %242 = vector.broadcast %241 : vector<16x1xf32> to vector<16x128xf32>
      %243 = arith.mulf %238, %242 : vector<16x128xf32>
      %244 = vector.broadcast %224 : vector<1x128xf32> to vector<16x128xf32>
      %245 = arith.mulf %243, %244 : vector<16x128xf32>
      %246 = vector.broadcast %225 : vector<1x128xf32> to vector<16x128xf32>
      %247 = arith.addf %245, %246 : vector<16x128xf32>
      %c0_117 = arith.constant 0 : index
      %c0_118 = arith.constant 0 : index
      %248 = vector.load %arg32[%c0_117, %c0_118] : memref<16x128xf32, #tpu.memory_space<vmem>>, vector<16x128xf32>
      tpu.vector_store %arg32[%c0_117, %c0_118], %247 {strides = array<i32>} : memref<16x128xf32, #tpu.memory_space<vmem>>, vector<16x128xf32>,
    } else {
    }
    %c0 = arith.constant 0 : index
    %c0_1 = arith.constant 0 : index
    %3 = vector.load %arg32[%c0, %c0_1] : memref<16x128xf32, #tpu.memory_space<vmem>>, vector<16x128xf32>
    %4 = arith.truncf %3 : vector<16x128xf32> to vector<16x128xbf16>
    %c0_2 = arith.constant 0 : index
    %c0_3 = arith.constant 0 : index
    %5 = vector.load %arg2[%c0_2, %c0_3] : memref<2x8xf32, #tpu.memory_space<vmem>>, vector<2x8xf32>
    %c0_4 = arith.constant 0 : index
    %c0_5 = arith.constant 0 : index
    %c0_6 = arith.constant 0 : index
    %6 = vector.load %arg10[%c0_4, %c0_5, %c0_6] : memref<1x128x384xbf16, #tpu.memory_space<vmem>>, vector<1x128x384xbf16>
    %7 = vector.shape_cast %6 : vector<1x128x384xbf16> to vector<128x384xbf16>
    %cst = arith.constant dense<0.000000e+00> : vector<16x384xf32>
    %8 = tpu.matmul %4, %7, %cst {dimension_numbers = #tpu.dot_dimension_numbers<[1], [0], [0], [1], [0, 0, 1, 1], [], []>} : vector<16x128xbf16>, vector<128x384xbf16>, vector<16x384xf32> -> vector<16x384xf32>
    %c0_7 = arith.constant 0 : index
    %c0_8 = arith.constant 0 : index
    %c0_9 = arith.constant 0 : index
    %9 = vector.load %arg11[%c0_7, %c0_8, %c0_9] : memref<1x1x384xf32, #tpu.memory_space<vmem>>, vector<1x1x384xf32>
    %10 = vector.shape_cast %9 : vector<1x1x384xf32> to vector<1x384xf32>
    %11 = vector.broadcast %10 : vector<1x384xf32> to vector<16x384xf32>
    %12 = arith.addf %8, %11 : vector<16x384xf32>
    %13 = vector.extract_strided_slice %12 {offsets = [0, 0], sizes = [16, 64], strides = [1, 1]} : vector<16x384xf32> to vector<16x64xf32>
    %14 = vector.shape_cast %13 : vector<16x64xf32> to vector<2x8x64xf32>
    %15 = arith.truncf %14 : vector<2x8x64xf32> to vector<2x8x64xbf16>
    %16 = vector.extract_strided_slice %12 {offsets = [0, 128], sizes = [16, 64], strides = [1, 1]} : vector<16x384xf32> to vector<16x64xf32>
    %17 = vector.shape_cast %16 : vector<16x64xf32> to vector<2x8x64xf32>
    %18 = arith.truncf %17 : vector<2x8x64xf32> to vector<2x8x64xbf16>
    %19 = vector.extract_strided_slice %12 {offsets = [0, 256], sizes = [16, 64], strides = [1, 1]} : vector<16x384xf32> to vector<16x64xf32>
    %20 = vector.shape_cast %19 : vector<16x64xf32> to vector<2x8x64xf32>
    %21 = arith.truncf %20 : vector<2x8x64xf32> to vector<2x8x64xbf16>
    "tpu.trace_start"() <{level = 10 : i32, message = "bqd,bkd->bqk"}> : () -> ()
    %cst_10 = arith.constant dense<0.000000e+00> : vector<2x8x8xf32>
    %22 = tpu.matmul %15, %18, %cst_10 {dimension_numbers = #tpu.dot_dimension_numbers<[2], [2], [1], [1], [0, 0, 0, 1, 1, 1], [0], [0]>} : vector<2x8x64xbf16>, vector<2x8x64xbf16>, vector<2x8x8xf32> -> vector<2x8x8xf32>
    "tpu.trace_stop"() : () -> ()
    %23 = vector.extract_strided_slice %12 {offsets = [0, 64], sizes = [16, 64], strides = [1, 1]} : vector<16x384xf32> to vector<16x64xf32>
    %24 = vector.shape_cast %23 : vector<16x64xf32> to vector<2x8x64xf32>
    %25 = arith.truncf %24 : vector<2x8x64xf32> to vector<2x8x64xbf16>
    %26 = vector.extract_strided_slice %12 {offsets = [0, 192], sizes = [16, 64], strides = [1, 1]} : vector<16x384xf32> to vector<16x64xf32>
    %27 = vector.shape_cast %26 : vector<16x64xf32> to vector<2x8x64xf32>
    %28 = arith.truncf %27 : vector<2x8x64xf32> to vector<2x8x64xbf16>
    %29 = vector.extract_strided_slice %12 {offsets = [0, 320], sizes = [16, 64], strides = [1, 1]} : vector<16x384xf32> to vector<16x64xf32>
    %30 = vector.shape_cast %29 : vector<16x64xf32> to vector<2x8x64xf32>
    %31 = arith.truncf %30 : vector<2x8x64xf32> to vector<2x8x64xbf16>
    "tpu.trace_start"() <{level = 10 : i32, message = "bqd,bkd->bqk"}> : () -> ()
    %cst_11 = arith.constant dense<0.000000e+00> : vector<2x8x8xf32>
    %32 = tpu.matmul %25, %28, %cst_11 {dimension_numbers = #tpu.dot_dimension_numbers<[2], [2], [1], [1], [0, 0, 0, 1, 1, 1], [0], [0]>} : vector<2x8x64xbf16>, vector<2x8x64xbf16>, vector<2x8x8xf32> -> vector<2x8x8xf32>
    "tpu.trace_stop"() : () -> ()
    %33 = vector.shape_cast %22 : vector<2x8x8xf32> to vector<1x2x8x8xf32>
    %34 = vector.shape_cast %32 : vector<2x8x8xf32> to vector<1x2x8x8xf32>
    %35 = tpu.concatenate %33, %34 in 0 : vector<1x2x8x8xf32>, vector<1x2x8x8xf32> -> vector<2x2x8x8xf32>
    %cst_12 = arith.constant 1.250000e-01 : f32
    %36 = vector.broadcast %cst_12 : f32 to vector<2x2x8x8xf32>
    %37 = arith.mulf %35, %36 : vector<2x2x8x8xf32>
    %38 = vector.shape_cast %5 : vector<2x8xf32> to vector<1x2x1x8xf32>
    %39 = vector.broadcast %38 : vector<1x2x1x8xf32> to vector<2x2x8x8xf32>
    %40 = arith.addf %37, %39 : vector<2x2x8x8xf32>
    %cst_13 = arith.constant dense<0xFF800000> : vector<2x2x8xf32>
    %41 = vector.multi_reduction <maximumf>, %40, %cst_13 [3] : vector<2x2x8x8xf32> to vector<2x2x8xf32>
    %42 = vector.shape_cast %41 : vector<2x2x8xf32> to vector<2x2x8x1xf32>
    %43 = vector.broadcast %42 : vector<2x2x8x1xf32> to vector<2x2x8x8xf32>
    %44 = arith.subf %40, %43 : vector<2x2x8x8xf32>
    %45 = math.exp %44 : vector<2x2x8x8xf32>
    %cst_14 = arith.constant dense<0.000000e+00> : vector<2x2x8xf32>
    %46 = vector.multi_reduction <add>, %45, %cst_14 [3] : vector<2x2x8x8xf32> to vector<2x2x8xf32>
    %47 = vector.shape_cast %46 : vector<2x2x8xf32> to vector<2x2x8x1xf32>
    %48 = tpu.reciprocal %47 {approx = true} : vector<2x2x8x1xf32> -> vector<2x2x8x1xf32>
    %49 = vector.broadcast %48 : vector<2x2x8x1xf32> to vector<2x2x8x8xf32>
    %50 = arith.mulf %45, %49 : vector<2x2x8x8xf32>
    %51 = arith.truncf %50 : vector<2x2x8x8xf32> to vector<2x2x8x8xbf16>
    %52 = vector.extract_strided_slice %51 {offsets = [0, 0, 0, 0], sizes = [1, 2, 8, 8], strides = [1, 1, 1, 1]} : vector<2x2x8x8xbf16> to vector<1x2x8x8xbf16>
    %53 = vector.shape_cast %52 : vector<1x2x8x8xbf16> to vector<2x8x8xbf16>
    "tpu.trace_start"() <{level = 10 : i32, message = "bqk,bkd->bqd"}> : () -> ()
    %cst_15 = arith.constant dense<0.000000e+00> : vector<2x8x64xf32>
    %54 = tpu.matmul %53, %21, %cst_15 {dimension_numbers = #tpu.dot_dimension_numbers<[2], [1], [1], [2], [0, 0, 0, 1, 1, 2], [0], [0]>} : vector<2x8x8xbf16>, vector<2x8x64xbf16>, vector<2x8x64xf32> -> vector<2x8x64xf32>
    "tpu.trace_stop"() : () -> ()
    %55 = vector.extract_strided_slice %51 {offsets = [1, 0, 0, 0], sizes = [1, 2, 8, 8], strides = [1, 1, 1, 1]} : vector<2x2x8x8xbf16> to vector<1x2x8x8xbf16>
    %56 = vector.shape_cast %55 : vector<1x2x8x8xbf16> to vector<2x8x8xbf16>
    "tpu.trace_start"() <{level = 10 : i32, message = "bqk,bkd->bqd"}> : () -> ()
    %cst_16 = arith.constant dense<0.000000e+00> : vector<2x8x64xf32>
    %57 = tpu.matmul %56, %31, %cst_16 {dimension_numbers = #tpu.dot_dimension_numbers<[2], [1], [1], [2], [0, 0, 0, 1, 1, 2], [0], [0]>} : vector<2x8x8xbf16>, vector<2x8x64xbf16>, vector<2x8x64xf32> -> vector<2x8x64xf32>
    "tpu.trace_stop"() : () -> ()
    %58 = tpu.concatenate %54, %57 in 2 : vector<2x8x64xf32>, vector<2x8x64xf32> -> vector<2x8x128xf32>
    %59 = vector.shape_cast %58 : vector<2x8x128xf32> to vector<16x128xf32>
    %60 = arith.truncf %59 : vector<16x128xf32> to vector<16x128xbf16>
    %c0_17 = arith.constant 0 : index
    %c0_18 = arith.constant 0 : index
    %c0_19 = arith.constant 0 : index
    %61 = vector.load %arg12[%c0_17, %c0_18, %c0_19] : memref<1x128x128xbf16, #tpu.memory_space<vmem>>, vector<1x128x128xbf16>
    %62 = vector.shape_cast %61 : vector<1x128x128xbf16> to vector<128x128xbf16>
    %cst_20 = arith.constant dense<0.000000e+00> : vector<16x128xf32>
    %63 = tpu.matmul %60, %62, %cst_20 {dimension_numbers = #tpu.dot_dimension_numbers<[1], [0], [0], [1], [0, 0, 1, 1], [], []>} : vector<16x128xbf16>, vector<128x128xbf16>, vector<16x128xf32> -> vector<16x128xf32>
    %c0_21 = arith.constant 0 : index
    %c0_22 = arith.constant 0 : index
    %c0_23 = arith.constant 0 : index
    %64 = vector.load %arg13[%c0_21, %c0_22, %c0_23] : memref<1x1x128xf32, #tpu.memory_space<vmem>>, vector<1x1x128xf32>
    %65 = vector.shape_cast %64 : vector<1x1x128xf32> to vector<1x128xf32>
    %66 = vector.broadcast %65 : vector<1x128xf32> to vector<16x128xf32>
    %67 = arith.addf %63, %66 : vector<16x128xf32>
    %68 = arith.truncf %67 : vector<16x128xf32> to vector<16x128xbf16>
    %c0_24 = arith.constant 0 : index
    %c0_25 = arith.constant 0 : index
    %c0_26 = arith.constant 0 : index
    %69 = vector.load %arg14[%c0_24, %c0_25, %c0_26] : memref<1x128x128xbf16, #tpu.memory_space<vmem>>, vector<1x128x128xbf16>
    %70 = vector.shape_cast %69 : vector<1x128x128xbf16> to vector<128x128xbf16>
    %cst_27 = arith.constant dense<0.000000e+00> : vector<16x128xf32>
    %71 = tpu.matmul %68, %70, %cst_27 {dimension_numbers = #tpu.dot_dimension_numbers<[1], [0], [0], [1], [0, 0, 1, 1], [], []>} : vector<16x128xbf16>, vector<128x128xbf16>, vector<16x128xf32> -> vector<16x128xf32>
    %c0_28 = arith.constant 0 : index
    %c0_29 = arith.constant 0 : index
    %c0_30 = arith.constant 0 : index
    %72 = vector.load %arg15[%c0_28, %c0_29, %c0_30] : memref<1x1x128xf32, #tpu.memory_space<vmem>>, vector<1x1x128xf32>
    %73 = vector.shape_cast %72 : vector<1x1x128xf32> to vector<1x128xf32>
    %74 = vector.broadcast %73 : vector<1x128xf32> to vector<16x128xf32>
    %75 = arith.addf %71, %74 : vector<16x128xf32>
    %76 = arith.mulf %75, %75 : vector<16x128xf32>
    %77 = arith.mulf %75, %76 : vector<16x128xf32>
    %cst_31 = arith.constant 4.471500e-02 : f32
    %78 = vector.broadcast %cst_31 : f32 to vector<16x128xf32>
    %79 = arith.mulf %78, %77 : vector<16x128xf32>
    %80 = arith.addf %75, %79 : vector<16x128xf32>
    %cst_32 = arith.constant 0.797884583 : f32
    %81 = vector.broadcast %cst_32 : f32 to vector<16x128xf32>
    %82 = arith.mulf %81, %80 : vector<16x128xf32>
    %83 = math.tanh %82 : vector<16x128xf32>
    %cst_33 = arith.constant 1.000000e+00 : f32
    %84 = vector.broadcast %cst_33 : f32 to vector<16x128xf32>
    %85 = arith.addf %84, %83 : vector<16x128xf32>
    %cst_34 = arith.constant 5.000000e-01 : f32
    %86 = vector.broadcast %cst_34 : f32 to vector<16x128xf32>
    %87 = arith.mulf %86, %85 : vector<16x128xf32>
    %88 = arith.mulf %75, %87 : vector<16x128xf32>
    %89 = arith.truncf %88 : vector<16x128xf32> to vector<16x128xbf16>
    %c0_35 = arith.constant 0 : index
    %c0_36 = arith.constant 0 : index
    %c0_37 = arith.constant 0 : index
    %90 = vector.load %arg16[%c0_35, %c0_36, %c0_37] : memref<1x128x128xbf16, #tpu.memory_space<vmem>>, vector<1x128x128xbf16>
    %91 = vector.shape_cast %90 : vector<1x128x128xbf16> to vector<128x128xbf16>
    %cst_38 = arith.constant dense<0.000000e+00> : vector<16x128xf32>
    %92 = tpu.matmul %89, %91, %cst_38 {dimension_numbers = #tpu.dot_dimension_numbers<[1], [0], [0], [1], [0, 0, 1, 1], [], []>} : vector<16x128xbf16>, vector<128x128xbf16>, vector<16x128xf32> -> vector<16x128xf32>
    %c0_39 = arith.constant 0 : index
    %c0_40 = arith.constant 0 : index
    %c0_41 = arith.constant 0 : index
    %93 = vector.load %arg17[%c0_39, %c0_40, %c0_41] : memref<1x1x128xf32, #tpu.memory_space<vmem>>, vector<1x1x128xf32>
    %94 = vector.shape_cast %93 : vector<1x1x128xf32> to vector<1x128xf32>
    %95 = vector.broadcast %94 : vector<1x128xf32> to vector<16x128xf32>
    %96 = arith.addf %92, %95 : vector<16x128xf32>
    %97 = arith.addf %67, %96 : vector<16x128xf32>
    %98 = arith.addf %3, %97 : vector<16x128xf32>
    %c0_42 = arith.constant 0 : index
    %c0_43 = arith.constant 0 : index
    %c0_44 = arith.constant 0 : index
    %99 = vector.load %arg18[%c0_42, %c0_43, %c0_44] : memref<1x1x128xf32, #tpu.memory_space<vmem>>, vector<1x1x128xf32>
    %100 = vector.shape_cast %99 : vector<1x1x128xf32> to vector<1x128xf32>
    %c0_45 = arith.constant 0 : index
    %c0_46 = arith.constant 0 : index
    %c0_47 = arith.constant 0 : index
    %101 = vector.load %arg19[%c0_45, %c0_46, %c0_47] : memref<1x1x128xf32, #tpu.memory_space<vmem>>, vector<1x1x128xf32>
    %102 = vector.shape_cast %101 : vector<1x1x128xf32> to vector<1x128xf32>
    %cst_48 = arith.constant dense<0.000000e+00> : vector<16xf32>
    %103 = vector.multi_reduction <add>, %98, %cst_48 [1] : vector<16x128xf32> to vector<16xf32>
    %104 = vector.shape_cast %103 : vector<16xf32> to vector<16x1xf32>
    %cst_49 = arith.constant 1.280000e+02 : f32
    %105 = vector.broadcast %cst_49 : f32 to vector<16x1xf32>
    %106 = arith.divf %104, %105 : vector<16x1xf32>
    %107 = vector.broadcast %106 : vector<16x1xf32> to vector<16x128xf32>
    %108 = arith.subf %98, %107 : vector<16x128xf32>
    %109 = arith.mulf %108, %108 : vector<16x128xf32>
    %cst_50 = arith.constant dense<0.000000e+00> : vector<16xf32>
    %110 = vector.multi_reduction <add>, %109, %cst_50 [1] : vector<16x128xf32> to vector<16xf32>
    %111 = vector.shape_cast %110 : vector<16xf32> to vector<16x1xf32>
    %cst_51 = arith.constant 1.280000e+02 : f32
    %112 = vector.broadcast %cst_51 : f32 to vector<16x1xf32>
    %113 = arith.divf %111, %112 : vector<16x1xf32>
    %114 = vector.broadcast %106 : vector<16x1xf32> to vector<16x128xf32>
    %115 = arith.subf %98, %114 : vector<16x128xf32>
    %cst_52 = arith.constant 1.000000e-07 : f32
    %116 = vector.broadcast %cst_52 : f32 to vector<16x1xf32>
    %117 = arith.addf %113, %116 : vector<16x1xf32>
    %118 = math.rsqrt %117 : vector<16x1xf32>
    %119 = vector.broadcast %118 : vector<16x1xf32> to vector<16x128xf32>
    %120 = arith.mulf %115, %119 : vector<16x128xf32>
    %121 = vector.broadcast %100 : vector<1x128xf32> to vector<16x128xf32>
    %122 = arith.mulf %120, %121 : vector<16x128xf32>
    %123 = vector.broadcast %102 : vector<1x128xf32> to vector<16x128xf32>
    %124 = arith.addf %122, %123 : vector<16x128xf32>
    %125 = arith.truncf %124 : vector<16x128xf32> to vector<16x128xbf16>
    %c0_53 = arith.constant 0 : index
    %c0_54 = arith.constant 0 : index
    %c0_55 = arith.constant 0 : index
    %126 = vector.load %arg20[%c0_53, %c0_54, %c0_55] : memref<1x128x512xbf16, #tpu.memory_space<vmem>>, vector<1x128x512xbf16>
    %127 = vector.shape_cast %126 : vector<1x128x512xbf16> to vector<128x512xbf16>
    %cst_56 = arith.constant dense<0.000000e+00> : vector<16x512xf32>
    %128 = tpu.matmul %125, %127, %cst_56 {dimension_numbers = #tpu.dot_dimension_numbers<[1], [0], [0], [1], [0, 0, 1, 1], [], []>} : vector<16x128xbf16>, vector<128x512xbf16>, vector<16x512xf32> -> vector<16x512xf32>
    %c0_57 = arith.constant 0 : index
    %c0_58 = arith.constant 0 : index
    %c0_59 = arith.constant 0 : index
    %129 = vector.load %arg21[%c0_57, %c0_58, %c0_59] : memref<1x1x512xf32, #tpu.memory_space<vmem>>, vector<1x1x512xf32>
    %130 = vector.shape_cast %129 : vector<1x1x512xf32> to vector<1x512xf32>
    %131 = vector.broadcast %130 : vector<1x512xf32> to vector<16x512xf32>
    %132 = arith.addf %128, %131 : vector<16x512xf32>
    %133 = arith.mulf %132, %132 : vector<16x512xf32>
    %134 = arith.mulf %132, %133 : vector<16x512xf32>
    %cst_60 = arith.constant 4.471500e-02 : f32
    %135 = vector.broadcast %cst_60 : f32 to vector<16x512xf32>
    %136 = arith.mulf %135, %134 : vector<16x512xf32>
    %137 = arith.addf %132, %136 : vector<16x512xf32>
    %cst_61 = arith.constant 0.797884583 : f32
    %138 = vector.broadcast %cst_61 : f32 to vector<16x512xf32>
    %139 = arith.mulf %138, %137 : vector<16x512xf32>
    %140 = math.tanh %139 : vector<16x512xf32>
    %cst_62 = arith.constant 1.000000e+00 : f32
    %141 = vector.broadcast %cst_62 : f32 to vector<16x512xf32>
    %142 = arith.addf %141, %140 : vector<16x512xf32>
    %cst_63 = arith.constant 5.000000e-01 : f32
    %143 = vector.broadcast %cst_63 : f32 to vector<16x512xf32>
    %144 = arith.mulf %143, %142 : vector<16x512xf32>
    %145 = arith.mulf %132, %144 : vector<16x512xf32>
    %146 = arith.truncf %145 : vector<16x512xf32> to vector<16x512xbf16>
    %c0_64 = arith.constant 0 : index
    %c0_65 = arith.constant 0 : index
    %c0_66 = arith.constant 0 : index
    %147 = vector.load %arg22[%c0_64, %c0_65, %c0_66] : memref<1x512x128xbf16, #tpu.memory_space<vmem>>, vector<1x512x128xbf16>
    %148 = vector.shape_cast %147 : vector<1x512x128xbf16> to vector<512x128xbf16>
    %cst_67 = arith.constant dense<0.000000e+00> : vector<16x128xf32>
    %149 = tpu.matmul %146, %148, %cst_67 {dimension_numbers = #tpu.dot_dimension_numbers<[1], [0], [0], [1], [0, 0, 1, 1], [], []>} : vector<16x512xbf16>, vector<512x128xbf16>, vector<16x128xf32> -> vector<16x128xf32>
    %c0_68 = arith.constant 0 : index
    %c0_69 = arith.constant 0 : index
    %c0_70 = arith.constant 0 : index
    %150 = vector.load %arg23[%c0_68, %c0_69, %c0_70] : memref<1x1x128xf32, #tpu.memory_space<vmem>>, vector<1x1x128xf32>
    %151 = vector.shape_cast %150 : vector<1x1x128xf32> to vector<1x128xf32>
    %152 = vector.broadcast %151 : vector<1x128xf32> to vector<16x128xf32>
    %153 = arith.addf %149, %152 : vector<16x128xf32>
    %154 = arith.truncf %153 : vector<16x128xf32> to vector<16x128xbf16>
    %c0_71 = arith.constant 0 : index
    %c0_72 = arith.constant 0 : index
    %c0_73 = arith.constant 0 : index
    %155 = vector.load %arg24[%c0_71, %c0_72, %c0_73] : memref<1x128x128xbf16, #tpu.memory_space<vmem>>, vector<1x128x128xbf16>
    %156 = vector.shape_cast %155 : vector<1x128x128xbf16> to vector<128x128xbf16>
    %cst_74 = arith.constant dense<0.000000e+00> : vector<16x128xf32>
    %157 = tpu.matmul %154, %156, %cst_74 {dimension_numbers = #tpu.dot_dimension_numbers<[1], [0], [0], [1], [0, 0, 1, 1], [], []>} : vector<16x128xbf16>, vector<128x128xbf16>, vector<16x128xf32> -> vector<16x128xf32>
    %c0_75 = arith.constant 0 : index
    %c0_76 = arith.constant 0 : index
    %c0_77 = arith.constant 0 : index
    %158 = vector.load %arg25[%c0_75, %c0_76, %c0_77] : memref<1x1x128xf32, #tpu.memory_space<vmem>>, vector<1x1x128xf32>
    %159 = vector.shape_cast %158 : vector<1x1x128xf32> to vector<1x128xf32>
    %160 = vector.broadcast %159 : vector<1x128xf32> to vector<16x128xf32>
    %161 = arith.addf %157, %160 : vector<16x128xf32>
    %162 = arith.mulf %161, %161 : vector<16x128xf32>
    %163 = arith.mulf %161, %162 : vector<16x128xf32>
    %cst_78 = arith.constant 4.471500e-02 : f32
    %164 = vector.broadcast %cst_78 : f32 to vector<16x128xf32>
    %165 = arith.mulf %164, %163 : vector<16x128xf32>
    %166 = arith.addf %161, %165 : vector<16x128xf32>
    %cst_79 = arith.constant 0.797884583 : f32
    %167 = vector.broadcast %cst_79 : f32 to vector<16x128xf32>
    %168 = arith.mulf %167, %166 : vector<16x128xf32>
    %169 = math.tanh %168 : vector<16x128xf32>
    %cst_80 = arith.constant 1.000000e+00 : f32
    %170 = vector.broadcast %cst_80 : f32 to vector<16x128xf32>
    %171 = arith.addf %170, %169 : vector<16x128xf32>
    %cst_81 = arith.constant 5.000000e-01 : f32
    %172 = vector.broadcast %cst_81 : f32 to vector<16x128xf32>
    %173 = arith.mulf %172, %171 : vector<16x128xf32>
    %174 = arith.mulf %161, %173 : vector<16x128xf32>
    %175 = arith.truncf %174 : vector<16x128xf32> to vector<16x128xbf16>
    %c0_82 = arith.constant 0 : index
    %c0_83 = arith.constant 0 : index
    %c0_84 = arith.constant 0 : index
    %176 = vector.load %arg26[%c0_82, %c0_83, %c0_84] : memref<1x128x128xbf16, #tpu.memory_space<vmem>>, vector<1x128x128xbf16>
    %177 = vector.shape_cast %176 : vector<1x128x128xbf16> to vector<128x128xbf16>
    %cst_85 = arith.constant dense<0.000000e+00> : vector<16x128xf32>
    %178 = tpu.matmul %175, %177, %cst_85 {dimension_numbers = #tpu.dot_dimension_numbers<[1], [0], [0], [1], [0, 0, 1, 1], [], []>} : vector<16x128xbf16>, vector<128x128xbf16>, vector<16x128xf32> -> vector<16x128xf32>
    %c0_86 = arith.constant 0 : index
    %c0_87 = arith.constant 0 : index
    %c0_88 = arith.constant 0 : index
    %179 = vector.load %arg27[%c0_86, %c0_87, %c0_88] : memref<1x1x128xf32, #tpu.memory_space<vmem>>, vector<1x1x128xf32>
    %180 = vector.shape_cast %179 : vector<1x1x128xf32> to vector<1x128xf32>
    %181 = vector.broadcast %180 : vector<1x128xf32> to vector<16x128xf32>
    %182 = arith.addf %178, %181 : vector<16x128xf32>
    %183 = arith.addf %153, %182 : vector<16x128xf32>
    %184 = arith.addf %124, %183 : vector<16x128xf32>
    %c0_89 = arith.constant 0 : index
    %c0_90 = arith.constant 0 : index
    %c0_91 = arith.constant 0 : index
    %185 = vector.load %arg28[%c0_89, %c0_90, %c0_91] : memref<1x1x128xf32, #tpu.memory_space<vmem>>, vector<1x1x128xf32>
    %186 = vector.shape_cast %185 : vector<1x1x128xf32> to vector<1x128xf32>
    %c0_92 = arith.constant 0 : index
    %c0_93 = arith.constant 0 : index
    %c0_94 = arith.constant 0 : index
    %187 = vector.load %arg29[%c0_92, %c0_93, %c0_94] : memref<1x1x128xf32, #tpu.memory_space<vmem>>, vector<1x1x128xf32>
    %188 = vector.shape_cast %187 : vector<1x1x128xf32> to vector<1x128xf32>
    %cst_95 = arith.constant dense<0.000000e+00> : vector<16xf32>
    %189 = vector.multi_reduction <add>, %184, %cst_95 [1] : vector<16x128xf32> to vector<16xf32>
    %190 = vector.shape_cast %189 : vector<16xf32> to vector<16x1xf32>
    %cst_96 = arith.constant 1.280000e+02 : f32
    %191 = vector.broadcast %cst_96 : f32 to vector<16x1xf32>
    %192 = arith.divf %190, %191 : vector<16x1xf32>
    %193 = vector.broadcast %192 : vector<16x1xf32> to vector<16x128xf32>
    %194 = arith.subf %184, %193 : vector<16x128xf32>
    %195 = arith.mulf %194, %194 : vector<16x128xf32>
    %cst_97 = arith.constant dense<0.000000e+00> : vector<16xf32>
    %196 = vector.multi_reduction <add>, %195, %cst_97 [1] : vector<16x128xf32> to vector<16xf32>
    %197 = vector.shape_cast %196 : vector<16xf32> to vector<16x1xf32>
    %cst_98 = arith.constant 1.280000e+02 : f32
    %198 = vector.broadcast %cst_98 : f32 to vector<16x1xf32>
    %199 = arith.divf %197, %198 : vector<16x1xf32>
    %200 = vector.broadcast %192 : vector<16x1xf32> to vector<16x128xf32>
    %201 = arith.subf %184, %200 : vector<16x128xf32>
    %cst_99 = arith.constant 1.000000e-07 : f32
    %202 = vector.broadcast %cst_99 : f32 to vector<16x1xf32>
    %203 = arith.addf %199, %202 : vector<16x1xf32>
    %204 = math.rsqrt %203 : vector<16x1xf32>
    %205 = vector.broadcast %204 : vector<16x1xf32> to vector<16x128xf32>
    %206 = arith.mulf %201, %205 : vector<16x128xf32>
    %207 = vector.broadcast %186 : vector<1x128xf32> to vector<16x128xf32>
    %208 = arith.mulf %206, %207 : vector<16x128xf32>
    %209 = vector.broadcast %188 : vector<1x128xf32> to vector<16x128xf32>
    %210 = arith.addf %208, %209 : vector<16x128xf32>
    %c0_100 = arith.constant 0 : index
    %c0_101 = arith.constant 0 : index
    %211 = vector.load %arg32[%c0_100, %c0_101] : memref<16x128xf32, #tpu.memory_space<vmem>>, vector<16x128xf32>
    tpu.vector_store %arg32[%c0_100, %c0_101], %210 {strides = array<i32>} : memref<16x128xf32, #tpu.memory_space<vmem>>, vector<16x128xf32>,
    %c1_i32 = arith.constant 1 : i32
    %212 = arith.cmpi eq, %arg0, %c1_i32 : i32
    %213 = arith.extui %212 : i1 to i32
    %c0_i32_102 = arith.constant 0 : i32
    %214 = arith.cmpi ne, %213, %c0_i32_102 : i32
    scf.if %214 {
      %215 = arith.truncf %210 : vector<16x128xf32> to vector<16x128xbf16>
      %c0_103 = arith.constant 0 : index
      %c0_104 = arith.constant 0 : index
      %216 = vector.load %arg8[%c0_103, %c0_104] : memref<128x128xbf16, #tpu.memory_space<vmem>>, vector<128x128xbf16>
      %cst_105 = arith.constant dense<0.000000e+00> : vector<16x128xf32>
      %217 = tpu.matmul %215, %216, %cst_105 {dimension_numbers = #tpu.dot_dimension_numbers<[1], [0], [0], [1], [0, 0, 1, 1], [], []>} : vector<16x128xbf16>, vector<128x128xbf16>, vector<16x128xf32> -> vector<16x128xf32>
      %c0_106 = arith.constant 0 : index
      %c0_107 = arith.constant 0 : index
      %218 = vector.load %arg9[%c0_106, %c0_107] : memref<1x128xf32, #tpu.memory_space<vmem>>, vector<1x128xf32>
      %219 = vector.broadcast %218 : vector<1x128xf32> to vector<16x128xf32>
      %220 = arith.addf %217, %219 : vector<16x128xf32>
      %c0_108 = arith.constant 0 : index
      %c0_109 = arith.constant 0 : index
      %221 = vector.load %arg30[%c0_108, %c0_109] : memref<16x128xf32, #tpu.memory_space<vmem>>, vector<16x128xf32>
      tpu.vector_store %arg30[%c0_108, %c0_109], %220 {strides = array<i32>} : memref<16x128xf32, #tpu.memory_space<vmem>>, vector<16x128xf32>,
      %222 = tpu.iota {dimensions = array<i32: 1>} : vector<16x128xi32>
      %c8_i32 = arith.constant 8 : i32
      %223 = vector.broadcast %c8_i32 : i32 to vector<16x128xi32>
      %224 = arith.cmpi slt, %222, %223 : vector<16x128xi32>
      %cst_110 = arith.constant -1.000000e+09 : f32
      %225 = vector.broadcast %cst_110 : f32 to vector<16x128xf32>
      %226 = arith.select %224, %220, %225 : vector<16x128xi1>, vector<16x128xf32>
      %cst_111 = arith.constant dense<0xFF800000> : vector<16xf32>
      %227 = vector.multi_reduction <maximumf>, %226, %cst_111 [1] : vector<16x128xf32> to vector<16xf32>
      %228 = vector.shape_cast %227 : vector<16xf32> to vector<16x1xf32>
      %229 = vector.broadcast %228 : vector<16x1xf32> to vector<16x128xf32>
      %230 = arith.subf %226, %229 : vector<16x128xf32>
      %231 = math.exp %230 : vector<16x128xf32>
      %cst_112 = arith.constant dense<0.000000e+00> : vector<16xf32>
      %232 = vector.multi_reduction <add>, %231, %cst_112 [1] : vector<16x128xf32> to vector<16xf32>
      %233 = vector.shape_cast %232 : vector<16xf32> to vector<16x1xf32>
      %234 = math.log %233 : vector<16x1xf32>
      %235 = arith.addf %234, %228 : vector<16x1xf32>
      %236 = vector.broadcast %235 : vector<16x1xf32> to vector<16x128xf32>
      %237 = arith.subf %226, %236 : vector<16x128xf32>
      %c0_113 = arith.constant 0 : index
      %c0_114 = arith.constant 0 : index
      %238 = vector.load %arg4[%c0_113, %c0_114] : memref<16x1xi32, #tpu.memory_space<vmem>>, vector<16x1xi32>
      %c0_115 = arith.constant 0 : index
      %c0_116 = arith.constant 0 : index
      %239 = vector.load %arg3[%c0_115, %c0_116] : memref<16x1xf32, #tpu.memory_space<vmem>>, vector<16x1xf32>
      %cst_117 = arith.constant 1.000000e+00 : f32
      %240 = vector.broadcast %cst_117 : f32 to vector<16x1xf32>
      %241 = arith.cmpf oeq, %239, %240 : vector<16x1xf32>
      %c-100_i32 = arith.constant -100 : i32
      %242 = vector.broadcast %c-100_i32 : i32 to vector<16x1xi32>
      %243 = arith.select %241, %238, %242 : vector<16x1xi1>, vector<16x1xi32>
      %244 = vector.broadcast %243 : vector<16x1xi32> to vector<16x128xi32>
      %245 = arith.cmpi eq, %244, %222 : vector<16x128xi32>
      %246 = arith.extui %245 : vector<16x128xi1> to vector<16x128xi32>
      %247 = arith.sitofp %246 : vector<16x128xi32> to vector<16x128xf32>
      %248 = arith.mulf %247, %237 : vector<16x128xf32>
      %cst_118 = arith.constant dense<0.000000e+00> : vector<16xf32>
      %249 = vector.multi_reduction <add>, %248, %cst_118 [1] : vector<16x128xf32> to vector<16xf32>
      %250 = vector.shape_cast %249 : vector<16xf32> to vector<16x1xf32>
      %cst_119 = arith.constant 0.000000e+00 : f32
      %251 = vector.broadcast %cst_119 : f32 to vector<16x1xf32>
      %252 = arith.subf %251, %250 : vector<16x1xf32>
      %c-100_i32_120 = arith.constant -100 : i32
      %253 = vector.broadcast %c-100_i32_120 : i32 to vector<16x1xi32>
      %254 = arith.cmpi ne, %243, %253 : vector<16x1xi32>
      %255 = arith.extui %254 : vector<16x1xi1> to vector<16x1xi32>
      %256 = arith.sitofp %255 : vector<16x1xi32> to vector<16x1xf32>
      %257 = vector.shape_cast %256 : vector<16x1xf32> to vector<1x16x1xf32>
      %cst_121 = arith.constant dense<0.000000e+00> : vector<1xf32>
      %258 = vector.multi_reduction <add>, %257, %cst_121 [1, 2] : vector<1x16x1xf32> to vector<1xf32>
      %259 = vector.shape_cast %258 : vector<1xf32> to vector<1x1x1xf32>
      %260 = vector.extract %259[0, 0, 0] : f32 from vector<1x1x1xf32>
      %cst_122 = arith.constant 1.000000e+00 : f32
      %261 = arith.maximumf %260, %cst_122 : f32
      %262 = arith.mulf %252, %256 : vector<16x1xf32>
      %263 = vector.shape_cast %262 : vector<16x1xf32> to vector<1x16x1xf32>
      %cst_123 = arith.constant dense<0.000000e+00> : vector<1xf32>
      %264 = vector.multi_reduction <add>, %263, %cst_123 [1, 2] : vector<1x16x1xf32> to vector<1xf32>
      %265 = vector.shape_cast %264 : vector<1xf32> to vector<1x1x1xf32>
      %266 = vector.extract %265[0, 0, 0] : f32 from vector<1x1x1xf32>
      %267 = arith.divf %266, %261 : f32
      %c0_124 = arith.constant 0 : index
      %c0_125 = arith.constant 0 : index
      %268 = memref.load %arg31[%c0_124, %c0_125] : memref<1x1xf32, #tpu.memory_space<smem>>
      memref.store %267, %arg31[%c0_124, %c0_125] : memref<1x1xf32, #tpu.memory_space<smem>>
    } else {
    }
    return
  }
  func.func @transform_0(%arg0: i32) -> (i32, i32) {
    %c0_i32 = arith.constant 0 : i32
    %c0_i32_0 = arith.constant 0 : i32
    %c0_i32_1 = arith.constant 0 : i32
    return %c0_i32, %c0_i32_0 : i32, i32
  }
  func.func @transform_1(%arg0: i32) -> (i32, i32) {
    %c0_i32 = arith.constant 0 : i32
    %c0_i32_0 = arith.constant 0 : i32
    %c0_i32_1 = arith.constant 0 : i32
    return %c0_i32, %c0_i32_0 : i32, i32
  }
  func.func @transform_2(%arg0: i32) -> (i32, i32) {
    %c0_i32 = arith.constant 0 : i32
    %c0_i32_0 = arith.constant 0 : i32
    %c0_i32_1 = arith.constant 0 : i32
    return %c0_i32, %c0_i32_0 : i32, i32
  }
  func.func @transform_3(%arg0: i32) -> (i32, i32) {
    %c0_i32 = arith.constant 0 : i32
    %c0_i32_0 = arith.constant 0 : i32
    %c0_i32_1 = arith.constant 0 : i32
    return %c0_i32, %c0_i32_0 : i32, i32
  }
  func.func @transform_4(%arg0: i32) -> (i32, i32) {
    %c0_i32 = arith.constant 0 : i32
    %c0_i32_0 = arith.constant 0 : i32
    %c0_i32_1 = arith.constant 0 : i32
    return %c0_i32, %c0_i32_0 : i32, i32
  }
  func.func @transform_5(%arg0: i32) -> (i32, i32) {
    %c0_i32 = arith.constant 0 : i32
    %c0_i32_0 = arith.constant 0 : i32
    %c0_i32_1 = arith.constant 0 : i32
    return %c0_i32, %c0_i32_0 : i32, i32
  }
  func.func @transform_6(%arg0: i32) -> (i32, i32) {
    %c0_i32 = arith.constant 0 : i32
    %c0_i32_0 = arith.constant 0 : i32
    %c0_i32_1 = arith.constant 0 : i32
    return %c0_i32, %c0_i32_0 : i32, i32
  }
  func.func @transform_7(%arg0: i32) -> (i32, i32) {
    %c0_i32 = arith.constant 0 : i32
    %c0_i32_0 = arith.constant 0 : i32
    %c0_i32_1 = arith.constant 0 : i32
    return %c0_i32, %c0_i32_0 : i32, i32
  }
  func.func @transform_8(%arg0: i32) -> (i32, i32) {
    %c0_i32 = arith.constant 0 : i32
    %c0_i32_0 = arith.constant 0 : i32
    %c0_i32_1 = arith.constant 0 : i32
    return %c0_i32, %c0_i32_0 : i32, i32
  }
  func.func @transform_9(%arg0: i32) -> (i32, i32, i32) {
    %c0_i32 = arith.constant 0 : i32
    %c0_i32_0 = arith.constant 0 : i32
    %c0_i32_1 = arith.constant 0 : i32
    return %arg0, %c0_i32, %c0_i32_0 : i32, i32, i32
  }
  func.func @transform_10(%arg0: i32) -> (i32, i32, i32) {
    %c0_i32 = arith.constant 0 : i32
    %c0_i32_0 = arith.constant 0 : i32
    %c0_i32_1 = arith.constant 0 : i32
    return %arg0, %c0_i32, %c0_i32_0 : i32, i32, i32
  }
  func.func @transform_11(%arg0: i32) -> (i32, i32, i32) {
    %c0_i32 = arith.constant 0 : i32
    %c0_i32_0 = arith.constant 0 : i32
    %c0_i32_1 = arith.constant 0 : i32
    return %arg0, %c0_i32, %c0_i32_0 : i32, i32, i32
  }
  func.func @transform_12(%arg0: i32) -> (i32, i32, i32) {
    %c0_i32 = arith.constant 0 : i32
    %c0_i32_0 = arith.constant 0 : i32
    %c0_i32_1 = arith.constant 0 : i32
    return %arg0, %c0_i32, %c0_i32_0 : i32, i32, i32
  }
  func.func @transform_13(%arg0: i32) -> (i32, i32, i32) {
    %c0_i32 = arith.constant 0 : i32
    %c0_i32_0 = arith.constant 0 : i32
    %c0_i32_1 = arith.constant 0 : i32
    return %arg0, %c0_i32, %c0_i32_0 : i32, i32, i32
  }
  func.func @transform_14(%arg0: i32) -> (i32, i32, i32) {
    %c0_i32 = arith.constant 0 : i32
    %c0_i32_0 = arith.constant 0 : i32
    %c0_i32_1 = arith.constant 0 : i32
    return %arg0, %c0_i32, %c0_i32_0 : i32, i32, i32
  }
  func.func @transform_15(%arg0: i32) -> (i32, i32, i32) {
    %c0_i32 = arith.constant 0 : i32
    %c0_i32_0 = arith.constant 0 : i32
    %c0_i32_1 = arith.constant 0 : i32
    return %arg0, %c0_i32, %c0_i32_0 : i32, i32, i32
  }
  func.func @transform_16(%arg0: i32) -> (i32, i32, i32) {
    %c0_i32 = arith.constant 0 : i32
    %c0_i32_0 = arith.constant 0 : i32
    %c0_i32_1 = arith.constant 0 : i32
    return %arg0, %c0_i32, %c0_i32_0 : i32, i32, i32
  }
  func.func @transform_17(%arg0: i32) -> (i32, i32, i32) {
    %c0_i32 = arith.constant 0 : i32
    %c0_i32_0 = arith.constant 0 : i32
    %c0_i32_1 = arith.constant 0 : i32
    return %arg0, %c0_i32, %c0_i32_0 : i32, i32, i32
  }
  func.func @transform_18(%arg0: i32) -> (i32, i32, i32) {
    %c0_i32 = arith.constant 0 : i32
    %c0_i32_0 = arith.constant 0 : i32
    %c0_i32_1 = arith.constant 0 : i32
    return %arg0, %c0_i32, %c0_i32_0 : i32, i32, i32
  }
  func.func @transform_19(%arg0: i32) -> (i32, i32, i32) {
    %c0_i32 = arith.constant 0 : i32
    %c0_i32_0 = arith.constant 0 : i32
    %c0_i32_1 = arith.constant 0 : i32
    return %arg0, %c0_i32, %c0_i32_0 : i32, i32, i32
  }
  func.func @transform_20(%arg0: i32) -> (i32, i32, i32) {
    %c0_i32 = arith.constant 0 : i32
    %c0_i32_0 = arith.constant 0 : i32
    %c0_i32_1 = arith.constant 0 : i32
    return %arg0, %c0_i32, %c0_i32_0 : i32, i32, i32
  }
  func.func @transform_21(%arg0: i32) -> (i32, i32, i32) {
    %c0_i32 = arith.constant 0 : i32
    %c0_i32_0 = arith.constant 0 : i32
    %c0_i32_1 = arith.constant 0 : i32
    return %arg0, %c0_i32, %c0_i32_0 : i32, i32, i32
  }
  func.func @transform_22(%arg0: i32) -> (i32, i32, i32) {
    %c0_i32 = arith.constant 0 : i32
    %c0_i32_0 = arith.constant 0 : i32
    %c0_i32_1 = arith.constant 0 : i32
    return %arg0, %c0_i32, %c0_i32_0 : i32, i32, i32
  }
  func.func @transform_23(%arg0: i32) -> (i32, i32, i32) {
    %c0_i32 = arith.constant 0 : i32
    %c0_i32_0 = arith.constant 0 : i32
    %c0_i32_1 = arith.constant 0 : i32
    return %arg0, %c0_i32, %c0_i32_0 : i32, i32, i32
  }
  func.func @transform_24(%arg0: i32) -> (i32, i32, i32) {
    %c0_i32 = arith.constant 0 : i32
    %c0_i32_0 = arith.constant 0 : i32
    %c0_i32_1 = arith.constant 0 : i32
    return %arg0, %c0_i32, %c0_i32_0 : i32, i32, i32
  }
  func.func @transform_25(%arg0: i32) -> (i32, i32, i32) {
    %c0_i32 = arith.constant 0 : i32
    %c0_i32_0 = arith.constant 0 : i32
    %c0_i32_1 = arith.constant 0 : i32
    return %arg0, %c0_i32, %c0_i32_0 : i32, i32, i32
  }
  func.func @transform_26(%arg0: i32) -> (i32, i32, i32) {
    %c0_i32 = arith.constant 0 : i32
    %c0_i32_0 = arith.constant 0 : i32
    %c0_i32_1 = arith.constant 0 : i32
    return %arg0, %c0_i32, %c0_i32_0 : i32, i32, i32
  }
  func.func @transform_27(%arg0: i32) -> (i32, i32, i32) {
    %c0_i32 = arith.constant 0 : i32
    %c0_i32_0 = arith.constant 0 : i32
    %c0_i32_1 = arith.constant 0 : i32
    return %arg0, %c0_i32, %c0_i32_0 : i32, i32, i32
  }
  func.func @transform_28(%arg0: i32) -> (i32, i32, i32) {
    %c0_i32 = arith.constant 0 : i32
    %c0_i32_0 = arith.constant 0 : i32
    %c0_i32_1 = arith.constant 0 : i32
    return %arg0, %c0_i32, %c0_i32_0 : i32, i32, i32
  }
  func.func @transform_29(%arg0: i32) -> (i32, i32) {
    %c0_i32 = arith.constant 0 : i32
    %c0_i32_0 = arith.constant 0 : i32
    %c0_i32_1 = arith.constant 0 : i32
    return %c0_i32, %c0_i32_0 : i32, i32
  }
  func.func @transform_30(%arg0: i32) -> (i32, i32) {
    %c0_i32 = arith.constant 0 : i32
    %c0_i32_0 = arith.constant 0 : i32
    %c0_i32_1 = arith.constant 0 : i32
    return %c0_i32, %c0_i32_0 : i32, i32
  }
}

</mosaic_0001>

<bundles_post_ra>
// kernel: custom_bert_forward.1
= control target key start
LH: loop header
LB: loop body
LE: loop exit
PB: predicated region body
PF: predicated region fallthrough
CT: control target
= control target key end

     0   :  { %s5993_s6 = smov 1   ;;  %s5994_s10 = smov 2   ;;  %s7187_s0 = inlined_call_operand.smem [shape: u32[31], index: -1, kind: input, shape index: {}] }
   0x1   :  { %s6066_s5 = sld [smem:[%s7187_s0]]   ;;  %s5995_s14 = smov 3  }
   0x2   :  { %s6071_s9 = sld [smem:[%s7187_s0 + %s5993_s6]]   ;;  %s5996_s18 = smov 4  }
   0x3   :  { %s6076_s13 = sld [smem:[%s7187_s0 + %s5994_s10]]   ;;  %s5997_s22 = smov 5  }
   0x4   :  { %s6081_s17 = sld [smem:[%s7187_s0 + %s5995_s14]]   ;;  %s5998_s26 = smov 6  }
   0x5   :  { %s6086_s21 = sld [smem:[%s7187_s0 + %s5996_s18]]   ;;  %s5999_s30 = smov 7  }
   0x6   :  { %s6091_s25 = sld [smem:[%s7187_s0 + %s5997_s22]]   ;;  %s6000_s4 = smov 8  }
   0x7   :  { %7242 = sst [smem:[#allocation37_spill]] %s6066_s5  ;;  %s6001_s10 = smov 9  }
   0x8   :  { %7243 = sst [smem:[#allocation38_spill]] %s6071_s9  ;;  %s6002_s15 = smov 10  }
   0x9   :  { %7244 = sst [smem:[#allocation39_spill]] %s6076_s13  ;;  %s6003_s20 = smov 11  }
   0xa   :  { %7245 = sst [smem:[#allocation40_spill]] %s6081_s17  ;;  %s6005_s1 = smov 13  }
   0xb   :  { %7246 = sst [smem:[#allocation41_spill]] %s6086_s21  ;;  %s6006_s7 = smov 14  }
   0xc   :  { %7247 = sst [smem:[#allocation42_spill]] %s6091_s25  ;;  %s6008_s22 = smov 16  }
   0xd   :  { %s6096_s29 = sld [smem:[%s7187_s0 + %s5998_s26]]   ;;  %s6004_s26 = smov 12  }
   0xe   :  { %s6101_s3 = sld [smem:[%s7187_s0 + %s5999_s30]]   ;;  %s6009_s28 = smov 17  }
   0xf   :  { %s6106_s8 = sld [smem:[%s7187_s0 + %s6000_s4]]  }
  0x10   :  { %s6111_s14 = sld [smem:[%s7187_s0 + %s6001_s10]]  }
  0x11   :  { %s6116_s19 = sld [smem:[%s7187_s0 + %s6002_s15]]   ;;  %s6007_s15 = smov 15  }
  0x12   :  { %s6121_s24 = sld [smem:[%s7187_s0 + %s6003_s20]]  }
  0x13   :  { %7248 = sst [smem:[#allocation43_spill]] %s6096_s29 }
  0x14   :  { %7249 = sst [smem:[#allocation44_spill]] %s6101_s3 }
  0x15   :  { %7250 = sst [smem:[#allocation45_spill]] %s6106_s8 }
  0x16   :  { %7251 = sst [smem:[#allocation46_spill]] %s6111_s14 }
  0x17   :  { %7252 = sst [smem:[#allocation47_spill]] %s6116_s19 }
  0x18   :  { %7253 = sst [smem:[#allocation48_spill]] %s6121_s24 }
  0x19   :  { %s6126_s30 = sld [smem:[%s7187_s0 + %s6004_s26]]  }
  0x1a   :  { %s6131_s6 = sld [smem:[%s7187_s0 + %s6005_s1]]  }
  0x1b   :  { %s6136_s12 = sld [smem:[%s7187_s0 + %s6006_s7]]   ;;  %s6010_s7 = smov 18  }
  0x1c   :  { %s6141_s20 = sld [smem:[%s7187_s0 + %s6007_s15]]   ;;  %s6011_s15 = smov 19  }
  0x1d   :  { %s6146_s27 = sld [smem:[%s7187_s0 + %s6008_s22]]   ;;  %s6012_s22 = smov 20  }
  0x1e   :  { %s6151_s4 = sld [smem:[%s7187_s0 + %s6009_s28]]   ;;  %s6013_s28 = smov 21  }
  0x1f   :  { %7254 = sst [smem:[#allocation49_spill]] %s6126_s30 }
  0x20   :  { %7255 = sst [smem:[#allocation50_spill]] %s6131_s6 }
  0x21   :  { %7256 = sst [smem:[#allocation51_spill]] %s6136_s12 }
  0x22   :  { %7257 = sst [smem:[#allocation52_spill]] %s6141_s20 }
  0x23   :  { %7258 = sst [smem:[#allocation53_spill]] %s6146_s27 }
  0x24   :  { %7259 = sst [smem:[#allocation54_spill]] %s6151_s4 }
  0x25   :  { %s6156_s13 = sld [smem:[%s7187_s0 + %s6010_s7]]   ;;  %s6014_s7 = smov 22  }
  0x26   :  { %s6161_s17 = sld [smem:[%s7187_s0 + %s6011_s15]]   ;;  %s6015_s15 = smov 23  }
  0x27   :  { %s6166_s9 = sld [smem:[%s7187_s0 + %s6012_s22]]   ;;  %s6016_s22 = smov 24  }
  0x28   :  { %s6171_s5 = sld [smem:[%s7187_s0 + %s6013_s28]]   ;;  %s6017_s28 = smov 25  }
  0x29   :  { %s6181_s4 = sld [smem:[%s7187_s0 + %s6015_s15]]   ;;  %s6019_s15 = smov 27  }
  0x2a   :  { %s6191_s27 = sld [smem:[%s7187_s0 + %s6017_s28]]   ;;  %s6021_s28 = smov 29  }
  0x2b   :  { %7260 = sst [smem:[#allocation55_spill]] %s6156_s13 }
  0x2c   :  { %7261 = sst [smem:[#allocation56_spill]] %s6161_s17 }
  0x2d   :  { %7262 = sst [smem:[#allocation57_spill]] %s6166_s9 }
  0x2e   :  { %7263 = sst [smem:[#allocation58_spill]] %s6171_s5 }
  0x2f   :  { %s6176_s13 = sld [smem:[%s7187_s0 + %s6014_s7]]   ;;  %s6018_s7 = smov 26  }
  0x30   :  { %7265 = sst [smem:[#allocation60_spill]] %s6181_s4 }
  0x31   :  { %s6186_s9 = sld [smem:[%s7187_s0 + %s6016_s22]]   ;;  %s6020_s22 = smov 28  }
  0x32   :  { %7267 = sst [smem:[#allocation62_spill]] %s6191_s27 }
  0x33   :  { %s6201_s12 = sld [smem:[%s7187_s0 + %s6019_s15]]  }
  0x34   :  { %s6211_s19 = sld [smem:[%s7187_s0 + %s6021_s28]]  }
  0x35   :  { %7264 = sst [smem:[#allocation59_spill]] %s6176_s13 }
  0x36   :  { %s6196_s13 = sld [smem:[%s7187_s0 + %s6018_s7]]   ;;  %s6022_s7 = smov 30  }
  0x37   :  { %7266 = sst [smem:[#allocation61_spill]] %s6186_s9 }
  0x38   :  { %s6206_s9 = sld [smem:[%s7187_s0 + %s6020_s22]]  }
  0x39   :  { %7269 = sst [smem:[#allocation64_spill]] %s6201_s12 }
  0x3a   :  { %7271 = sst [smem:[#allocation66_spill]] %s6211_s19 }
  0x3b   :  { %s6216_s30 = sld [smem:[%s7187_s0 + %s6022_s7]]  }
  0x3c   :  { %7268 = sst [smem:[#allocation63_spill]] %s6196_s13 }
  0x3e   :  { %7270 = sst [smem:[#allocation65_spill]] %s6206_s9 }
  0x41   :  { %7272 = sst [smem:[#allocation67_spill]] %s6216_s30 }
  0x42   :  { %67 = vsyncpa [#allocation4], 0 }
  0x43   :  { %68 = vsyncpa [#allocation7], 0 }
  0x44   :  { %69 = vsyncpa [#allocation10], 0 }
  0x45   :  { %70 = vsyncpa [#allocation13], 0 }
  0x46   :  { %72 = vsyncpa [#allocation13 + $0x1], 0 }
  0x47   :  { %73 = vsyncpa [#allocation16], 0 }
  0x48   :  { %75 = vsyncpa [#allocation16 + $0x1], 0 }
  0x49   :  { %76 = vsyncpa [#allocation19], 0 }
  0x4a   :  { %78 = vsyncpa [#allocation19 + $0x1], 0 }
  0x4b   :  { %79 = vsyncpa [#allocation22], 0 }
  0x4c   :  { %81 = vsyncpa [#allocation22 + $0x1], 0 }
  0x4d   :  { %82 = vsyncpa [#allocation25], 0 }
  0x4e   :  { %84 = vsyncpa [#allocation25 + $0x1], 0 }
  0x4f   :  { %85 = vsyncpa [#allocation5], 0  ;;  %s6218_s15 = smov 0   ;;  %s6220_s16 = smov 0  }
  0x50   :  { %s6222_s0 = smov 0   ;;  %s6224_s18 = smov 0  }
  0x51 LB: > { %s7273_s29 = sld [smem:[#allocation43_spill]]  ;;  %s7274_s27 = sld [smem:[#allocation62_spill]]  ;;  %s5979_s15 = sphi %s6218_s15, %s7364_s15   ;;  %s5991_s18 = sphi %s6224_s18, %s7363_s18   ;;  %s5987_s0 = sphi %s6222_s0, %s7366_s0   ;;  %s5983_s16 = sphi %s6220_s16, %s7365_s16  }
  0x52   : > { %s7275_s21 = sld [smem:[#allocation41_spill]]  ;;  %s7276_s17 = sld [smem:[#allocation56_spill]] }
  0x53   : > { %s7277_s12 = sld [smem:[#allocation64_spill]]  ;;  %s7278_s8 = sld [smem:[#allocation45_spill]] }
  0x54   : > { %s7279_s6 = sld [smem:[#allocation50_spill]]  ;;  %s7280_s4 = sld [smem:[#allocation60_spill]] }
  0x55   : > { %s7281_s5 = sld [smem:[#allocation58_spill]]  ;;  %s7282_s20 = sld [smem:[#allocation52_spill]] }
  0x56   : > { %s7283_s14 = sld [smem:[#allocation46_spill]]  ;;  %s7284_s3 = sld [smem:[#allocation44_spill]] }
  0x57   : > { %s7285_s25 = sld [smem:[#allocation42_spill]]  ;;  %7286 = sst [smem:[#allocation68_spill]] %s5983_s16 }
  0x58   : > { %7287 = sst [smem:[#allocation69_spill]] %s5987_s0  ;;  %s6237_s22 = sadd.s32 4294967295, %s5991_s18  }
  0x59   : > { %7288 = sst [smem:[#allocation70_spill]] %s6237_s22  ;;  %p300_p0 = scmp.ne.s32.totalorder %s5983_s16, %s5979_s15 }
  0x5a   : > { %p7191_p1 = scmp.eq.s32.totalorder %s6237_s22, 0  ;;  %p4463_p2 = scmp.ge.s32.totalorder %s5991_s18, 1 }
  0x5b   : > { %p847_p3 = scmp.lt.s32.totalorder %s5991_s18, 3  ;;  %s6023_s28 = smov [#allocation6]  }
  0x5c   : > { %p6246_p5 = por %p7191_p1, %p300_p0  ;;  %s885_s1 = sshll.u32 %s6023_s28, 4  ;;  %s886_s1 = int_to_ptr.vmem [resolvable:$true] %s885_s1 }
  0x5d   : > { %p6250_p6 = pnand %p4463_p2, %p847_p3  ;;  %s6024_s7 = smov [#allocation9]  }
  0x5e   : > { %s7289_s23 = scalar_select %p6246_p5, 1, 0 }
  0x5f   : > { %s7291_s26 = scalar_select %p6250_p6, 1, 0 }
  0x60   : > { %7290 = sst [smem:[#allocation71_spill]] %s7289_s23  ;;  %p5088_p7 = pneg %p6250_p6 }
  0x61   : > { %7292 = sst [smem:[#allocation72_spill]] %s7291_s26  ;;  %s906_s10 = sshll.u32 %s6024_s7, 4  ;;  %s6262_s10 = int_to_ptr.vmem [resolvable:$true] %s906_s10 }
  0x62   : > { %p6258_p8 = pnand %p5088_p7, %p7191_p1  ;;  %s5473_s11 = scalar_lea.hbm %s7285_s25, 16 }
  0x63   : > { %p5474_p9 = scmp.ne.s32.totalorder %s7285_s25, %s5473_s11  ;;  %p5480_p13 = scmp.lt.u32.totalorder %s5473_s11, %s7285_s25 }
  0x64   : > { %s7293_s2 = scalar_select %p6258_p8, 1, 0 }
  0x65   : > { %p6268_p10 = pneg %p6258_p8 }
  0x67   : > { %s7294_s15 = scalar_select %p6268_p10, 1, 0 }
  0x68   : > { %p5476_p11 = pnand %p6268_p10, %p5474_p9 }
  0x6a   : > { %p5477_p12 = pneg %p5476_p11 }
  0x6c   : > { %p5482_p0 = pnand %p5480_p13, %p5477_p12 }
  0x6e   : > { %5485 = shalt.err (!%p5482_p0)
}
  0x6f   : > { %s5486_s28 = scalar_lea.vmem %s886_s1, 16  ;;  %s5493_s7 = scalar_lea.vmem %s886_s1, 32 }
  0x70   : > { %p5487_p2 = scmp.ne.s32.totalorder %s886_s1, %s5486_s28  ;;  %p5494_p4 = scmp.lt.s32.totalorder %s886_s1, %s886_s1 }
  0x71   : > { %p5495_p1 = scmp.lt.s32.totalorder %s5493_s7, %s5486_s28 }
  0x72   : > { %p5489_p3 = pnand %p5487_p2, %p6268_p10 }
  0x73   : > { %p5496_p5 = por %p5495_p1, %p5494_p4 }
  0x74   : > { %p5490_p7 = pneg %p5489_p3 }
  0x76   : > { %p5497_p6 = pnand %p5496_p5, %p5490_p7 }
  0x78   : > { %5500 = shalt.err (!%p5497_p6)
}
  0x79   : > { %5094 = dma.hbm_to_vmem [thread:$0]  (!%p6258_p8), %s7285_s25, 16, %s886_s1, [#allocation7]  }
  0x7a   : > { %s5501_s11 = scalar_lea.hbm %s7284_s3, 1024 }
  0x7b   : > { %p5502_p9 = scmp.ne.s32.totalorder %s7284_s3, %s5501_s11  ;;  %p5508_p13 = scmp.lt.u32.totalorder %s5501_s11, %s7284_s3 }
  0x7d   : > { %p5504_p11 = pnand %p5502_p9, %p6268_p10 }
  0x7f   : > { %p5505_p12 = pneg %p5504_p11 }
  0x81   : > { %p5510_p0 = pnand %p5508_p13, %p5505_p12 }
  0x83   : > { %5513 = shalt.err (!%p5510_p0)
}
  0x84   : > { %s5514_s28 = scalar_lea.vmem %s6262_s10, 1024  ;;  %p5522_p6 = scmp.lt.s32.totalorder %s6262_s10, %s6262_s10 }
  0x85   : > { %p5515_p1 = scmp.ne.s32.totalorder %s6262_s10, %s5514_s28  ;;  %p5523_p2 = scmp.lt.s32.totalorder %s5514_s28, %s5514_s28 }
  0x87   : > { %p5517_p4 = pnand %p5515_p1, %p6268_p10  ;;  %p5524_p3 = por %p5523_p2, %p5522_p6 }
  0x89   : > { %p5518_p5 = pneg %p5517_p4 }
  0x8b   : > { %p5525_p7 = pnand %p5524_p3, %p5518_p5 }
  0x8d   : > { %5528 = shalt.err (!%p5525_p7)
}
  0x8e   : > { %s7197_s1 = smov 64   ;;  %s7199_s7 = smov 4  }
  0x8f   : > { %5100 = dma.hbm_to_vmem [thread:$0]  (!%p6258_p8), %s7284_s3, 1024, %s6262_s10, [#allocation10], %s7197_s1, %s7197_s1, %s7199_s7  }
  0x90   : > { %s6299_s11 = sadd.s32 1, %s5991_s18   ;;  %s287_s28 = sadd.s32 1, %s5987_s0 }
  0x91   : > { %7295 = sst [smem:[#allocation73_spill]] %s6299_s11  ;;  %s284_s25 = ssub.s32 %s5991_s18, %s6299_s11 }
  0x92   : > { %p294_p9 = scmp.ne.s32.totalorder %s5987_s0, %s5983_s16  ;;  %p285_p11 = scmp.eq.s32.totalorder %s284_s25, 0 }
  0x93   : > { %p295_p12 = scmp.eq.s32.totalorder %s5991_s18, 0  ;;  %p5140_p13 = scmp.lt.s32.totalorder %s5991_s18, 2 }
  0x94   : > { %s6309_s30 = sand.u32 1, %s5991_s18   ;;  %s6315_s24 = sand.u32 1, %s5987_s0  }
  0x95   : > { %s6312_s19 = scalar_select %p285_p11, %s5987_s0, %s287_s28  }
  0x96   : > { %p296_p0 = por %p295_p12, %p294_p9  ;;  %s5035_s10 = smul.u32 3072, %s5991_s18 }
  0x97   : > { %7296 = sst [smem:[#allocation74_spill]] %s6312_s19  ;;  %s5034_s1 = smul.u32 192, %s6315_s24 }
  0x98   : > { %p6319_p1 = pnand %p5140_p13, %p296_p0  ;;  %s6324_s25 = scalar_lea.hbm %s7283_s14, %s5035_s10 }
  0x99   : > { %s935_s28 = scalar_lea.vmem [#allocation12], %s5034_s1  ;;  %s6329_s19 = sshll.u32 %s6315_s24, 6 }
  0x9a   : > { %s7297_s7 = scalar_select %p6319_p1, 1, 0 }
  0x9b   : > { %s942_s3 = sshll.u32 %s935_s28, 4  ;;  %s5529_s11 = scalar_lea.hbm %s6324_s25, 3072  ;;  %s6326_s3 = int_to_ptr.vmem [resolvable:$true] %s942_s3 }
  0x9c   : > { %p5530_p4 = scmp.ne.s32.totalorder %s6324_s25, %s5529_s11  ;;  %p6336_p5 = pneg %p6319_p1 }
  0x9d   : > { %s5534_s10 = scalar_lea.hbm %s7283_s14, 6144  ;;  %p5535_p3 = scmp.lt.u32.totalorder %s6324_s25, %s7283_s14 }
  0x9e   : > { %s7298_s23 = scalar_select %p6336_p5, 1, 0 }
  0x9f   : > { %p5532_p6 = pnand %p6336_p5, %p5530_p4  ;;  %p5536_p7 = scmp.lt.u32.totalorder %s5534_s10, %s5529_s11 }
  0xa0   : > { %p5538_p11 = scmp.lt.u32.totalorder %s5529_s11, %s6324_s25 }
  0xa1   : > { %p5533_p2 = pneg %p5532_p6  ;;  %p5537_p9 = por %p5536_p7, %p5535_p3 }
  0xa3   : > { %p5539_p12 = por %p5538_p11, %p5537_p9 }
  0xa5   : > { %p5540_p13 = pnand %p5539_p12, %p5533_p2 }
  0xa7   : > { %5543 = shalt.err (!%p5540_p13)
}
  0xa8   : > { %s5544_s1 = scalar_lea.vmem %s6326_s3, 3072  ;;  %s6027_s28 = smov [#allocation12]  }
  0xa9   : > { %p5545_p0 = scmp.ne.s32.totalorder %s6326_s3, %s5544_s1  ;;  %s5549_s0 = sshll.u32 %s6027_s28, 4  ;;  %s5550_s0 = int_to_ptr.vmem [resolvable:$false] %s5549_s0 }
  0xaa   : > { %s5551_s16 = scalar_lea.vmem %s5550_s0, 6144  ;;  %p5552_p4 = scmp.lt.s32.totalorder %s6326_s3, %s5550_s0 }
  0xab   : > { %p5547_p8 = pnand %p5545_p0, %p6336_p5  ;;  %p5553_p6 = scmp.lt.s32.totalorder %s5551_s16, %s5544_s1 }
  0xad   : > { %p5548_p10 = pneg %p5547_p8  ;;  %p5554_p3 = por %p5553_p6, %p5552_p4 }
  0xaf   : > { %p5555_p7 = pnand %p5554_p3, %p5548_p10 }
  0xb1   : > { %5558 = shalt.err (!%p5555_p7)
}
  0xb2   : > { %s6028_s11 = smov 192   ;;  %s6029_s10 = smov 12  }
  0xb3   : > { %s7299_s0 = scalar_lea.sflag [#allocation13], %s6309_s30  ;;  %s6358_s16 = sshll.u32 %s5991_s18, 10 }
  0xb4   : > { %5107 = dma.hbm_to_vmem [thread:$0]  (!%p6319_p1), %s6324_s25, 3072, %s6326_s3, %s7299_s0, %s6028_s11, %s6028_s11, %s6029_s10  }
  0xb5   : > { %s6362_s1 = scalar_lea.hbm %s7282_s20, %s6358_s16  ;;  %s1004_s28 = scalar_lea.vmem [#allocation15], %s6329_s19 }
  0xb6   : > { %s1011_s14 = sshll.u32 %s1004_s28, 4  ;;  %s4477_s22 = sshll.u32 %s6315_s24, 8  ;;  %s6366_s14 = int_to_ptr.vmem [resolvable:$true] %s1011_s14 }
  0xb7   : > { %s7219_s26 = scalar_lea.sflag [#allocation16], %s6309_s30  ;;  %s5559_s9 = scalar_lea.hbm %s6362_s1, 1024 }
  0xb8   : > { %p5560_p8 = scmp.ne.s32.totalorder %s6362_s1, %s5559_s9  ;;  %s5564_s3 = scalar_lea.hbm %s7282_s20, 2048 }
  0xb9   : > { %p5565_p9 = scmp.lt.u32.totalorder %s6362_s1, %s7282_s20  ;;  %p5566_p11 = scmp.lt.u32.totalorder %s5564_s3, %s5559_s9 }
  0xba   : > { %p5562_p10 = pnand %p5560_p8, %p6336_p5  ;;  %p5568_p13 = scmp.lt.u32.totalorder %s5559_s9, %s6362_s1 }
  0xbb   : > { %p5567_p12 = por %p5566_p11, %p5565_p9 }
  0xbc   : > { %p5563_p2 = pneg %p5562_p10 }
  0xbd   : > { %p5569_p0 = por %p5568_p13, %p5567_p12 }
  0xbf   : > { %p5570_p4 = pnand %p5569_p0, %p5563_p2 }
  0xc1   : > { %5573 = shalt.err (!%p5570_p4)
}
  0xc2   : > { %s5574_s25 = scalar_lea.vmem %s6366_s14, 1024  ;;  %s6030_s11 = smov [#allocation15]  }
  0xc3   : > { %p5575_p6 = scmp.ne.s32.totalorder %s6366_s14, %s5574_s25  ;;  %s5579_s10 = sshll.u32 %s6030_s11, 4  ;;  %s5580_s10 = int_to_ptr.vmem [resolvable:$false] %s5579_s10 }
  0xc4   : > { %s5581_s0 = scalar_lea.vmem %s5580_s10, 2048  ;;  %p5582_p8 = scmp.lt.s32.totalorder %s6366_s14, %s5580_s10 }
  0xc5   : > { %p5577_p3 = pnand %p5575_p6, %p6336_p5  ;;  %p5583_p10 = scmp.lt.s32.totalorder %s5581_s0, %s5574_s25 }
  0xc7   : > { %p5578_p7 = pneg %p5577_p3  ;;  %p5584_p9 = por %p5583_p10, %p5582_p8 }
  0xc9   : > { %p5585_p11 = pnand %p5584_p9, %p5578_p7 }
  0xcb   : > { %5588 = shalt.err (!%p5585_p11)
}
  0xcc   : > { %s7300_s9 = smov 4   ;;  %s7301_s28 = smov 64  }
  0xcd   : > { %5113 = dma.hbm_to_vmem [thread:$0]  (!%p6319_p1), %s6362_s1, 1024, %s6366_s14, %s7219_s26, %s7301_s28, %s7301_s28, %s7300_s9  }
  0xce   : > { %s4689_s3 = sshll.u32 %s5991_s18, 12  ;;  %s1043_s25 = scalar_lea.vmem [#allocation17], %s4477_s22 }
  0xcf   : > { %s1050_s11 = sshll.u32 %s1043_s25, 4  ;;  %s6395_s10 = scalar_lea.hbm %s7276_s17, %s4689_s3  ;;  %s6397_s11 = int_to_ptr.vmem [resolvable:$true] %s1050_s11 }
  0xd0   : > { %s6400_s0 = scalar_lea.hbm %s7281_s5, %s4689_s3  ;;  %s1071_s20 = scalar_lea.vmem [#allocation18], %s4477_s22 }
  0xd1   : > { %s1078_s13 = sshll.u32 %s1071_s20, 4  ;;  %s7221_s14 = scalar_lea.sflag [#allocation19], %s6309_s30  ;;  %s6404_s13 = int_to_ptr.vmem [resolvable:$true] %s1078_s13 }
  0xd2   : > { %s5589_s1 = scalar_lea.hbm %s6400_s0, 4096  ;;  %s5594_s25 = scalar_lea.hbm %s7281_s5, 8192 }
  0xd3   : > { %p5590_p2 = scmp.ne.s32.totalorder %s6400_s0, %s5589_s1  ;;  %p5595_p0 = scmp.lt.u32.totalorder %s6400_s0, %s7281_s5 }
  0xd4   : > { %p5596_p4 = scmp.lt.u32.totalorder %s5594_s25, %s5589_s1  ;;  %p5598_p3 = scmp.lt.u32.totalorder %s5589_s1, %s6400_s0 }
  0xd5   : > { %p5592_p12 = pnand %p5590_p2, %p6336_p5 }
  0xd6   : > { %p5597_p6 = por %p5596_p4, %p5595_p0 }
  0xd7   : > { %p5593_p13 = pneg %p5592_p12 }
  0xd8   : > { %p5599_p7 = por %p5598_p3, %p5597_p6 }
  0xda   : > { %p5600_p8 = pnand %p5599_p7, %p5593_p13 }
  0xdc   : > { %5603 = shalt.err (!%p5600_p8)
}
  0xdd   : > { %s5604_s20 = scalar_lea.vmem %s6404_s13, 4096  ;;  %s6031_s22 = smov [#allocation18]  }
  0xde   : > { %p5605_p10 = scmp.ne.s32.totalorder %s6404_s13, %s5604_s20  ;;  %s5609_s3 = sshll.u32 %s6031_s22, 4  ;;  %s5610_s3 = int_to_ptr.vmem [resolvable:$false] %s5609_s3 }
  0xdf   : > { %s5611_s26 = scalar_lea.vmem %s5610_s3, 8192  ;;  %p5612_p2 = scmp.lt.s32.totalorder %s6404_s13, %s5610_s3 }
  0xe0   : > { %p5607_p9 = pnand %p5605_p10, %p6336_p5  ;;  %p5613_p12 = scmp.lt.s32.totalorder %s5611_s26, %s5604_s20 }
  0xe2   : > { %p5608_p11 = pneg %p5607_p9  ;;  %p5614_p0 = por %p5613_p12, %p5612_p2 }
  0xe4   : > { %p5615_p4 = pnand %p5614_p0, %p5608_p11 }
  0xe6   : > { %5618 = shalt.err (!%p5615_p4)
}
  0xe7   : > { %5119 = dma.hbm_to_vmem [thread:$0]  (!%p6319_p1), %s6400_s0, 4096, %s6404_s13, %s7221_s14, %s7301_s28, %s7301_s28, %s7300_s9  }
  0xe8   : > { %s6431_s26 = scalar_lea.hbm %s7274_s27, %s6358_s16  ;;  %s1125_s1 = scalar_lea.vmem [#allocation21], %s6329_s19 }
  0xe9   : > { %s1132_s25 = sshll.u32 %s1125_s1, 4  ;;  %s6435_s20 = sshll.u32 %s5991_s18, 4  ;;  %s6437_s25 = int_to_ptr.vmem [resolvable:$true] %s1132_s25 }
  0xea   : > { %s7222_s22 = scalar_lea.sflag [#allocation22], %s6309_s30  ;;  %s5619_s3 = scalar_lea.hbm %s6431_s26, 1024 }
  0xeb   : > { %p5620_p13 = scmp.ne.s32.totalorder %s6431_s26, %s5619_s3  ;;  %s5624_s5 = scalar_lea.hbm %s7274_s27, 2048 }
  0xec   : > { %p5625_p7 = scmp.lt.u32.totalorder %s6431_s26, %s7274_s27  ;;  %p5626_p8 = scmp.lt.u32.totalorder %s5624_s5, %s5619_s3 }
  0xed   : > { %p5622_p6 = pnand %p5620_p13, %p6336_p5  ;;  %p5628_p9 = scmp.lt.u32.totalorder %s5619_s3, %s6431_s26 }
  0xee   : > { %p5627_p10 = por %p5626_p8, %p5625_p7 }
  0xef   : > { %p5623_p3 = pneg %p5622_p6 }
  0xf0   : > { %p5629_p11 = por %p5628_p9, %p5627_p10 }
  0xf2   : > { %p5630_p2 = pnand %p5629_p11, %p5623_p3 }
  0xf4   : > { %5633 = shalt.err (!%p5630_p2)
}
  0xf5   : > { %s5634_s13 = scalar_lea.vmem %s6437_s25, 1024  ;;  %s6032_s18 = smov [#allocation21]  }
  0xf6   : > { %p5635_p12 = scmp.ne.s32.totalorder %s6437_s25, %s5634_s13  ;;  %s5639_s0 = sshll.u32 %s6032_s18, 4  ;;  %s5640_s0 = int_to_ptr.vmem [resolvable:$false] %s5639_s0 }
  0xf7   : > { %s5641_s1 = scalar_lea.vmem %s5640_s0, 2048  ;;  %p5642_p13 = scmp.lt.s32.totalorder %s6437_s25, %s5640_s0 }
  0xf8   : > { %p5637_p0 = pnand %p5635_p12, %p6336_p5  ;;  %p5643_p6 = scmp.lt.s32.totalorder %s5641_s1, %s5634_s13 }
  0xfa   : > { %p5638_p4 = pneg %p5637_p0  ;;  %p5644_p7 = por %p5643_p6, %p5642_p13 }
  0xfc   : > { %p5645_p8 = pnand %p5644_p7, %p5638_p4 }
  0xfe   : > { %5648 = shalt.err (!%p5645_p8)
}
  0xff   : > { %5125 = dma.hbm_to_vmem [thread:$0]  (!%p6319_p1), %s6431_s26, 1024, %s6437_s25, %s7222_s22, %s7301_s28, %s7301_s28, %s7300_s9  }
 0x100   : > { %s6464_s5 = scalar_lea.hbm %s7277_s12, %s6435_s20  ;;  %s1162_s3 = scalar_lea.vmem [#allocation24], %s6315_s24 }
 0x101   : > { %s1169_s13 = sshll.u32 %s1162_s3, 4  ;;  %s6033_s18 = smov [#allocation3]   ;;  %s6467_s13 = int_to_ptr.vmem [resolvable:$true] %s1169_s13 }
 0x102   : > { %s6469_s0 = sshll.u32 %s6033_s18, 4  ;;  %s1160_s1 = scalar_lea.sflag [#allocation25], %s6309_s30  ;;  %s872_s0 = int_to_ptr.vmem [resolvable:$true] %s6469_s0 }
 0x103   : > { %s5649_s14 = scalar_lea.hbm %s6464_s5, 16  ;;  %s5654_s26 = scalar_lea.hbm %s7277_s12, 32 }
 0x104   : > { %p5650_p3 = scmp.ne.s32.totalorder %s6464_s5, %s5649_s14  ;;  %p5655_p11 = scmp.lt.u32.totalorder %s6464_s5, %s7277_s12 }
 0x105   : > { %p5656_p2 = scmp.lt.u32.totalorder %s5654_s26, %s5649_s14  ;;  %p5658_p0 = scmp.lt.u32.totalorder %s5649_s14, %s6464_s5 }
 0x106   : > { %p5652_p10 = pnand %p5650_p3, %p6336_p5 }
 0x107   : > { %p5657_p12 = por %p5656_p2, %p5655_p11 }
 0x108   : > { %p5653_p9 = pneg %p5652_p10 }
 0x109   : > { %p5659_p4 = por %p5658_p0, %p5657_p12 }
 0x10b   : > { %p5660_p13 = pnand %p5659_p4, %p5653_p9 }
 0x10d   : > { %5663 = shalt.err (!%p5660_p13)
}
 0x10e   : > { %s5664_s25 = scalar_lea.vmem %s6467_s13, 16  ;;  %s6034_s3 = smov [#allocation24]  }
 0x10f   : > { %p5665_p6 = scmp.ne.s32.totalorder %s6467_s13, %s5664_s25  ;;  %s5669_s18 = sshll.u32 %s6034_s3, 4  ;;  %s5670_s18 = int_to_ptr.vmem [resolvable:$false] %s5669_s18 }
 0x110   : > { %s5671_s22 = scalar_lea.vmem %s5670_s18, 32  ;;  %p5672_p3 = scmp.lt.s32.totalorder %s6467_s13, %s5670_s18 }
 0x111   : > { %p5667_p7 = pnand %p5665_p6, %p6336_p5  ;;  %p5673_p10 = scmp.lt.s32.totalorder %s5671_s22, %s5664_s25 }
 0x113   : > { %p5668_p8 = pneg %p5667_p7  ;;  %p5674_p11 = por %p5673_p10, %p5672_p3 }
 0x115   : > { %p5675_p2 = pnand %p5674_p11, %p5668_p8 }
 0x117   : > { %5678 = shalt.err (!%p5675_p2)
}
 0x118   : > { %5131 = dma.hbm_to_vmem [thread:$0]  (!%p6319_p1), %s6464_s5, 16, %s6467_s13, %s1160_s1  }
 0x119   : > { %s5679_s14 = scalar_lea.hbm %s7275_s21, 1024  ;;  %p7302_p12 = scmp.ne.s32.totalorder %s7294_s15, 0 }
 0x11a   : > { %p5680_p9 = scmp.ne.s32.totalorder %s7275_s21, %s5679_s14  ;;  %p5686_p13 = scmp.lt.u32.totalorder %s5679_s14, %s7275_s21 }
 0x11c   : > { %p5682_p0 = pnand %p5680_p9, %p7302_p12 }
 0x11e   : > { %p5683_p4 = pneg %p5682_p0 }
 0x120   : > { %p5688_p6 = pnand %p5686_p13, %p5683_p4 }
 0x122   : > { %5691 = shalt.err (!%p5688_p6)
}
 0x123   : > { %s5692_s22 = scalar_lea.vmem %s872_s0, 1024  ;;  %p5700_p10 = scmp.lt.s32.totalorder %s872_s0, %s872_s0 }
 0x124   : > { %p5693_p7 = scmp.ne.s32.totalorder %s872_s0, %s5692_s22  ;;  %p5701_p11 = scmp.lt.s32.totalorder %s5692_s22, %s5692_s22 }
 0x126   : > { %p5695_p8 = pnand %p5693_p7, %p7302_p12  ;;  %p5702_p2 = por %p5701_p11, %p5700_p10 }
 0x128   : > { %p5696_p3 = pneg %p5695_p8 }
 0x12a   : > { %p5703_p5 = pnand %p5702_p2, %p5696_p3 }
 0x12c   : > { %5706 = shalt.err (!%p5703_p5)
}
 0x12d   : > { %p7303_p1 = scmp.ne.s32.totalorder %s7293_s2, 0  ;;  %s6035_s5 = smov [#allocation8]  }
 0x12e   : > { %s896_s13 = sshll.u32 %s6035_s5, 4  ;;  %s6036_s26 = smov [#allocation11]   ;;  %s897_s13 = int_to_ptr.vmem [resolvable:$true] %s896_s13 }
 0x12f   : > { %5091 = dma.hbm_to_vmem [thread:$0]  (!%p7303_p1), %s7275_s21, 1024, %s872_s0, [#allocation4], %s7301_s28, %s7301_s28, %s7300_s9  }
 0x130   : > { %s920_s25 = sshll.u32 %s6036_s26, 4  ;;  %s5707_s3 = scalar_lea.hbm %s7273_s29, 16  ;;  %s921_s25 = int_to_ptr.vmem [resolvable:$true] %s920_s25 }
 0x131   : > { %p5708_p9 = scmp.ne.s32.totalorder %s7273_s29, %s5707_s3  ;;  %p5714_p4 = scmp.lt.u32.totalorder %s5707_s3, %s7273_s29 }
 0x133   : > { %p5710_p5 = pnand %p5708_p9, %p7302_p12 }
 0x135   : > { %p5711_p0 = pneg %p5710_p5 }
 0x137   : > { %p5716_p13 = pnand %p5714_p4, %p5711_p0 }
 0x139   : > { %5719 = shalt.err (!%p5716_p13)
}
 0x13a   : > { %s5720_s18 = scalar_lea.vmem %s897_s13, 16  ;;  %s5727_s0 = scalar_lea.vmem %s897_s13, 32 }
 0x13b   : > { %p5721_p6 = scmp.ne.s32.totalorder %s897_s13, %s5720_s18  ;;  %p5728_p3 = scmp.lt.s32.totalorder %s897_s13, %s897_s13 }
 0x13c   : > { %p5729_p10 = scmp.lt.s32.totalorder %s5727_s0, %s5720_s18 }
 0x13d   : > { %p5723_p7 = pnand %p5721_p6, %p7302_p12 }
 0x13e   : > { %p5730_p11 = por %p5729_p10, %p5728_p3 }
 0x13f   : > { %p5724_p8 = pneg %p5723_p7 }
 0x141   : > { %p5731_p2 = pnand %p5730_p11, %p5724_p8 }
 0x143   : > { %5734 = shalt.err (!%p5731_p2)
}
 0x144   : > { %5097 = dma.hbm_to_vmem [thread:$0]  (!%p7303_p1), %s7273_s29, 16, %s897_s13, [#allocation7]  }
 0x145   : > { %s5735_s14 = scalar_lea.hbm %s7278_s8, 16 }
 0x146   : > { %p5736_p9 = scmp.ne.s32.totalorder %s7278_s8, %s5735_s14  ;;  %p5742_p4 = scmp.lt.u32.totalorder %s5735_s14, %s7278_s8 }
 0x148   : > { %p5738_p5 = pnand %p5736_p9, %p7302_p12 }
 0x14a   : > { %p5739_p0 = pneg %p5738_p5 }
 0x14c   : > { %p5744_p13 = pnand %p5742_p4, %p5739_p0 }
 0x14e   : > { %5747 = shalt.err (!%p5744_p13)
}
 0x14f   : > { %s5748_s22 = scalar_lea.vmem %s921_s25, 16  ;;  %s5755_s5 = scalar_lea.vmem %s921_s25, 32 }
 0x150   : > { %p5749_p6 = scmp.ne.s32.totalorder %s921_s25, %s5748_s22  ;;  %p5756_p3 = scmp.lt.s32.totalorder %s921_s25, %s921_s25 }
 0x151   : > { %p5757_p10 = scmp.lt.s32.totalorder %s5755_s5, %s5748_s22 }
 0x152   : > { %p5751_p7 = pnand %p5749_p6, %p7302_p12 }
 0x153   : > { %p5758_p11 = por %p5757_p10, %p5756_p3 }
 0x154   : > { %p5752_p8 = pneg %p5751_p7 }
 0x156   : > { %p5759_p2 = pnand %p5758_p11, %p5752_p8 }
 0x158   : > { %5762 = shalt.err (!%p5759_p2)
}
 0x159   : > { %5103 = dma.hbm_to_vmem [thread:$0]  (!%p7303_p1), %s7278_s8, 16, %s921_s25, [#allocation10]  }
 0x15a   : > { %s6527_s13 = scalar_lea.hbm %s7279_s6, %s6358_s16  ;;  %s977_s15 = scalar_lea.vmem [#allocation14], %s6329_s19 }
 0x15b   : > { %s984_s26 = sshll.u32 %s977_s15, 4  ;;  %s5763_s3 = scalar_lea.hbm %s6527_s13, 1024  ;;  %s6530_s26 = int_to_ptr.vmem [resolvable:$true] %s984_s26 }
 0x15c   : > { %p5764_p12 = scmp.ne.s32.totalorder %s6527_s13, %s5763_s3  ;;  %p7304_p9 = scmp.ne.s32.totalorder %s7298_s23, 0 }
 0x15d   : > { %s5768_s2 = scalar_lea.hbm %s7279_s6, 2048  ;;  %p5769_p4 = scmp.lt.u32.totalorder %s6527_s13, %s7279_s6 }
 0x15e   : > { %p5766_p5 = pnand %p5764_p12, %p7304_p9  ;;  %p5770_p13 = scmp.lt.u32.totalorder %s5768_s2, %s5763_s3 }
 0x15f   : > { %p5772_p1 = scmp.lt.u32.totalorder %s5763_s3, %s6527_s13 }
 0x160   : > { %p5767_p0 = pneg %p5766_p5  ;;  %p5771_p6 = por %p5770_p13, %p5769_p4 }
 0x162   : > { %p5773_p7 = por %p5772_p1, %p5771_p6 }
 0x164   : > { %p5774_p8 = pnand %p5773_p7, %p5767_p0 }
 0x166   : > { %5777 = shalt.err (!%p5774_p8)
}
 0x167   : > { %s5778_s25 = scalar_lea.vmem %s6530_s26, 1024  ;;  %s6037_s18 = smov [#allocation14]  }
 0x168   : > { %p5779_p3 = scmp.ne.s32.totalorder %s6530_s26, %s5778_s25  ;;  %s5783_s0 = sshll.u32 %s6037_s18, 4  ;;  %s5784_s0 = int_to_ptr.vmem [resolvable:$false] %s5783_s0 }
 0x169   : > { %s5785_s14 = scalar_lea.vmem %s5784_s0, 2048  ;;  %p5786_p2 = scmp.lt.s32.totalorder %s6530_s26, %s5784_s0 }
 0x16a   : > { %p5781_p10 = pnand %p5779_p3, %p7304_p9  ;;  %p5787_p12 = scmp.lt.s32.totalorder %s5785_s14, %s5778_s25 }
 0x16c   : > { %p5782_p11 = pneg %p5781_p10  ;;  %p5788_p5 = por %p5787_p12, %p5786_p2 }
 0x16e   : > { %p5789_p4 = pnand %p5788_p5, %p5782_p11 }
 0x170   : > { %5792 = shalt.err (!%p5789_p4)
}
 0x171   : > { %p7305_p0 = scmp.ne.s32.totalorder %s7297_s7, 0  ;;  %s7306_s22 = scalar_lea.sflag [#allocation13], %s6309_s30 }
 0x172   : > { %s5793_s5 = scalar_lea.hbm %s6395_s10, 4096  ;;  %s5798_s15 = scalar_lea.hbm %s7276_s17, 8192 }
 0x173   : > { %5110 = dma.hbm_to_vmem [thread:$0]  (!%p7305_p0), %s6527_s13, 1024, %s6530_s26, %s7306_s22, %s7301_s28, %s7301_s28, %s7300_s9  }
 0x174   : > { %p5794_p13 = scmp.ne.s32.totalorder %s6395_s10, %s5793_s5  ;;  %p5799_p7 = scmp.lt.u32.totalorder %s6395_s10, %s7276_s17 }
 0x175   : > { %p5800_p8 = scmp.lt.u32.totalorder %s5798_s15, %s5793_s5  ;;  %p5802_p10 = scmp.lt.u32.totalorder %s5793_s5, %s6395_s10 }
 0x176   : > { %p5796_p6 = pnand %p5794_p13, %p7304_p9 }
 0x177   : > { %p5801_p3 = por %p5800_p8, %p5799_p7 }
 0x178   : > { %p5797_p1 = pneg %p5796_p6 }
 0x179   : > { %p5803_p11 = por %p5802_p10, %p5801_p3 }
 0x17b   : > { %p5804_p2 = pnand %p5803_p11, %p5797_p1 }
 0x17d   : > { %5807 = shalt.err (!%p5804_p2)
}
 0x17e   : > { %s5808_s3 = scalar_lea.vmem %s6397_s11, 4096  ;;  %s6038_s13 = smov [#allocation17]  }
 0x17f   : > { %p5809_p12 = scmp.ne.s32.totalorder %s6397_s11, %s5808_s3  ;;  %s5813_s26 = sshll.u32 %s6038_s13, 4  ;;  %s5814_s26 = int_to_ptr.vmem [resolvable:$false] %s5813_s26 }
 0x180   : > { %s5815_s2 = scalar_lea.vmem %s5814_s26, 8192  ;;  %p5816_p13 = scmp.lt.s32.totalorder %s6397_s11, %s5814_s26 }
 0x181   : > { %p5811_p5 = pnand %p5809_p12, %p7304_p9  ;;  %p5817_p6 = scmp.lt.s32.totalorder %s5815_s2, %s5808_s3 }
 0x183   : > { %p5812_p4 = pneg %p5811_p5  ;;  %p5818_p7 = por %p5817_p6, %p5816_p13 }
 0x185   : > { %p5819_p8 = pnand %p5818_p7, %p5812_p4 }
 0x187   : > { %5822 = shalt.err (!%p5819_p8)
}
 0x188   : > { %s6039_s25 = smov 256   ;;  %s6040_s18 = smov 16  }
 0x189   : > { %s7307_s0 = scalar_lea.sflag [#allocation16], %s6309_s30  ;;  %s6575_s14 = scalar_lea.hbm %s7280_s4, %s6358_s16 }
 0x18a   : > { %5116 = dma.hbm_to_vmem [thread:$0]  (!%p7305_p0), %s6395_s10, 4096, %s6397_s11, %s7307_s0, %s6039_s25, %s6039_s25, %s6040_s18  }
 0x18b   : > { %s1098_s22 = scalar_lea.vmem [#allocation20], %s6329_s19  ;;  %s5823_s15 = scalar_lea.hbm %s6575_s14, 1024 }
 0x18c   : > { %s1105_s5 = sshll.u32 %s1098_s22, 4  ;;  %p5824_p1 = scmp.ne.s32.totalorder %s6575_s14, %s5823_s15  ;;  %s6578_s5 = int_to_ptr.vmem [resolvable:$true] %s1105_s5 }
 0x18d   : > { %s5828_s3 = scalar_lea.hbm %s7280_s4, 2048  ;;  %p5829_p11 = scmp.lt.u32.totalorder %s6575_s14, %s7280_s4 }
 0x18e   : > { %p5826_p3 = pnand %p5824_p1, %p7304_p9  ;;  %p5830_p2 = scmp.lt.u32.totalorder %s5828_s3, %s5823_s15 }
 0x18f   : > { %p5832_p5 = scmp.lt.u32.totalorder %s5823_s15, %s6575_s14 }
 0x190   : > { %p5827_p10 = pneg %p5826_p3  ;;  %p5831_p12 = por %p5830_p2, %p5829_p11 }
 0x192   : > { %p5833_p4 = por %p5832_p5, %p5831_p12 }
 0x194   : > { %p5834_p13 = pnand %p5833_p4, %p5827_p10 }
 0x196   : > { %5837 = shalt.err (!%p5834_p13)
}
 0x197   : > { %s5838_s19 = scalar_lea.vmem %s6578_s5, 1024  ;;  %s6041_s16 = smov [#allocation20]  }
 0x198   : > { %p5839_p6 = scmp.ne.s32.totalorder %s6578_s5, %s5838_s19  ;;  %s5843_s11 = sshll.u32 %s6041_s16, 4  ;;  %s5844_s11 = int_to_ptr.vmem [resolvable:$false] %s5843_s11 }
 0x199   : > { %s5845_s10 = scalar_lea.vmem %s5844_s11, 2048  ;;  %p5846_p1 = scmp.lt.s32.totalorder %s6578_s5, %s5844_s11 }
 0x19a   : > { %p5841_p7 = pnand %p5839_p6, %p7304_p9  ;;  %p5847_p3 = scmp.lt.s32.totalorder %s5845_s10, %s5838_s19 }
 0x19c   : > { %p5842_p8 = pneg %p5841_p7  ;;  %p5848_p11 = por %p5847_p3, %p5846_p1 }
 0x19e   : > { %p5849_p2 = pnand %p5848_p11, %p5842_p8 }
 0x1a0   : > { %5852 = shalt.err (!%p5849_p2)
}
 0x1a1   : > { %s7308_s13 = scalar_lea.sflag [#allocation19], %s6309_s30  ;;  %s7309_s26 = sld [smem:[#allocation63_spill]] }
 0x1a2   : > { %5122 = dma.hbm_to_vmem [thread:$0]  (!%p7305_p0), %s6575_s14, 1024, %s6578_s5, %s7308_s13, %s7301_s28, %s7301_s28, %s7300_s9  }
 0x1a3   : > { %s1145_s25 = scalar_lea.vmem [#allocation23], %s6315_s24 }
 0x1a4   : > { %s1152_s18 = sshll.u32 %s1145_s25, 4  ;;  %s1153_s18 = int_to_ptr.vmem [resolvable:$true] %s1152_s18 }
 0x1a7   : > { %s6604_s2 = scalar_lea.hbm %s7309_s26, %s6435_s20  ;;  %s5858_s22 = scalar_lea.hbm %s7309_s26, 32 }
 0x1a8   : > { %s5853_s0 = scalar_lea.hbm %s6604_s2, 16  ;;  %p5859_p4 = scmp.lt.u32.totalorder %s6604_s2, %s7309_s26 }
 0x1a9   : > { %p5854_p10 = scmp.ne.s32.totalorder %s6604_s2, %s5853_s0  ;;  %p5860_p13 = scmp.lt.u32.totalorder %s5858_s22, %s5853_s0 }
 0x1aa   : > { %p5862_p7 = scmp.lt.u32.totalorder %s5853_s0, %s6604_s2 }
 0x1ab   : > { %p5856_p12 = pnand %p5854_p10, %p7304_p9  ;;  %p5861_p6 = por %p5860_p13, %p5859_p4 }
 0x1ad   : > { %p5857_p5 = pneg %p5856_p12  ;;  %p5863_p8 = por %p5862_p7, %p5861_p6 }
 0x1af   : > { %p5864_p1 = pnand %p5863_p8, %p5857_p5 }
 0x1b1   : > { %5867 = shalt.err (!%p5864_p1)
}
 0x1b2   : > { %s5868_s9 = scalar_lea.vmem %s1153_s18, 16  ;;  %s6042_s28 = smov [#allocation23]  }
 0x1b3   : > { %p5869_p3 = scmp.ne.s32.totalorder %s1153_s18, %s5868_s9  ;;  %s5873_s14 = sshll.u32 %s6042_s28, 4  ;;  %s5874_s14 = int_to_ptr.vmem [resolvable:$false] %s5873_s14 }
 0x1b4   : > { %s5875_s5 = scalar_lea.vmem %s5874_s14, 32  ;;  %p5876_p10 = scmp.lt.s32.totalorder %s1153_s18, %s5874_s14 }
 0x1b5   : > { %p5871_p11 = pnand %p5869_p3, %p7304_p9  ;;  %p5877_p12 = scmp.lt.s32.totalorder %s5875_s5, %s5868_s9 }
 0x1b7   : > { %p5872_p2 = pneg %p5871_p11  ;;  %p5878_p0 = por %p5877_p12, %p5876_p10 }
 0x1b9   : > { %p5879_p4 = pnand %p5878_p0, %p5872_p2 }
 0x1bb   : > { %5882 = shalt.err (!%p5879_p4)
}
 0x1bc   : > { %p7310_p13 = scmp.ne.s32.totalorder %s7297_s7, 0  ;;  %s7311_s15 = scalar_lea.sflag [#allocation22], %s6309_s30 }
 0x1bd   : > { %s7312_s3 = sld [smem:[#allocation65_spill]]  ;;  %s1179_s16 = scalar_lea.vmem [#allocation26], %s6315_s24 }
 0x1be   : > { %5128 = dma.hbm_to_vmem [thread:$0]  (!%p7310_p13), %s6604_s2, 16, %s1153_s18, %s7311_s15  }
 0x1bf   : > { %s1186_s11 = sshll.u32 %s1179_s16, 4  ;;  %s1187_s11 = int_to_ptr.vmem [resolvable:$true] %s1186_s11 }
 0x1c3   : > { %s6624_s19 = scalar_lea.hbm %s7312_s3, %s6435_s20  ;;  %s5888_s13 = scalar_lea.hbm %s7312_s3, 32 }
 0x1c4   : > { %s5883_s10 = scalar_lea.hbm %s6624_s19, 16  ;;  %p5889_p7 = scmp.lt.u32.totalorder %s6624_s19, %s7312_s3 }
 0x1c5   : > { %p5884_p0 = scmp.ne.s32.totalorder %s6624_s19, %s5883_s10  ;;  %p5890_p8 = scmp.lt.u32.totalorder %s5888_s13, %s5883_s10 }
 0x1c6   : > { %p5892_p3 = scmp.lt.u32.totalorder %s5883_s10, %s6624_s19 }
 0x1c7   : > { %p5886_p5 = pnand %p5884_p0, %p7304_p9  ;;  %p5891_p1 = por %p5890_p8, %p5889_p7 }
 0x1c9   : > { %p5887_p6 = pneg %p5886_p5  ;;  %p5893_p11 = por %p5892_p3, %p5891_p1 }
 0x1cb   : > { %p5894_p2 = pnand %p5893_p11, %p5887_p6 }
 0x1cd   : > { %5897 = shalt.err (!%p5894_p2)
}
 0x1ce   : > { %s5898_s20 = scalar_lea.vmem %s1187_s11, 16  ;;  %s6043_s24 = smov [#allocation26]  }
 0x1cf   : > { %p5899_p10 = scmp.ne.s32.totalorder %s1187_s11, %s5898_s20  ;;  %s5903_s2 = sshll.u32 %s6043_s24, 4  ;;  %s5904_s2 = int_to_ptr.vmem [resolvable:$false] %s5903_s2 }
 0x1d0   : > { %s5905_s25 = scalar_lea.vmem %s5904_s2, 32  ;;  %p5906_p0 = scmp.lt.s32.totalorder %s1187_s11, %s5904_s2 }
 0x1d1   : > { %p5901_p12 = pnand %p5899_p10, %p7304_p9  ;;  %p5907_p5 = scmp.lt.s32.totalorder %s5905_s25, %s5898_s20 }
 0x1d3   : > { %p5902_p4 = pneg %p5901_p12  ;;  %p5908_p13 = por %p5907_p5, %p5906_p0 }
 0x1d5   : > { %p5909_p7 = pnand %p5908_p13, %p5902_p4 }
 0x1d7   : > { %5912 = shalt.err (!%p5909_p7)
}
 0x1d8   : > { %p7313_p8 = scmp.ne.s32.totalorder %s7297_s7, 0  ;;  %s7314_s18 = sld [smem:[#allocation72_spill]] }
 0x1da   : > { %5134 = dma.hbm_to_vmem [thread:$0]  (!%p7313_p8), %s6624_s19, 16, %s1187_s11, %s1160_s1  }
 0x1de   : > { %p7315_p6 = scmp.ne.s32.totalorder %s7314_s18, 0 }
 0x1e0   : > { %1195 = sbr.rel (%p7315_p6) target bundleno = 5615 (0x15ef), region = 136 }
 0x1e7   : > { %s7316_s23 = sld [smem:[#allocation70_spill]] }
 0x1ed   : > { %p7317_p9 = scmp.eq.s32.totalorder %s7316_s23, 0 }
 0x1ef   : > { %5942 = dma.done.wait (%p7317_p9), [#allocation4], 1024   ;;  %p7318_p1 = pmov %p7317_p9 }
 0x1f1   : > { %5944 = vsyncadd (%p7318_p1), [#allocation4], 4294966272  ;;  %p7319_p3 = pmov %p7318_p1 }
 0x1f2   : > { %p7320_p13 = pmov %p7318_p1 }
 0x1f3   : > { %5946 = dma.done.wait (%p7319_p3), [#allocation7], 32  }
 0x1f4   : > { %5948 = vsyncadd (%p7320_p13), [#allocation7], 4294967264  ;;  %p7321_p11 = pmov %p7318_p1 }
 0x1f5   : > { %p7322_p2 = pmov %p7318_p1 }
 0x1f6   : > { %5950 = dma.done.wait (%p7321_p11), [#allocation10], 1040  }
 0x1f7   : > { %5952 = vsyncadd (%p7322_p2), [#allocation10], 4294966256  ;;  %s7323_s30 = sld [smem:[#allocation68_spill]]  ;;  %s7324_s7 = sld [smem:[#allocation71_spill]] }
 0x1f8   : > { %s1217_s1 = sand.u32 1, %s7316_s23  }
 0x1f9   : > { %s1218_s9 = scalar_lea.sflag [#allocation13], %s1217_s1 }
 0x1fd   : > { %s6658_s0 = sand.u32 1, %s7323_s30   ;;  %p7325_p10 = scmp.ne.s32.totalorder %s7324_s7, 0 }
 0x1fe   : > { %s5036_s22 = smul.u32 192, %s6658_s0 }
 0x200   : > { %s6661_s28 = scalar_lea.vmem [#allocation12], %s5036_s22 }
 0x201   : > { %5954 = dma.done.wait (%p7325_p10), %s1218_s9, 4096  }
 0x202   : > { %5956 = vsyncadd (%p7325_p10), %s1218_s9, 4294963200  ;;  %s4498_s14 = sshll.u32 %s6658_s0, 6  ;;  %s1236_s15 = scalar_lea.sflag [#allocation16], %s1217_s1 }
 0x203   : > { %s6668_s5 = scalar_lea.vmem [#allocation14], %s4498_s14  ;;  %s6670_s19 = scalar_lea.vmem [#allocation15], %s4498_s14 }
 0x204   : > { %5958 = dma.done.wait (%p7325_p10), %s1236_s15, 5120  }
 0x205   : > { %5960 = vsyncadd (%p7325_p10), %s1236_s15, 4294962176  ;;  %s4500_s16 = sshll.u32 %s6658_s0, 8  ;;  %s1254_s10 = scalar_lea.sflag [#allocation19], %s1217_s1 }
 0x206   : > { %s6677_s11 = scalar_lea.vmem [#allocation17], %s4500_s16  ;;  %s6679_s13 = scalar_lea.vmem [#allocation18], %s4500_s16 }
 0x207   : > { %7326 = sst [smem:[#allocation75_spill]] %s6677_s11 }
 0x208   : > { %7327 = sst [smem:[#allocation76_spill]] %s6679_s13 }
 0x209   : > { %5962 = dma.done.wait (%p7325_p10), %s1254_s10, 5120  }
 0x20a   : > { %5964 = vsyncadd (%p7325_p10), %s1254_s10, 4294962176  ;;  %s6685_s20 = scalar_lea.vmem [#allocation20], %s4498_s14  ;;  %s1272_s24 = scalar_lea.sflag [#allocation22], %s1217_s1 }
 0x20b   : > { %7328 = sst [smem:[#allocation77_spill]] %s6685_s20  ;;  %s6687_s2 = scalar_lea.vmem [#allocation21], %s4498_s14 }
 0x20c   : > { %7329 = sst [smem:[#allocation78_spill]] %s6687_s2 }
 0x20d   : > { %5966 = dma.done.wait (%p7325_p10), %s1272_s24, 1040  }
 0x20e   : > { %5968 = vsyncadd (%p7325_p10), %s1272_s24, 4294966256  ;;  %s1289_s18 = scalar_lea.sflag [#allocation25], %s1217_s1 }
 0x20f   : > { %5970 = dma.done.wait (%p7325_p10), %s1289_s18, 32  }
 0x210   : > { %5972 = vsyncadd (%p7325_p10), %s1289_s18, 4294967264  ;;  %s7330_s22 = sld [smem:[#allocation48_spill]]  ;;  %s7331_s9 = sld [smem:[#allocation49_spill]] }
 0x211   : > { %s7332_s14 = sld [smem:[#allocation47_spill]]  ;;  %s7333_s15 = sld [smem:[#allocation51_spill]] }
 0x212   : > { %s7334_s16 = sld [smem:[#allocation53_spill]]  ;;  %s7335_s10 = sld [smem:[#allocation54_spill]] }
 0x213   : > { %s7336_s24 = sld [smem:[#allocation55_spill]]  ;;  %s7337_s3 = sld [smem:[#allocation57_spill]] }
 0x214   : > { %s7338_s4 = sld [smem:[#allocation59_spill]]  ;;  %s7339_s6 = sld [smem:[#allocation61_spill]] }
 0x215   : > { %p1447_p12 = scmp.lt.s32.totalorder %s7316_s23, 1  ;;  %s1299_s13 = scalar_lea.vmem [#allocation26], %s6658_s0 }
 0x216   : > { %p7340_p4 = scmp.ne.s32.totalorder %s7316_s23, 0 }
 0x217   : > { %s6701_s1 = scalar_select %p1447_p12, %s7316_s23, 1 }
 0x218   : > { %s7341_s11 = sld [smem:[#allocation37_spill]] (!%p7340_p4)  ;;  %v6044_v1 = vmov (!%p7340_p4), 0   ;;  %v6045_v2 = vmov (!%p7340_p4), 0.0   ;;  %v5236_v3 = vld [vmem:[#allocation3] sm:$0xff] (!%p7340_p4)   ;;  %v5237_v5 = vld [vmem:[#allocation3 + $0x8] sm:$0xff] (!%p7340_p4)   ;;  %v5238_v6 = vld [vmem:[#allocation3 + $0x10] sm:$0xff] (!%p7340_p4)   ;;  %v1488_v12 = vlaneseq (!%p7340_p4) }
 0x219   : > { %s5037_s7 = smul.u32 3, %s6701_s1  ;;  %s4693_s18 = sshll.u32 %s6701_s1, 6  ;;  %5235 = vset.pattern.permute.xlu0 (!%p7340_p4), %v6044_v1  ;;  %4826 = vmatprep.subr.bf16.mxu0 (!%p7340_p4), %v6045_v2  ;;  %vm6046_vm0 = vmmov (!%p7340_p4), 0   ;;  %v5239_v7 = vld [vmem:[#allocation3 + $0x18] sm:$0xff] (!%p7340_p4)   ;;  %v5240_v8 = vld [vmem:[#allocation3 + $0x20] sm:$0xff] (!%p7340_p4)   ;;  %v5241_v9 = vld [vmem:[#allocation3 + $0x28] sm:$0xff] (!%p7340_p4)  }
 0x21a   : > { %s6706_s30 = scalar_lea.vmem %s7330_s22, %s4693_s18  ;;  %s1458_s25 = scalar_lea.vmem %s7331_s9, %s6701_s1  ;;  %4827 = vmatpush3.bf16.msra.mxu0 (!%p7340_p4), %v5236_v3  ;;  %4842 = vmatprep.mubr.msk.bf16.mxu0 (!%p7340_p4), %vm6046_vm0, %v6045_v2  ;;  %v5242_v10 = vld [vmem:[#allocation3 + $0x30] sm:$0xff] (!%p7340_p4)   ;;  %v5243_v11 = vld [vmem:[#allocation3 + $0x38] sm:$0xff] (!%p7340_p4)   ;;  %v1489_v14 = vand.u32 (!%p7340_p4), 127, %v1488_v12  ;;  %v6047_v16 = vmov (!%p7340_p4), 1.0|1.0  }
 0x21b   : > { %s6711_s8 = scalar_lea.vmem %s7332_s14, %s5037_s7  ;;  %s1461_s12 = scalar_lea.vmem %s7333_s15, %s6701_s1  ;;  %4828 = vmatprep.subr.bf16.mxu0 (!%p7340_p4), %v6045_v2  ;;  %v4520_v36 = vld [vmem:[#allocation6] ss:$0 sm:$0xff] (!%p7340_p4)  ;;  %v4521_v38 = vld [vmem:[#allocation8] ss:$0 sm:$0xff] (!%p7340_p4) }
 0x21c   : > { %s1464_s17 = scalar_lea.vmem %s7334_s16, %s6701_s1  ;;  %s1467_s21 = scalar_lea.vmem %s7335_s10, %s6701_s1 }
 0x21d   : > { %s1470_s26 = scalar_lea.vmem %s7336_s24, %s6701_s1  ;;  %s4506_s27 = sshll.u32 %s6701_s1, 2 }
 0x21e   : > { %s6723_s29 = scalar_lea.vmem %s7337_s3, %s4506_s27  ;;  %s1477_s2 = scalar_lea.vmem %s7338_s4, %s6701_s1  ;;  %v1486_v0 = vld [vmem:[%s7341_s11] sm:$0xff] (!%p7340_p4)  ;;  %v1487_v4 = vld [vmem:[%s7341_s11 + $0x8] sm:$0xff] (!%p7340_p4)  ;;  %4829 = vmatpush3.bf16.msra.mxu0 (!%p7340_p4), %v5237_v5 }
 0x21f   : > { %s1480_s20 = scalar_lea.vmem %s7339_s6, %s6701_s1  ;;  %1485 = sbr.rel (%p7340_p4) target bundleno = 1205 (0x4b5), region = 200  ;;  %1491 = vperm.xlu0 (!%p7340_p4), %5235, %v1486_v0   ;;  %4830 = vmatprep.subr.bf16.mxu0 (!%p7340_p4), %v6045_v2 }
 0x222   : > { %4831 = vmatpush3.bf16.msra.mxu0 (!%p7340_p4), %v5238_v6 }
 0x223   : > { %1494 = vperm.xlu0 (!%p7340_p4), %5235, %v1487_v4   ;;  %4832 = vmatprep.subr.bf16.mxu0 (!%p7340_p4), %v6045_v2 }
 0x226   : > { %4833 = vmatpush3.bf16.msra.mxu0 %v5239_v7 }
 0x227   : > { %4834 = vmatprep.subr.bf16.mxu0 %v6045_v2 }
 0x22a   : > { %4835 = vmatpush3.bf16.msra.mxu0 %v5240_v8 }
 0x22b   : > { %4836 = vmatprep.subr.bf16.mxu0 %v6045_v2 }
 0x22e   : > { %4837 = vmatpush3.bf16.msra.mxu0 %v5241_v9 }
 0x22f   : > { %4838 = vmatprep.subr.bf16.mxu0 %v6045_v2 }
 0x232   : > { %4839 = vmatpush3.bf16.msra.mxu0 %v5242_v10 }
 0x233   : > { %4840 = vmatprep.subr.bf16.mxu0 %v6045_v2 }
 0x236   : > { %4841 = vmatpush3.bf16.msra.mxu0 %v5243_v11 }
 0x29e   : > { %v1492_v13 = vpop.permute.xlu0 %1491 }
 0x29f   : > { %vm1496_vm1 = vcmp.eq.s32.totalorder %v1492_v13, %v1489_v14 }
 0x2a2   : > { %v1495_v15 = vpop.permute.xlu0 %1494 }
 0x2a3   : > { %vm1497_vm2 = vcmp.eq.s32.totalorder %v1495_v15, %v1489_v14 }
 0x2a4   : > { %vm4518_vm3 = vmpackc.low %vm1497_vm2, %vm1496_vm1 }
 0x2a5   : > { %4843 = vmatmul.mubr.msk.bf16.vlgmr.msra.gmra.mrb[0].mxu0 %vm4518_vm3, %v6047_v16 }
 0x378   : > { %v1601_v17 = vpop.f32.mrb[0].mxu0 }
 0x379   : > { %1610 = vadd.xlane.f32.xlu1 %v1601_v17  ;;  %v4844_v18 = vpop.f32.mrb[1].mxu0 }
 0x37a   : > { %v1604_v19 = vpop.f32.mrb[2].mxu0 }
 0x37b   : > { %v4845_v20 = vpop.f32.mrb[3].mxu0 }
 0x37d   : > { %1612 = vadd.xlane.f32.xlu1 %v1604_v19 }
 0x406   : > { %v1611_v21 = vpop.xlane.xlu1 %1610 }
 0x407   : > { %v1615_v22 = vmul.f32 0.0078125, %v1611_v21 }
 0x409   : > { %v1617_v23 = vsub.f32 %v1601_v17, %v1615_v22 }
 0x40a   : > { %v1613_v24 = vpop.xlane.xlu1 %1612 }
 0x40b   : > { %v1616_v25 = vmul.f32 0.0078125, %v1613_v24  ;;  %v1619_v26 = vmul.f32 %v1617_v23, %v1617_v23 }
 0x40d   : > { %v1618_v27 = vsub.f32 %v1604_v19, %v1616_v25  ;;  %1621 = vadd.xlane.f32.xlu0 %v1619_v26 }
 0x40f   : > { %v1620_v28 = vmul.f32 %v1618_v27, %v1618_v27 }
 0x411   : > { %1623 = vadd.xlane.f32.xlu1 %v1620_v28 }
 0x49a   : > { %v1622_v29 = vpop.xlane.xlu0 %1621 }
 0x49b   : > { %v1625_v30 = vmul.f32 0.0078125, %v1622_v29 }
 0x49d   : > { %v1627_v31 = vadd.f32 1e-07, %v1625_v30 }
 0x49e   : > { %v1624_v32 = vpop.xlane.xlu1 %1623 }
 0x49f   : > { %5244 = vrsqrt.f32 %v1627_v31  ;;  %v1626_v33 = vmul.f32 0.0078125, %v1624_v32 }
 0x4a1   : > { %v1628_v34 = vadd.f32 1e-07, %v1626_v33 }
 0x4a3   : > { %5246 = vrsqrt.f32 %v1628_v34 }
 0x4a9   : > { %v5245_v35 = vpop.eup %5244 }
 0x4aa   : > { %v1631_v37 = vmul.f32 %v5245_v35, %v1617_v23 }
 0x4ac   : > { %v1639_v39 = vmul.f32 %v4520_v36, %v1631_v37 }
 0x4ad   : > { %v5247_v40 = vpop.eup %5246 }
 0x4ae   : > { %v1647_v41 = vadd.f32 %v4521_v38, %v1639_v39  ;;  %v1632_v42 = vmul.f32 %v5247_v40, %v1618_v27 }
 0x4b0   : > { %1649 = vst [vmem:[#allocation2] sm:$0xff] %v1647_v41  ;;  %v1640_v43 = vmul.f32 %v4520_v36, %v1632_v42 }
 0x4b2   : > { %v1648_v44 = vadd.f32 %v4521_v38, %v1640_v43 }
 0x4b4   : > { %1650 = vst [vmem:[#allocation2 + $0x8] sm:$0xff] %v1648_v44 }
 0x4b5 PF: > { %v5253_v45 = vld [vmem:[%s6661_s28 + $0x4] ss:$12 sps:$4 sm:$0xff]   ;;  %v5255_v46 = vld [vmem:[%s6661_s28] ss:$12 sps:$4 sm:$0xff]   ;;  %v6048_v47 = vmov 0   ;;  %v6049_v48 = vmov 0.0   ;;  %v1689_v10 = vlaneseq }
 0x4b6   : > { %1864 = vmatprep.mubr.bf16.mxu0 %v6048_v47  ;;  %4846 = vmatprep.subr.bf16.mxu1 %v6049_v48  ;;  %v5256_v49 = vld [vmem:[%s6661_s28 + $0x1c] ss:$12 sps:$4 sm:$0xff]   ;;  %v5258_v50 = vld [vmem:[%s6661_s28 + $0x18] ss:$12 sps:$4 sm:$0xff]   ;;  %v5259_v51 = vld [vmem:[%s6661_s28 + $0x34] ss:$12 sps:$4 sm:$0xff]  }
 0x4b7   : > { %1832 = vmatprep.subr.bf16.mxu0 %v5253_v45  ;;  %v5261_v52 = vld [vmem:[%s6661_s28 + $0x30] ss:$12 sps:$4 sm:$0xff]   ;;  %v5262_v53 = vld [vmem:[%s6661_s28 + $0x4c] ss:$12 sps:$4 sm:$0xff]   ;;  %v5264_v54 = vld [vmem:[%s6661_s28 + $0x48] ss:$12 sps:$4 sm:$0xff]  }
 0x4b8   : > { %1833 = vmatpush1.bf16.msra.mxu0 %v5255_v46  ;;  %v5265_v55 = vld [vmem:[%s6661_s28 + $0x64] ss:$12 sps:$4 sm:$0xff]   ;;  %v5277_v56 = vld [vmem:[%s6661_s28 + $0x8] ss:$12 sps:$4 sm:$0xff]   ;;  %v5278_v57 = vld [vmem:[%s6661_s28 + $0x20] ss:$12 sps:$4 sm:$0xff]  }
 0x4b9   : > { %1834 = vmatprep.subr.bf16.mxu0 %v5256_v49  ;;  %4847 = vmatpush3.bf16.msra.mxu1 %v5277_v56  ;;  %v5267_v58 = vld [vmem:[%s6661_s28 + $0x60] ss:$12 sps:$4 sm:$0xff]   ;;  %v5268_v59 = vld [vmem:[%s6661_s28 + $0x7c] ss:$12 sps:$4 sm:$0xff]   ;;  %v5279_v60 = vld [vmem:[%s6661_s28 + $0x38] ss:$12 sps:$4 sm:$0xff]  }
 0x4ba   : > { %4848 = vmatprep.subr.bf16.mxu1 %v6049_v48  ;;  %v5270_v61 = vld [vmem:[%s6661_s28 + $0x78] ss:$12 sps:$4 sm:$0xff]   ;;  %v5271_v62 = vld [vmem:[%s6661_s28 + $0x94] ss:$12 sps:$4 sm:$0xff]   ;;  %v5280_v63 = vld [vmem:[%s6661_s28 + $0x50] ss:$12 sps:$4 sm:$0xff]  }
 0x4bb   : > { %v5273_v0 = vld [vmem:[%s6661_s28 + $0x90] ss:$12 sps:$4 sm:$0xff]   ;;  %v5274_v1 = vld [vmem:[%s6661_s28 + $0xac] ss:$12 sps:$4 sm:$0xff]   ;;  %v5281_v2 = vld [vmem:[%s6661_s28 + $0x68] ss:$12 sps:$4 sm:$0xff]  }
 0x4bc   : > { %1835 = vmatpush1.bf16.msra.mxu0 %v5258_v50  ;;  %v5276_v3 = vld [vmem:[%s6661_s28 + $0xa8] ss:$12 sps:$4 sm:$0xff]   ;;  %v5282_v6 = vld [vmem:[%s6661_s28 + $0x80] ss:$12 sps:$4 sm:$0xff]   ;;  %v5283_v8 = vld [vmem:[%s6661_s28 + $0x98] ss:$12 sps:$4 sm:$0xff]  }
 0x4bd   : > { %1836 = vmatprep.subr.bf16.mxu0 %v5259_v51  ;;  %4849 = vmatpush3.bf16.msra.mxu1 %v5278_v57  ;;  %v6760_v4 = vld [vmem:[#allocation2] sm:$0xff]  ;;  %v6762_v5 = vld [vmem:[#allocation2 + $0x8] sm:$0xff]  ;;  %vm6050_vm4 = vmmov 0   ;;  %v6782_v11 = vshrl.u32 %v1689_v10, 7  ;;  %vm1922_vm5 = vcmask 523264   ;;  %vm2212_vm6 = vcmask 1043456  }
 0x4be   : > { %4850 = vmatprep.subr.bf16.mxu1 %v6049_v48  ;;  %v1653_v7 = vpack.c.bf16 %v6762_v5, %v6760_v4  ;;  %v5284_v9 = vld [vmem:[%s6661_s28 + $0xb0] ss:$12 sps:$4 sm:$0xff]   ;;  %4862 = vmatprep.mubr.msk.bf16.mxu1 %vm6050_vm4, %v6049_v48  ;;  %v1687_v13 = vld [vmem:[%s6711_s8] sm:$0x7]  ;;  %s6051_s8 = smov 64   ;;  %s7342_s6 = sld [smem:[#allocation38_spill]] }
 0x4bf   : > { %v1695_v12 = vsub.s32 1, %v6782_v11  ;;  %v6787_v14 = vsub.s32 0, %v6782_v11  ;;  %v1699_v31 = vsub.s32 2, %v6782_v11  ;;  %v6052_v51 = vmov 1966171168   ;;  %s7349_s28 = sld [smem:[#allocation76_spill]] }
 0x4c0   : > { %1837 = vmatpush1.bf16.msra.mxu0 %v5261_v52  ;;  %v2133_v52 = vunpack.c.l.s4 %v6052_v51  ;;  %vm2160_vm7 = vcmask 64512  }
 0x4c1   : > { %1838 = vmatprep.subr.bf16.mxu0 %v5262_v53  ;;  %4851 = vmatpush3.bf16.msra.mxu1 %v5279_v60  ;;  %v1696_v15 = vrot.slane %v1687_v13, %v1695_v12  ;;  %v1692_v16 = vrot.slane %v1687_v13, %v6787_v14  ;;  %v1700_v32 = vrot.slane %v1687_v13, %v1699_v31 }
 0x4c2   : > { %4852 = vmatprep.subr.bf16.mxu1 %v6049_v48  ;;  %v2134_v53 = vunpack.c.0.s8 %v2133_v52 }
 0x4c4   : > { %1839 = vmatpush1.bf16.msra.mxu0 %v5264_v54  ;;  %v2137_v54 = vsub.s32 %v2134_v53, %v6782_v11 }
 0x4c5   : > { %1840 = vmatprep.subr.bf16.mxu0 %v5265_v55  ;;  %4853 = vmatpush3.bf16.msra.mxu1 %v5280_v63  ;;  %v4550_v55 = vld.sshfl [vmem:[%s7342_s6] sm:$0x11 pattern:$0x75316420] }
 0x4c6   : > { %4854 = vmatprep.subr.bf16.mxu1 %v6049_v48  ;;  %v2138_v56 = vrot.slane %v4550_v55, %v2137_v54 }
 0x4c8   : > { %1841 = vmatpush1.bf16.msra.mxu0 %v5267_v58  ;;  %v2149_v57 = vrot.slane %v2138_v56, %v6787_v14  ;;  %v2131_v58 = vcombine.high %v4550_v55, %v4550_v55 }
 0x4c9   : > { %1842 = vmatprep.subr.bf16.mxu0 %v5268_v59  ;;  %4855 = vmatpush3.bf16.msra.mxu1 %v5281_v2 }
 0x4ca   : > { %4856 = vmatprep.subr.bf16.mxu1 %v6049_v48 }
 0x4cc   : > { %1843 = vmatpush1.bf16.msra.mxu0 %v5270_v61 }
 0x4cd   : > { %1844 = vmatprep.subr.bf16.mxu0 %v5271_v62  ;;  %4857 = vmatpush3.bf16.msra.mxu1 %v5282_v6 }
 0x4ce   : > { %4858 = vmatprep.subr.bf16.mxu1 %v6049_v48 }
 0x4d0   : > { %1845 = vmatpush1.bf16.msra.mxu0 %v5273_v0 }
 0x4d1   : > { %1846 = vmatprep.subr.bf16.mxu0 %v5274_v1  ;;  %4859 = vmatpush3.bf16.msra.mxu1 %v5283_v8  ;;  %v2145_v1 = vrot.slane %v2131_v58, %v2137_v54 }
 0x4d2   : > { %4860 = vmatprep.subr.bf16.mxu1 %v6049_v48 }
 0x4d4   : > { %1847 = vmatpush1.bf16.msra.mxu0 %v5276_v3  ;;  %v2153_v3 = vrot.slane %v2145_v1, %v6787_v14 }
 0x4d5   : > { %4890 = vmatprep.subr.bf16.mxu0 %v6049_v48  ;;  %4861 = vmatpush3.bf16.msra.mxu1 %v5284_v9 }
 0x4d6   : > { %4866 = vmatprep.subr.bf16.mxu1 %v6049_v48 }
 0x4d7   : > { %1865 = vmatmul.mubr.bf16.vlgmr.msra.gmra.mrb[0].mxu0 %v1653_v7 }
 0x4d8   : > { %4892 = vmatprep.mubr.msk.bf16.mxu0 %vm6050_vm4, %v6049_v48  ;;  %4863 = vmatmul.mubr.bf16.vlgmr.msra.gmra.mrb[0].mxu1 %v1653_v7 }
 0x4d9   : > { %4868 = vmatprep.mubr.msk.bf16.mxu1 %vm6050_vm4, %v6049_v48 }
 0x5aa   : > { %v1866_v17 = vpop.f32.mrb[0].mxu0 }
 0x5ab   : > { %v1868_v18 = vpop.f32.mrb[1].mxu0  ;;  %v1867_v22 = vadd.f32 %v1866_v17, %v1692_v16  ;;  %v1909_v33 = vpop.f32.mrb[0].mxu1 }
 0x5ac   : > { %v1869_v19 = vadd.f32 %v1868_v18, %v1696_v15  ;;  %v1870_v20 = vpop.f32.mrb[2].mxu0  ;;  %v1910_v34 = vadd.f32 %v1909_v33, %v1700_v32  ;;  %v4864_v35 = vpop.f32.mrb[1].mxu1 }
 0x5ad   : > { %v1872_v21 = vpop.f32.mrb[3].mxu0  ;;  %v1871_v26 = vadd.f32 %v1870_v20, %v1692_v16  ;;  %v1916_v28 = vpack.c.bf16 %v1867_v22, %v1867_v22  ;;  %v1912_v36 = vpop.f32.mrb[2].mxu1 }
 0x5ae   : > { %v1918_v23 = vpack.c.bf16 %v1869_v19, %v1869_v19  ;;  %v1873_v24 = vadd.f32 %v1872_v21, %v1696_v15  ;;  %v6809_v37 = vpack.c.bf16 %v1910_v34, %v1910_v34  ;;  %v4865_v38 = vpop.f32.mrb[3].mxu1  ;;  %v1913_v43 = vadd.f32 %v1912_v36, %v1700_v32 }
 0x5af   : > { %v1917_v29 = vpack.c.bf16 %v1871_v26, %v1871_v26 }
 0x5b0   : > { %v1927_v25 = vsel %vm1922_vm5, %v1918_v23, 0  ;;  %v1919_v27 = vpack.c.bf16 %v1873_v24, %v1873_v24  ;;  %2019 = vrot.lane.b32.xlu0 %v1918_v23, %s6051_s8  ;;  %v2214_v39 = vsel %vm2212_vm6, %v6809_v37, 0  ;;  %v6820_v46 = vpack.c.bf16 %v1913_v43, %v1913_v43 }
 0x5b1   : > { %4867 = vmatpush3.bf16.xpose.msra.mxu1 %v1927_v25  ;;  %4891 = vmatpush3.bf16.msra.mxu0 %v2214_v39 }
 0x5b2   : > { %2071 = vrot.lane.b32.xlu1 %v1919_v27, %s6051_s8  ;;  %4872 = vmatprep.subr.bf16.mxu1 %v6049_v48  ;;  %v1973_v30 = vsel %vm1922_vm5, %v1919_v27, 0  ;;  %v2260_v49 = vsel %vm2212_vm6, %v6820_v46, 0 }
 0x5b3   : > { %4902 = vmatprep.subr.bf16.mxu0 %v6049_v48 }
 0x5b4   : > { %2016 = vrot.lane.b32.xlu0 %v1916_v28, %s6051_s8 }
 0x5b6   : > { %2068 = vrot.lane.b32.xlu1 %v1917_v29, %s6051_s8 }
 0x5b8   : > { %4869 = vmatmul.mubr.msk.bf16.vlgmr.msra.gmra.mrb[4].mxu1 %vm1922_vm5, %v1916_v28 }
 0x5b9   : > { %4873 = vmatpush3.bf16.xpose.msra.mxu1 %v1973_v30  ;;  %4874 = vmatprep.mubr.msk.bf16.mxu1 %vm6050_vm4, %v6049_v48 }
 0x5ba   : > { %4878 = vmatprep.subr.bf16.mxu1 %v6049_v48 }
 0x5c0   : > { %4875 = vmatmul.mubr.msk.bf16.vlgmr.msra.gmra.mrb[8].mxu1 %vm1922_vm5, %v1917_v29 }
 0x5c1   : > { %4880 = vmatprep.mubr.msk.bf16.mxu1 %vm6050_vm4, %v6049_v48 }
 0x622   : > { %v2020_v40 = vpop.permute.xlu0 %2019 }
 0x623   : > { %v2025_v41 = vsel %vm1922_vm5, %v2020_v40, 0 }
 0x624   : > { %4879 = vmatpush3.bf16.xpose.msra.mxu1 %v2025_v41  ;;  %v2072_v42 = vpop.permute.xlu1 %2071 }
 0x625   : > { %4884 = vmatprep.subr.bf16.mxu1 %v6049_v48  ;;  %v2077_v45 = vsel %vm1922_vm5, %v2072_v42, 0 }
 0x626   : > { %v2017_v44 = vpop.permute.xlu0 %2016 }
 0x628   : > { %v2069_v50 = vpop.permute.xlu1 %2068 }
 0x62b   : > { %4881 = vmatmul.mubr.msk.bf16.vlgmr.msra.gmra.mrb[12].mxu1 %vm1922_vm5, %v2017_v44 }
 0x62c   : > { %4885 = vmatpush3.bf16.xpose.msra.mxu1 %v2077_v45  ;;  %4886 = vmatprep.mubr.msk.bf16.mxu1 %vm6050_vm4, %v6049_v48 }
 0x62d   : > { %4896 = vmatprep.subr.bf16.mxu1 %v6049_v48 }
 0x633   : > { %4887 = vmatmul.mubr.msk.bf16.vlgmr.msra.gmra.mrb[16].mxu1 %vm1922_vm5, %v2069_v50 }
 0x634   : > { %4897 = vmatpush3.bf16.msra.mxu1 %v2260_v49  ;;  %4898 = vmatprep.mubr.msk.bf16.mxu1 %vm6050_vm4, %v6049_v48 }
 0x635   : > { %4908 = vmatprep.subr.bf16.mxu1 %v6049_v48 }
 0x68b   : > { %v1963_v59 = vpop.f32.mrb[4].mxu1 }
 0x68c   : > { %v2119_v60 = vmul.f32 0.125, %v1963_v59  ;;  %v4870_v61 = vpop.f32.mrb[5].mxu1 }
 0x68d   : > { %v1966_v62 = vpop.f32.mrb[6].mxu1 }
 0x68e   : > { %v4871_v63 = vpop.f32.mrb[7].mxu1  ;;  %v2156_v0 = vadd.f32 %v2149_v57, %v2119_v60 }
 0x690   : > { %v2161_v2 = vsel %vm2160_vm7, %v2156_v0, -inf }
 0x691   : > { %2162 = vmax.xlane.f32.xlu0 %v2161_v2 }
 0x693   : > { %v2009_v6 = vpop.f32.mrb[8].mxu1 }
 0x694   : > { %v2120_v7 = vmul.f32 0.125, %v2009_v6  ;;  %v4876_v8 = vpop.f32.mrb[9].mxu1 }
 0x695   : > { %v2012_v9 = vpop.f32.mrb[10].mxu1 }
 0x696   : > { %v4877_v13 = vpop.f32.mrb[11].mxu1  ;;  %v2157_v15 = vadd.f32 %v2153_v3, %v2120_v7 }
 0x698   : > { %v2164_v16 = vsel %vm2160_vm7, %v2157_v15, -inf }
 0x699   : > { %2165 = vmax.xlane.f32.xlu1 %v2164_v16  ;;  %v5285_v16 = vld [vmem:[%s6706_s30] sm:$0xff]  }
 0x6fe   : > { %v2061_v17 = vpop.f32.mrb[12].mxu1 }
 0x6ff   : > { %v2121_v18 = vmul.f32 0.125, %v2061_v17  ;;  %v4882_v19 = vpop.f32.mrb[13].mxu1 }
 0x700   : > { %v2064_v20 = vpop.f32.mrb[14].mxu1 }
 0x701   : > { %v4883_v21 = vpop.f32.mrb[15].mxu1  ;;  %v2158_v22 = vadd.f32 %v2149_v57, %v2121_v18  ;;  %v5286_v18 = vld [vmem:[%s6706_s30 + $0x8] sm:$0xff]  }
 0x703   : > { %v2167_v23 = vsel %vm2160_vm7, %v2158_v22, -inf }
 0x704   : > { %2168 = vmax.xlane.f32.xlu0 %v2167_v23 }
 0x706   : > { %v2113_v24 = vpop.f32.mrb[16].mxu1 }
 0x707   : > { %v2122_v25 = vmul.f32 0.125, %v2113_v24  ;;  %v4888_v26 = vpop.f32.mrb[17].mxu1  ;;  %v5288_v24 = vld [vmem:[%s6706_s30 + $0x18] sm:$0xff]  }
 0x708   : > { %v2116_v27 = vpop.f32.mrb[18].mxu1 }
 0x709   : > { %v4889_v28 = vpop.f32.mrb[19].mxu1  ;;  %v2159_v29 = vadd.f32 %v2153_v3, %v2122_v25 }
 0x70a   : > { %v5289_v28 = vld [vmem:[%s6706_s30 + $0x20] sm:$0xff]  }
 0x70b   : > { %v2170_v30 = vsel %vm2160_vm7, %v2159_v29, -inf }
 0x70c   : > { %2171 = vmax.xlane.f32.xlu0 %v2170_v30  ;;  %v5291_v30 = vld [vmem:[%s6706_s30 + $0x30] sm:$0xff]  }
 0x71e   : > { %v2163_v32 = vpop.xlane.xlu0 %2162 }
 0x71f   : > { %v2173_v33 = vsub.f32 %v2156_v0, %v2163_v32  ;;  %v5292_v32 = vld [vmem:[%s6706_s30 + $0x38] sm:$0xff]  }
 0x721   : > { %v2177_v34 = vmul.f32 1.442695, %v2173_v33 }
 0x723   : > { %5405 = vpow2.f32 %v2177_v34 }
 0x726   : > { %v2166_v35 = vpop.xlane.xlu1 %2165 }
 0x727   : > { %v2174_v36 = vsub.f32 %v2157_v15, %v2166_v35 }
 0x729   : > { %v2179_v38 = vmul.f32 1.442695, %v2174_v36 }
 0x72b   : > { %5407 = vpow2.f32 %v2179_v38  ;;  %v5293_v38 = vld [vmem:[%s6668_s5] sm:$0xff]  }
 0x72d   : > { %v5406_v39 = vpop.eup %5405 }
 0x72e   : > { %v2185_v40 = vsel %vm2160_vm7, %v5406_v39, 0.0 }
 0x72f   : > { %2186 = vadd.xlane.f32.xlu1 %v2185_v40 }
 0x735   : > { %v5408_v41 = vpop.eup %5407 }
 0x736   : > { %v2188_v42 = vsel %vm2160_vm7, %v5408_v41, 0.0 }
 0x737   : > { %2189 = vadd.xlane.f32.xlu0 %v2188_v42 }
 0x791   : > { %v2169_v43 = vpop.xlane.xlu0 %2168 }
 0x792   : > { %v2175_v44 = vsub.f32 %v2158_v22, %v2169_v43  ;;  %v5287_v22 = vld [vmem:[%s6706_s30 + $0x10] sm:$0xff]   ;;  %v5295_v43 = vld [vmem:[%s6668_s5 + $0x10] sm:$0xff]  }
 0x794   : > { %v2181_v45 = vmul.f32 1.442695, %v2175_v44 }
 0x796   : > { %5409 = vpow2.f32 %v2181_v45 }
 0x799   : > { %v2172_v49 = vpop.xlane.xlu0 %2171 }
 0x79a   : > { %v2176_v50 = vsub.f32 %v2159_v29, %v2172_v49  ;;  %v5290_v29 = vld [vmem:[%s6706_s30 + $0x28] sm:$0xff]  }
 0x79b   : > { %v5296_v49 = vld [vmem:[%s6668_s5 + $0x18] sm:$0xff]  }
 0x79c   : > { %v2183_v51 = vmul.f32 1.442695, %v2176_v50  ;;  %v5297_v50 = vld [vmem:[%s6668_s5 + $0x20] sm:$0xff]  }
 0x79e   : > { %5411 = vpow2.f32 %v2183_v51  ;;  %v5298_v51 = vld [vmem:[%s6668_s5 + $0x28] sm:$0xff]  }
 0x7a0   : > { %v5410_v52 = vpop.eup %5409 }
 0x7a1   : > { %v2191_v53 = vsel %vm2160_vm7, %v5410_v52, 0.0 }
 0x7a2   : > { %2192 = vadd.xlane.f32.xlu1 %v2191_v53 }
 0x7a8   : > { %v5412_v54 = vpop.eup %5411 }
 0x7a9   : > { %v2194_v55 = vsel %vm2160_vm7, %v5412_v54, 0.0 }
 0x7aa   : > { %2195 = vadd.xlane.f32.xlu0 %v2194_v55 }
 0x7b3   : > { %2303 = vrot.lane.b32.xlu1 %v6809_v37, %s6051_s8 }
 0x7bc   : > { %v2187_v56 = vpop.xlane.xlu1 %2186 }
 0x7bd   : > { %5413 = vrcp.f32 %v2187_v56 }
 0x7c0   : > { %2352 = vrot.lane.b32.xlu0 %v6820_v46, %s6051_s8 }
 0x7c4   : > { %v2190_v57 = vpop.xlane.xlu0 %2189 }
 0x7c5   : > { %5415 = vrcp.f32 %v2190_v57 }
 0x7c7   : > { %v5414_v58 = vpop.eup %5413 }
 0x7c8   : > { %v2201_v59 = vmul.f32 %v5414_v58, %v5406_v39  ;;  %v5294_v39 = vld [vmem:[%s6668_s5 + $0x8] sm:$0xff]   ;;  %v5299_v58 = vld [vmem:[%s6668_s5 + $0x30] sm:$0xff]  }
 0x7ca   : > { %v2205_v60 = vpack.c.bf16 %v2201_v59, %v2201_v59  ;;  %v5300_v59 = vld [vmem:[%s6668_s5 + $0x38] sm:$0xff]  }
 0x7cc   : > { %4893 = vmatmul.mubr.msk.bf16.vlgmr.msra.gmra.mrb[4].mxu0 %vm2160_vm7, %v2205_v60  ;;  %v4555_v60 = vld [vmem:[%s1458_s25] ss:$0 sm:$0xff] }
 0x7cd   : > { %4904 = vmatprep.mubr.msk.bf16.mxu0 %vm6050_vm4, %v6049_v48 }
 0x7cf   : > { %v5416_v61 = vpop.eup %5415 }
 0x7d0   : > { %v2202_v62 = vmul.f32 %v5416_v61, %v5408_v41 }
 0x7d2   : > { %v2206_v63 = vpack.c.bf16 %v2202_v62, %v2202_v62 }
 0x7d4   : > { %4899 = vmatmul.mubr.msk.bf16.vlgmr.msra.gmra.mrb[20].mxu1 %vm2160_vm7, %v2206_v63 }
 0x7d5   : > { %4910 = vmatprep.mubr.msk.bf16.mxu1 %vm6050_vm4, %v6049_v48 }
 0x82f   : > { %v2193_v37 = vpop.xlane.xlu1 %2192 }
 0x830   : > { %5417 = vrcp.f32 %v2193_v37 }
 0x833   : > { %v2304_v46 = vpop.permute.xlu1 %2303 }
 0x834   : > { %v2309_v0 = vsel %vm2212_vm6, %v2304_v46, 0 }
 0x835   : > { %4903 = vmatpush3.bf16.msra.mxu0 %v2309_v0 }
 0x836   : > { %4914 = vmatprep.subr.bf16.mxu0 %v6049_v48 }
 0x837   : > { %v2196_v1 = vpop.xlane.xlu0 %2195 }
 0x838   : > { %5419 = vrcp.f32 %v2196_v1 }
 0x83a   : > { %v5418_v2 = vpop.eup %5417 }
 0x83b   : > { %v2203_v3 = vmul.f32 %v5418_v2, %v5410_v52  ;;  %v2353_v6 = vpop.permute.xlu0 %2352  ;;  %v5301_v2 = vld [vmem:[%s6670_s19] sm:$0xff]  }
 0x83c   : > { %v2358_v7 = vsel %vm2212_vm6, %v2353_v6, 0  ;;  %v5303_v6 = vld [vmem:[%s6670_s19 + $0x10] sm:$0xff]  }
 0x83d   : > { %4909 = vmatpush3.bf16.msra.mxu1 %v2358_v7  ;;  %v2207_v8 = vpack.c.bf16 %v2203_v3, %v2203_v3  ;;  %v5302_v3 = vld [vmem:[%s6670_s19 + $0x8] sm:$0xff]   ;;  %v5304_v7 = vld [vmem:[%s6670_s19 + $0x18] sm:$0xff]  }
 0x83e   : > { %4934 = vmatprep.subr.bf16.mxu1 %v6049_v48 }
 0x83f   : > { %4905 = vmatmul.mubr.msk.bf16.vlgmr.msra.gmra.mrb[8].mxu0 %vm2160_vm7, %v2207_v8  ;;  %v5305_v8 = vld [vmem:[%s6670_s19 + $0x20] sm:$0xff]  }
 0x840   : > { %4930 = vmatprep.mubr.msk.bf16.mxu0 %vm6050_vm4, %v6049_v48  ;;  %4915 = vmatpush3.bf16.msra.mxu0 %v5285_v16  ;;  %v4564_v16 = vld [vmem:[%s1461_s12] ss:$0 sm:$0xff]  ;;  %s7346_s12 = sld [smem:[#allocation75_spill]] }
 0x841   : > { %4916 = vmatprep.subr.bf16.mxu0 %v6049_v48 }
 0x842   : > { %v5420_v9 = vpop.eup %5419 }
 0x843   : > { %v2204_v13 = vmul.f32 %v5420_v9, %v5412_v54  ;;  %v5306_v9 = vld [vmem:[%s6670_s19 + $0x28] sm:$0xff]  }
 0x844   : > { %4917 = vmatpush3.bf16.msra.mxu0 %v5286_v18 }
 0x845   : > { %v2208_v15 = vpack.c.bf16 %v2204_v13, %v2204_v13  ;;  %4918 = vmatprep.subr.bf16.mxu0 %v6049_v48  ;;  %v5307_v13 = vld [vmem:[%s6670_s19 + $0x30] sm:$0xff]  }
 0x847   : > { %4911 = vmatmul.mubr.msk.bf16.vlgmr.msra.gmra.mrb[24].mxu1 %vm2160_vm7, %v2208_v15  ;;  %v5308_v15 = vld [vmem:[%s6670_s19 + $0x38] sm:$0xff]   ;;  %s7354_s19 = scalar_lea.vmem [#allocation23], %s6658_s0 }
 0x848   : > { %4950 = vmatprep.mubr.msk.bf16.mxu1 %vm6050_vm4, %v6049_v48  ;;  %4919 = vmatpush3.bf16.msra.mxu0 %v5287_v22 }
 0x849   : > { %4920 = vmatprep.subr.bf16.mxu0 %v6049_v48  ;;  %4935 = vmatpush3.bf16.msra.mxu1 %v5293_v38 }
 0x84a   : > { %4936 = vmatprep.subr.bf16.mxu1 %v6049_v48 }
 0x84c   : > { %4921 = vmatpush3.bf16.msra.mxu0 %v5288_v24 }
 0x84d   : > { %4922 = vmatprep.subr.bf16.mxu0 %v6049_v48  ;;  %4937 = vmatpush3.bf16.msra.mxu1 %v5294_v39 }
 0x84e   : > { %4938 = vmatprep.subr.bf16.mxu1 %v6049_v48 }
 0x850   : > { %4923 = vmatpush3.bf16.msra.mxu0 %v5289_v28 }
 0x851   : > { %4924 = vmatprep.subr.bf16.mxu0 %v6049_v48  ;;  %4939 = vmatpush3.bf16.msra.mxu1 %v5295_v43 }
 0x852   : > { %4940 = vmatprep.subr.bf16.mxu1 %v6049_v48 }
 0x854   : > { %4925 = vmatpush3.bf16.msra.mxu0 %v5290_v29 }
 0x855   : > { %4926 = vmatprep.subr.bf16.mxu0 %v6049_v48  ;;  %4941 = vmatpush3.bf16.msra.mxu1 %v5296_v49 }
 0x856   : > { %4942 = vmatprep.subr.bf16.mxu1 %v6049_v48 }
 0x858   : > { %4927 = vmatpush3.bf16.msra.mxu0 %v5291_v30 }
 0x859   : > { %4928 = vmatprep.subr.bf16.mxu0 %v6049_v48  ;;  %4943 = vmatpush3.bf16.msra.mxu1 %v5297_v50 }
 0x85a   : > { %4944 = vmatprep.subr.bf16.mxu1 %v6049_v48 }
 0x85c   : > { %4929 = vmatpush3.bf16.msra.mxu0 %v5292_v32 }
 0x85d   : > { %4954 = vmatprep.subr.bf16.mxu0 %v6049_v48  ;;  %4945 = vmatpush3.bf16.msra.mxu1 %v5298_v51 }
 0x85e   : > { %4946 = vmatprep.subr.bf16.mxu1 %v6049_v48 }
 0x861   : > { %4947 = vmatpush3.bf16.msra.mxu1 %v5299_v58  ;;  %v5311_v58 = vld [vmem:[%s7346_s12 + $0x4] ss:$16 sps:$4 sm:$0xff]  }
 0x862   : > { %4948 = vmatprep.subr.bf16.mxu1 %v6049_v48 }
 0x865   : > { %4949 = vmatpush3.bf16.msra.mxu1 %v5300_v59  ;;  %v5312_v59 = vld [vmem:[%s7346_s12 + $0x8] ss:$16 sps:$4 sm:$0xff]  }
 0x866   : > { %3027 = vmatprep.subr.bf16.mxu1 %v5311_v58  ;;  %v5359_v58 = vld [vmem:[%s7349_s28] sm:$0xff]  }
 0x89f   : > { %v6862_v17 = vpop.f32.mrb[4].mxu0 }
 0x8a0   : > { %v4894_v19 = vpop.f32.mrb[5].mxu0 }
 0x8a1   : > { %v2253_v20 = vpop.f32.mrb[6].mxu0 }
 0x8a2   : > { %v4895_v21 = vpop.f32.mrb[7].mxu0 }
 0x8a7   : > { %v2296_v23 = vpop.f32.mrb[20].mxu1 }
 0x8a8   : > { %v4900_v25 = vpop.f32.mrb[21].mxu1 }
 0x8a9   : > { %v2299_v26 = vpop.f32.mrb[22].mxu1 }
 0x8aa   : > { %v4901_v27 = vpop.f32.mrb[23].mxu1 }
 0x912   : > { %v2345_v33 = vpop.f32.mrb[8].mxu0 }
 0x913   : > { %v4906_v34 = vpop.f32.mrb[9].mxu0 }
 0x914   : > { %v2348_v35 = vpop.f32.mrb[10].mxu0 }
 0x915   : > { %v4907_v36 = vpop.f32.mrb[11].mxu0 }
 0x91a   : > { %v2394_v40 = vpop.f32.mrb[24].mxu1 }
 0x91b   : > { %v5248_v41 = vpack.i.bf16 %v2394_v40, %v2345_v33  ;;  %v4912_v42 = vpop.f32.mrb[25].mxu1 }
 0x91c   : > { %v2397_v44 = vpop.f32.mrb[26].mxu1 }
 0x91d   : > { %5249 = vrot.lane.b32.xlu1 %v5248_v41, %s6051_s8  ;;  %v4913_v45 = vpop.f32.mrb[27].mxu1  ;;  %v4573_v44 = vld [vmem:[%s1464_s17] ss:$0 sm:$0xff] }
 0x98f   : > { %v5250_v52 = vpop.permute.xlu1 %5249 }
 0x990   : > { %v5252_v53 = vunpack.i.h.bf16 %v5250_v52  ;;  %v5251_v54 = vunpack.i.l.bf16 %v5250_v52 }
 0x992   : > { %v2409_v55 = vsel %vm1922_vm5, %v2296_v23, %v5252_v53  ;;  %v2408_v56 = vsel %vm1922_vm5, %v6862_v17, %v5251_v54 }
 0x993   : > { %v2410_v57 = vpack.c.bf16 %v2409_v55, %v2408_v56 }
 0x995   : > { %4931 = vmatmul.mubr.bf16.vlgmr.msra.gmra.mrb[12].mxu0 %v2410_v57  ;;  %v5309_v57 = vld [vmem:[%s7346_s12] ss:$16 sps:$4 sm:$0xff]  }
 0x996   : > { %4970 = vmatprep.mubr.msk.bf16.mxu0 %vm6050_vm4, %v6049_v48  ;;  %4955 = vmatpush3.bf16.msra.mxu0 %v5301_v2 }
 0x997   : > { %4956 = vmatprep.subr.bf16.mxu0 %v6049_v48 }
 0x99a   : > { %4957 = vmatpush3.bf16.msra.mxu0 %v5302_v3 }
 0x99b   : > { %4958 = vmatprep.subr.bf16.mxu0 %v6049_v48 }
 0x99e   : > { %4959 = vmatpush3.bf16.msra.mxu0 %v5303_v6 }
 0x99f   : > { %4960 = vmatprep.subr.bf16.mxu0 %v6049_v48 }
 0x9a2   : > { %4961 = vmatpush3.bf16.msra.mxu0 %v5304_v7  ;;  %v5323_v7 = vld [vmem:[%s7346_s12 + $0x44] ss:$16 sps:$4 sm:$0xff]  }
 0x9a3   : > { %4962 = vmatprep.subr.bf16.mxu0 %v6049_v48 }
 0x9a6   : > { %4963 = vmatpush3.bf16.msra.mxu0 %v5305_v8  ;;  %v5326_v8 = vld [vmem:[%s7346_s12 + $0x4c] ss:$16 sps:$4 sm:$0xff]  }
 0x9a7   : > { %4964 = vmatprep.subr.bf16.mxu0 %v6049_v48 }
 0x9aa   : > { %4965 = vmatpush3.bf16.msra.mxu0 %v5306_v9  ;;  %v5321_v9 = vld [vmem:[%s7346_s12 + $0x40] ss:$16 sps:$4 sm:$0xff]  }
 0x9ab   : > { %4966 = vmatprep.subr.bf16.mxu0 %v6049_v48 }
 0x9ae   : > { %4967 = vmatpush3.bf16.msra.mxu0 %v5307_v13  ;;  %v5324_v13 = vld [vmem:[%s7346_s12 + $0x48] ss:$16 sps:$4 sm:$0xff]  }
 0x9af   : > { %4968 = vmatprep.subr.bf16.mxu0 %v6049_v48 }
 0x9b2   : > { %4969 = vmatpush3.bf16.msra.mxu0 %v5308_v15  ;;  %v5329_v15 = vld [vmem:[%s7346_s12 + $0x64] ss:$16 sps:$4 sm:$0xff]  }
 0xa68   : > { %v2516_v61 = vpop.f32.mrb[12].mxu0 }
 0xa69   : > { %v4932_v62 = vpop.f32.mrb[13].mxu0  ;;  %v6903_v37 = vadd.f32 %v4555_v60, %v2516_v61  ;;  %v5317_v61 = vld [vmem:[%s7346_s12 + $0x24] ss:$16 sps:$4 sm:$0xff]  }
 0xa6a   : > { %v2519_v63 = vpop.f32.mrb[14].mxu0  ;;  %v5320_v62 = vld [vmem:[%s7346_s12 + $0x2c] ss:$16 sps:$4 sm:$0xff]  }
 0xa6b   : > { %v6905_v46 = vadd.f32 %v4555_v60, %v2519_v63  ;;  %v4933_v0 = vpop.f32.mrb[15].mxu0  ;;  %v5314_v60 = vld [vmem:[%s7346_s12 + $0xc] ss:$16 sps:$4 sm:$0xff]   ;;  %v5315_v63 = vld [vmem:[%s7346_s12 + $0x20] ss:$16 sps:$4 sm:$0xff]  }
 0xa6c   : > { %3070 = vmatprep.subr.bf16.mxu0 %v5314_v60  ;;  %v5361_v60 = vld [vmem:[%s7349_s28 + $0x48] sm:$0xff]  }
 0xa6d   : > { %v2523_v1 = vpack.c.bf16 %v6905_v46, %v6903_v37 }
 0xa6f   : > { %4951 = vmatmul.mubr.bf16.vlgmr.msra.gmra.mrb[28].mxu1 %v2523_v1 }
 0xa70   : > { %3059 = vmatprep.mubr.bf16.mxu1 %v6048_v47  ;;  %3028 = vmatpush1.bf16.msra.mxu1 %v5309_v57  ;;  %v5358_v57 = vld [vmem:[%s7349_s28 + $0xc0] sm:$0xff]  }
 0xa71   : > { %3029 = vmatprep.subr.bf16.mxu1 %v5317_v61  ;;  %v5362_v61 = vld [vmem:[%s7349_s28 + $0xc8] sm:$0xff]  }
 0xa74   : > { %3030 = vmatpush1.bf16.msra.mxu1 %v5315_v63  ;;  %v5364_v63 = vld [vmem:[%s7349_s28 + $0x88] sm:$0xff]  }
 0xa75   : > { %3031 = vmatprep.subr.bf16.mxu1 %v5323_v7  ;;  %v5374_v7 = vld [vmem:[%s7349_s28 + $0xe0] sm:$0xff]  }
 0xa78   : > { %3032 = vmatpush1.bf16.msra.mxu1 %v5321_v9  ;;  %v5376_v9 = vld [vmem:[%s7349_s28 + $0xa0] sm:$0xff]  }
 0xa79   : > { %3033 = vmatprep.subr.bf16.mxu1 %v5329_v15  ;;  %v5378_v15 = vld [vmem:[%s7349_s28 + $0xe8] sm:$0xff]  }
 0xb42   : > { %v2629_v17 = vpop.f32.mrb[28].mxu1 }
 0xb43   : > { %v2630_v18 = vadd.f32 %v4564_v16, %v2629_v17  ;;  %v4952_v19 = vpop.f32.mrb[29].mxu1  ;;  %v5327_v17 = vld [vmem:[%s7346_s12 + $0x60] ss:$16 sps:$4 sm:$0xff]  }
 0xb44   : > { %v2632_v20 = vpop.f32.mrb[30].mxu1  ;;  %3034 = vmatpush1.bf16.msra.mxu1 %v5327_v17  ;;  %v5335_v19 = vld [vmem:[%s7346_s12 + $0x84] ss:$16 sps:$4 sm:$0xff]   ;;  %v5380_v17 = vld [vmem:[%s7349_s28 + $0xa8] sm:$0xff]  }
 0xb45   : > { %v2636_v21 = vmul.f32 %v2630_v18, %v2630_v18  ;;  %v2633_v22 = vadd.f32 %v4564_v16, %v2632_v20  ;;  %v4953_v23 = vpop.f32.mrb[31].mxu1  ;;  %v5332_v16 = vld [vmem:[%s7346_s12 + $0x6c] ss:$16 sps:$4 sm:$0xff]   ;;  %3035 = vmatprep.subr.bf16.mxu1 %v5335_v19  ;;  %v5382_v19 = vld [vmem:[%s7349_s28 + $0xf0] sm:$0xff]  }
 0xb46   : > { %v5338_v20 = vld [vmem:[%s7346_s12 + $0x8c] ss:$16 sps:$4 sm:$0xff]   ;;  %v5341_v23 = vld [vmem:[%s7346_s12 + $0xa4] ss:$16 sps:$4 sm:$0xff]  }
 0xb47   : > { %v2638_v24 = vmul.f32 %v2636_v21, %v2630_v18  ;;  %v2637_v25 = vmul.f32 %v2633_v22, %v2633_v22  ;;  %v5333_v21 = vld [vmem:[%s7346_s12 + $0x80] ss:$16 sps:$4 sm:$0xff]  }
 0xb48   : > { %3036 = vmatpush1.bf16.msra.mxu1 %v5333_v21  ;;  %v5384_v21 = vld [vmem:[%s7349_s28 + $0xb0] sm:$0xff]  }
 0xb49   : > { %v2640_v26 = vmul.f32 0.044715, %v2638_v24  ;;  %v2639_v27 = vmul.f32 %v2637_v25, %v2633_v22  ;;  %v5344_v24 = vld [vmem:[%s7346_s12 + $0xac] ss:$16 sps:$4 sm:$0xff]   ;;  %v5339_v25 = vld [vmem:[%s7346_s12 + $0xa0] ss:$16 sps:$4 sm:$0xff]   ;;  %3037 = vmatprep.subr.bf16.mxu1 %v5341_v23 }
 0xb4a   : > { %v5386_v23 = vld [vmem:[%s7349_s28 + $0xf8] sm:$0xff]  }
 0xb4b   : > { %v2642_v28 = vadd.f32 %v2640_v26, %v2630_v18  ;;  %v2641_v29 = vmul.f32 0.044715, %v2639_v27  ;;  %v5342_v26 = vld [vmem:[%s7346_s12 + $0xa8] ss:$16 sps:$4 sm:$0xff]   ;;  %v5347_v27 = vld [vmem:[%s7346_s12 + $0xc4] ss:$16 sps:$4 sm:$0xff]  }
 0xb4c   : > { %3038 = vmatpush1.bf16.msra.mxu1 %v5339_v25  ;;  %v5388_v25 = vld [vmem:[%s7349_s28 + $0xb8] sm:$0xff]  }
 0xb4d   : > { %v2644_v30 = vmul.f32 0.7978846, %v2642_v28  ;;  %v2643_v32 = vadd.f32 %v2641_v29, %v2633_v22  ;;  %v5350_v28 = vld [vmem:[%s7346_s12 + $0xcc] ss:$16 sps:$4 sm:$0xff]   ;;  %v5345_v29 = vld [vmem:[%s7346_s12 + $0xc0] ss:$16 sps:$4 sm:$0xff]   ;;  %3039 = vmatprep.subr.bf16.mxu1 %v5347_v27 }
 0xb4e   : > { %v2861_v27 = vsub.s32 3, %v6782_v11 }
 0xb4f   : > { %5421 = vtanh.f32 %v2644_v30  ;;  %v2645_v33 = vmul.f32 0.7978846, %v2643_v32  ;;  %v5348_v30 = vld [vmem:[%s7346_s12 + $0xc8] ss:$16 sps:$4 sm:$0xff]   ;;  %v5353_v32 = vld [vmem:[%s7346_s12 + $0xe4] ss:$16 sps:$4 sm:$0xff]  }
 0xb50   : > { %3040 = vmatpush1.bf16.msra.mxu1 %v5345_v29 }
 0xb51   : > { %5423 = vtanh.f32 %v2645_v33  ;;  %v5351_v33 = vld [vmem:[%s7346_s12 + $0xe0] ss:$16 sps:$4 sm:$0xff]   ;;  %3041 = vmatprep.subr.bf16.mxu1 %v5353_v32 }
 0xb54   : > { %3042 = vmatpush1.bf16.msra.mxu1 %v5351_v33 }
 0xb59   : > { %v5422_v34 = vpop.eup %5421 }
 0xb5a   : > { %v2648_v35 = vadd.f32 1.0, %v5422_v34  ;;  %v5354_v34 = vld [vmem:[%s7346_s12 + $0xe8] ss:$16 sps:$4 sm:$0xff]  }
 0xb5b   : > { %v5424_v36 = vpop.eup %5423 }
 0xb5c   : > { %v2650_v38 = vmul.f32 0.5, %v2648_v35  ;;  %v2649_v39 = vadd.f32 1.0, %v5424_v36  ;;  %v5356_v35 = vld [vmem:[%s7346_s12 + $0xec] ss:$16 sps:$4 sm:$0xff]  }
 0xb5e   : > { %v2651_v40 = vmul.f32 0.5, %v2649_v39  ;;  %v2652_v41 = vmul.f32 %v2650_v38, %v2630_v18  ;;  %v5330_v18 = vld [vmem:[%s7346_s12 + $0x68] ss:$16 sps:$4 sm:$0xff]  }
 0xb60   : > { %v2653_v42 = vmul.f32 %v2651_v40, %v2633_v22  ;;  %v5336_v22 = vld [vmem:[%s7346_s12 + $0x88] ss:$16 sps:$4 sm:$0xff]  }
 0xb62   : > { %v2654_v43 = vpack.c.bf16 %v2653_v42, %v2652_v41 }
 0xb64   : > { %4971 = vmatmul.mubr.bf16.vlgmr.msra.gmra.mrb[16].mxu0 %v2654_v43 }
 0xb65   : > { %3102 = vmatprep.mubr.bf16.mxu0 %v6048_v47  ;;  %3071 = vmatpush1.bf16.msra.mxu0 %v5312_v59  ;;  %v5360_v59 = vld [vmem:[%s7349_s28 + $0x80] sm:$0xff]  }
 0xb66   : > { %3072 = vmatprep.subr.bf16.mxu0 %v5320_v62  ;;  %v5363_v62 = vld [vmem:[%s7349_s28 + $0x8] sm:$0xff]  }
 0xc37   : > { %v2760_v45 = vpop.f32.mrb[16].mxu0 }
 0xc38   : > { %v2761_v49 = vadd.f32 %v4573_v44, %v2760_v45  ;;  %v4972_v50 = vpop.f32.mrb[17].mxu0 }
 0xc39   : > { %v2763_v51 = vpop.f32.mrb[18].mxu0 }
 0xc3a   : > { %v2767_v52 = vadd.f32 %v2761_v49, %v6903_v37  ;;  %v2764_v53 = vadd.f32 %v4573_v44, %v2763_v51  ;;  %v4973_v54 = vpop.f32.mrb[19].mxu0  ;;  %v4582_v44 = vld [vmem:[%s1467_s21] ss:$0 sm:$0xff]  ;;  %s7350_s21 = sld [smem:[#allocation77_spill]] }
 0xc3c   : > { %v2768_v55 = vadd.f32 %v2764_v53, %v6905_v46  ;;  %v2769_v56 = vadd.f32 %v2767_v52, %v6760_v4  ;;  %v5318_v4 = vld [vmem:[%s7346_s12 + $0x28] ss:$16 sps:$4 sm:$0xff]   ;;  %v4583_v52 = vld [vmem:[%s1470_s26] ss:$0 sm:$0xff]  ;;  %s7352_s26 = sld [smem:[#allocation78_spill]] }
 0xc3d   : > { %3073 = vmatpush1.bf16.msra.mxu0 %v5318_v4  ;;  %v5365_v4 = vld [vmem:[%s7349_s28 + $0x50] sm:$0xff]  }
 0xc3e   : > { %2773 = vadd.xlane.f32.xlu1 %v2769_v56  ;;  %v2770_v47 = vadd.f32 %v2768_v55, %v6762_v5  ;;  %3074 = vmatprep.subr.bf16.mxu0 %v5326_v8  ;;  %v5375_v8 = vld [vmem:[%s7349_s28 + $0x20] sm:$0xff]  }
 0xc40   : > { %2775 = vadd.xlane.f32.xlu0 %v2770_v47 }
 0xc41   : > { %3075 = vmatpush1.bf16.msra.mxu0 %v5324_v13  ;;  %v5377_v13 = vld [vmem:[%s7349_s28 + $0x68] sm:$0xff]  }
 0xc42   : > { %3076 = vmatprep.subr.bf16.mxu0 %v5332_v16  ;;  %v5379_v16 = vld [vmem:[%s7349_s28 + $0x28] sm:$0xff]  }
 0xc45   : > { %3077 = vmatpush1.bf16.msra.mxu0 %v5330_v18  ;;  %v5381_v18 = vld [vmem:[%s7349_s28 + $0x70] sm:$0xff]  }
 0xc46   : > { %3078 = vmatprep.subr.bf16.mxu0 %v5338_v20  ;;  %v5383_v20 = vld [vmem:[%s7349_s28 + $0x30] sm:$0xff]  }
 0xc49   : > { %3079 = vmatpush1.bf16.msra.mxu0 %v5336_v22  ;;  %v5385_v22 = vld [vmem:[%s7349_s28 + $0x78] sm:$0xff]  }
 0xc4a   : > { %3080 = vmatprep.subr.bf16.mxu0 %v5344_v24  ;;  %v5387_v24 = vld [vmem:[%s7349_s28 + $0x38] sm:$0xff]  }
 0xc4d   : > { %3081 = vmatpush1.bf16.msra.mxu0 %v5342_v26  ;;  %v2845_v26 = vld [vmem:[%s6723_s29] sm:$0xf] }
 0xc4e   : > { %3082 = vmatprep.subr.bf16.mxu0 %v5350_v28  ;;  %v2850_v28 = vrot.slane %v2845_v26, %v6787_v14  ;;  %v2858_v29 = vrot.slane %v2845_v26, %v1699_v31  ;;  %v2862_v32 = vrot.slane %v2845_v26, %v2861_v27 }
 0xc51   : > { %3083 = vmatpush1.bf16.msra.mxu0 %v5348_v30  ;;  %v2854_v30 = vrot.slane %v2845_v26, %v1695_v12 }
 0xc52   : > { %3084 = vmatprep.subr.bf16.mxu0 %v5356_v35 }
 0xc55   : > { %3085 = vmatpush1.bf16.msra.mxu0 %v5354_v34 }
 0xc56   : > { %4777 = vmatprep.subr.bf16.mxu0 %v5358_v57 }
 0xccb   : > { %v2774_v5 = vpop.xlane.xlu1 %2773 }
 0xccc   : > { %v2778_v37 = vmul.f32 0.0078125, %v2774_v5  ;;  %v5366_v5 = vld [vmem:[%s7349_s28 + $0xd0] sm:$0xff]  }
 0xccd   : > { %v2776_v46 = vpop.xlane.xlu0 %2775 }
 0xcce   : > { %v6944_v0 = vsub.f32 %v2769_v56, %v2778_v37  ;;  %v2779_v1 = vmul.f32 0.0078125, %v2776_v46  ;;  %v5367_v37 = vld [vmem:[%s7349_s28 + $0x10] sm:$0xff]  }
 0xccf   : > { %v5368_v46 = vld [vmem:[%s7349_s28 + $0x90] sm:$0xff]  }
 0xcd0   : > { %v6946_v2 = vsub.f32 %v2770_v47, %v2779_v1  ;;  %v2782_v3 = vmul.f32 %v6944_v0, %v6944_v0  ;;  %v5357_v47 = vld [vmem:[%s7349_s28 + $0x40] sm:$0xff]   ;;  %v5370_v1 = vld [vmem:[%s7349_s28 + $0xd8] sm:$0xff]  }
 0xcd1   : > { %4755 = vmatprep.subr.bf16.mxu1 %v5357_v47 }
 0xcd2   : > { %2784 = vadd.xlane.f32.xlu0 %v2782_v3  ;;  %v2783_v6 = vmul.f32 %v6946_v2, %v6946_v2  ;;  %v5372_v3 = vld [vmem:[%s7349_s28 + $0x98] sm:$0xff]  }
 0xcd4   : > { %2786 = vadd.xlane.f32.xlu1 %v2783_v6  ;;  %v5373_v6 = vld [vmem:[%s7349_s28 + $0x60] sm:$0xff]  }
 0xd5f   : > { %v2785_v36 = vpop.xlane.xlu0 %2784 }
 0xd60   : > { %v2788_v38 = vmul.f32 0.0078125, %v2785_v36 }
 0xd61   : > { %v2787_v39 = vpop.xlane.xlu1 %2786 }
 0xd62   : > { %v2790_v40 = vadd.f32 1e-07, %v2788_v38  ;;  %v2789_v41 = vmul.f32 0.0078125, %v2787_v39 }
 0xd64   : > { %5425 = vrsqrt.f32 %v2790_v40  ;;  %v2791_v42 = vadd.f32 1e-07, %v2789_v41 }
 0xd66   : > { %5427 = vrsqrt.f32 %v2791_v42 }
 0xd6e   : > { %v5426_v43 = vpop.eup %5425 }
 0xd6f   : > { %v2794_v45 = vmul.f32 %v5426_v43, %v6944_v0  ;;  %v5369_v0 = vld [vmem:[%s7349_s28 + $0x58] sm:$0xff]  }
 0xd70   : > { %v5428_v49 = vpop.eup %5427 }
 0xd71   : > { %v2795_v50 = vmul.f32 %v5428_v49, %v6946_v2  ;;  %v2802_v51 = vmul.f32 %v4582_v44, %v2794_v45  ;;  %v5371_v2 = vld [vmem:[%s7349_s28 + $0x18] sm:$0xff]  }
 0xd73   : > { %v2803_v53 = vmul.f32 %v4582_v44, %v2795_v50  ;;  %v6984_v54 = vadd.f32 %v4583_v52, %v2802_v51 }
 0xd75   : > { %v6986_v55 = vadd.f32 %v4583_v52, %v2803_v53 }
 0xd77   : > { %v2812_v56 = vpack.c.bf16 %v6986_v55, %v6984_v54 }
 0xd79   : > { %3060 = vmatmul.mubr.bf16.vlgmr.msra.gmra.mrb[32].mxu1 %v2812_v56  ;;  %3103 = vmatmul.mubr.bf16.vlgmr.msra.gmra.mrb[20].mxu0 %v2812_v56 }
 0xd7a   : > { %4756 = vmatpush3.bf16.msra.mxu1 %v5359_v58  ;;  %4778 = vmatpush3.bf16.msra.mxu0 %v5360_v59 }
 0xd7b   : > { %4757 = vmatprep.subr.bf16.mxu1 %v5361_v60  ;;  %4779 = vmatprep.subr.bf16.mxu0 %v5362_v61 }
 0xd7e   : > { %4758 = vmatpush3.bf16.msra.mxu1 %v5363_v62  ;;  %4780 = vmatpush3.bf16.msra.mxu0 %v5364_v63 }
 0xd7f   : > { %4759 = vmatprep.subr.bf16.mxu1 %v5365_v4  ;;  %4781 = vmatprep.subr.bf16.mxu0 %v5366_v5 }
 0xd82   : > { %4760 = vmatpush3.bf16.msra.mxu1 %v5367_v37  ;;  %4782 = vmatpush3.bf16.msra.mxu0 %v5368_v46 }
 0xd83   : > { %4761 = vmatprep.subr.bf16.mxu1 %v5369_v0  ;;  %4783 = vmatprep.subr.bf16.mxu0 %v5370_v1 }
 0xd86   : > { %4762 = vmatpush3.bf16.msra.mxu1 %v5371_v2  ;;  %4784 = vmatpush3.bf16.msra.mxu0 %v5372_v3 }
 0xd87   : > { %4763 = vmatprep.subr.bf16.mxu1 %v5373_v6  ;;  %4785 = vmatprep.subr.bf16.mxu0 %v5374_v7 }
 0xd8a   : > { %4764 = vmatpush3.bf16.msra.mxu1 %v5375_v8  ;;  %4786 = vmatpush3.bf16.msra.mxu0 %v5376_v9 }
 0xd8b   : > { %4765 = vmatprep.subr.bf16.mxu1 %v5377_v13  ;;  %4787 = vmatprep.subr.bf16.mxu0 %v5378_v15 }
 0xd8e   : > { %4766 = vmatpush3.bf16.msra.mxu1 %v5379_v16  ;;  %4788 = vmatpush3.bf16.msra.mxu0 %v5380_v17 }
 0xd8f   : > { %4767 = vmatprep.subr.bf16.mxu1 %v5381_v18  ;;  %4789 = vmatprep.subr.bf16.mxu0 %v5382_v19 }
 0xd92   : > { %4768 = vmatpush3.bf16.msra.mxu1 %v5383_v20  ;;  %4790 = vmatpush3.bf16.msra.mxu0 %v5384_v21 }
 0xd93   : > { %4769 = vmatprep.subr.bf16.mxu1 %v5385_v22  ;;  %4791 = vmatprep.subr.bf16.mxu0 %v5386_v23 }
 0xd96   : > { %4770 = vmatpush3.bf16.msra.mxu1 %v5387_v24  ;;  %4792 = vmatpush3.bf16.msra.mxu0 %v5388_v25 }
 0xd97   : > { %4974 = vmatprep.subr.bf16.mxu1 %v6049_v48  ;;  %4994 = vmatprep.subr.bf16.mxu0 %v6049_v48 }
 0xe4c   : > { %v3061_v33 = vpop.f32.mrb[32].mxu1  ;;  %v3104_v34 = vpop.f32.mrb[20].mxu0 }
 0xe4d   : > { %v7031_v35 = vadd.f32 %v3061_v33, %v2850_v28  ;;  %v7033_v36 = vadd.f32 %v3104_v34, %v2858_v29  ;;  %v3063_v38 = vpop.f32.mrb[33].mxu1  ;;  %v3106_v39 = vpop.f32.mrb[21].mxu0 }
 0xe4e   : > { %v7035_v40 = vadd.f32 %v3063_v38, %v2854_v30  ;;  %v7037_v41 = vadd.f32 %v3106_v39, %v2862_v32  ;;  %v3065_v14 = vpop.f32.mrb[34].mxu1  ;;  %v3108_v42 = vpop.f32.mrb[22].mxu0 }
 0xe4f   : > { %v3113_v31 = vmul.f32 %v7031_v35, %v7031_v35  ;;  %v3115_v11 = vmul.f32 %v7033_v36, %v7033_v36  ;;  %v7043_v12 = vadd.f32 %v3065_v14, %v2850_v28  ;;  %v7045_v43 = vadd.f32 %v3108_v42, %v2858_v29  ;;  %v3067_v44 = vpop.f32.mrb[35].mxu1  ;;  %v3110_v45 = vpop.f32.mrb[23].mxu0 }
 0xe50   : > { %v3114_v49 = vmul.f32 %v7035_v40, %v7035_v40  ;;  %v3116_v50 = vmul.f32 %v7037_v41, %v7037_v41  ;;  %v7051_v51 = vadd.f32 %v3067_v44, %v2854_v30  ;;  %v7053_v52 = vadd.f32 %v3110_v45, %v2862_v32 }
 0xe51   : > { %v3121_v53 = vmul.f32 %v3113_v31, %v7031_v35  ;;  %v3123_v56 = vmul.f32 %v3115_v11, %v7033_v36  ;;  %v3117_v47 = vmul.f32 %v7043_v12, %v7043_v12  ;;  %v3119_v57 = vmul.f32 %v7045_v43, %v7045_v43 }
 0xe52   : > { %v3122_v58 = vmul.f32 %v3114_v49, %v7035_v40  ;;  %v3124_v59 = vmul.f32 %v3116_v50, %v7037_v41  ;;  %v3118_v60 = vmul.f32 %v7051_v51, %v7051_v51  ;;  %v3120_v61 = vmul.f32 %v7053_v52, %v7053_v52 }
 0xe53   : > { %v3129_v62 = vmul.f32 0.044715, %v3121_v53  ;;  %v3131_v63 = vmul.f32 0.044715, %v3123_v56  ;;  %v3125_v4 = vmul.f32 %v3117_v47, %v7043_v12  ;;  %v3127_v5 = vmul.f32 %v3119_v57, %v7045_v43 }
 0xe54   : > { %v3130_v37 = vmul.f32 0.044715, %v3122_v58  ;;  %v3132_v46 = vmul.f32 0.044715, %v3124_v59  ;;  %v3126_v0 = vmul.f32 %v3118_v60, %v7051_v51  ;;  %v3128_v1 = vmul.f32 %v3120_v61, %v7053_v52 }
 0xe55   : > { %v3137_v2 = vadd.f32 %v3129_v62, %v7031_v35  ;;  %v3139_v3 = vadd.f32 %v3131_v63, %v7033_v36  ;;  %v3133_v6 = vmul.f32 0.044715, %v3125_v4  ;;  %v3135_v7 = vmul.f32 0.044715, %v3127_v5 }
 0xe56   : > { %v3138_v8 = vadd.f32 %v3130_v37, %v7035_v40  ;;  %v3140_v9 = vadd.f32 %v3132_v46, %v7037_v41  ;;  %v3134_v13 = vmul.f32 0.044715, %v3126_v0  ;;  %v3136_v15 = vmul.f32 0.044715, %v3128_v1 }
 0xe57   : > { %v3145_v16 = vmul.f32 0.7978846, %v3137_v2  ;;  %v3147_v17 = vmul.f32 0.7978846, %v3139_v3  ;;  %v3141_v18 = vadd.f32 %v3133_v6, %v7043_v12  ;;  %v3143_v19 = vadd.f32 %v3135_v7, %v7045_v43  ;;  %v5396_v7 = vld [vmem:[%s7350_s21 + $0x38] sm:$0xff]  }
 0xe58   : > { %v3146_v20 = vmul.f32 0.7978846, %v3138_v8  ;;  %v3148_v21 = vmul.f32 0.7978846, %v3140_v9  ;;  %v3142_v22 = vadd.f32 %v3134_v13, %v7051_v51  ;;  %v3144_v23 = vadd.f32 %v3136_v15, %v7053_v52  ;;  %v4616_v13 = vld [vmem:[%s1477_s2] ss:$0 sm:$0xff] }
 0xe59   : > { %5429 = vtanh.f32 %v3145_v16  ;;  %v3149_v24 = vmul.f32 0.7978846, %v3141_v18  ;;  %v3151_v25 = vmul.f32 0.7978846, %v3143_v19  ;;  %s7356_s2 = sld [smem:[#allocation70_spill]] }
 0xe5a   : > { %5431 = vtanh.f32 %v3147_v17  ;;  %v3150_v26 = vmul.f32 0.7978846, %v3142_v22  ;;  %v3152_v27 = vmul.f32 0.7978846, %v3144_v23 }
 0xe5b   : > { %5433 = vtanh.f32 %v3146_v20 }
 0xe5c   : > { %5435 = vtanh.f32 %v3148_v21 }
 0xe5d   : > { %5437 = vtanh.f32 %v3149_v24 }
 0xe5e   : > { %5439 = vtanh.f32 %v3151_v25 }
 0xe5f   : > { %5441 = vtanh.f32 %v3150_v26  ;;  %p4669_p0 = scmp.ne.s32.totalorder %s7356_s2, 1 }
 0xe60   : > { %5443 = vtanh.f32 %v3152_v27  ;;  %vm6054_vm8 = vmmov (!%p4669_p0), 0   ;;  %s7359_s25 = sld [smem:[#allocation40_spill]] (!%p4669_p0)  ;;  %s7360_s30 = sld [smem:[#allocation39_spill]] (!%p4669_p0)  ;;  %vm4004_vm15 = vcmask (!%p4669_p0), 7168  }
 0xe61   : > { %s6056_s9 = smov (!%p4669_p0), 1.0  }
 0xe63   : > { %v5430_v28 = vpop.eup %5429 }
 0xe64   : > { %v5432_v29 = vpop.eup %5431  ;;  %v3161_v30 = vadd.f32 1.0, %v5430_v28 }
 0xe65   : > { %v5434_v32 = vpop.eup %5433  ;;  %v3163_v33 = vadd.f32 1.0, %v5432_v29 }
 0xe66   : > { %v5436_v34 = vpop.eup %5435  ;;  %v3162_v38 = vadd.f32 1.0, %v5434_v32  ;;  %v3169_v31 = vmul.f32 0.5, %v3161_v30  ;;  %v5397_v30 = vld [vmem:[%s7352_s26] sm:$0xff]   ;;  %v5398_v32 = vld [vmem:[%s7352_s26 + $0x8] sm:$0xff]  }
 0xe67   : > { %v5438_v39 = vpop.eup %5437  ;;  %v3164_v14 = vadd.f32 1.0, %v5436_v34  ;;  %v3171_v45 = vmul.f32 0.5, %v3163_v33  ;;  %v5399_v33 = vld [vmem:[%s7352_s26 + $0x10] sm:$0xff]   ;;  %v5400_v34 = vld [vmem:[%s7352_s26 + $0x18] sm:$0xff]  }
 0xe68   : > { %v5440_v42 = vpop.eup %5439  ;;  %v3165_v11 = vadd.f32 1.0, %v5438_v39  ;;  %v3170_v47 = vmul.f32 0.5, %v3162_v38  ;;  %v3177_v60 = vmul.f32 %v3169_v31, %v7031_v35  ;;  %v5401_v38 = vld [vmem:[%s7352_s26 + $0x20] sm:$0xff]   ;;  %v5402_v39 = vld [vmem:[%s7352_s26 + $0x28] sm:$0xff]  }
 0xe69   : > { %v5442_v44 = vpop.eup %5441  ;;  %v3167_v49 = vadd.f32 1.0, %v5440_v42  ;;  %v3172_v59 = vmul.f32 0.5, %v3164_v14  ;;  %v3179_v63 = vmul.f32 %v3171_v45, %v7033_v36  ;;  %v5390_v36 = vld [vmem:[%s7350_s21 + $0x8] sm:$0xff]   ;;  %v5403_v14 = vld [vmem:[%s7352_s26 + $0x30] sm:$0xff]   ;;  %v5404_v42 = vld [vmem:[%s7352_s26 + $0x38] sm:$0xff]  }
 0xe6a   : > { %v5444_v50 = vpop.eup %5443  ;;  %v3173_v53 = vmul.f32 0.5, %v3165_v11  ;;  %v3166_v56 = vadd.f32 1.0, %v5442_v44  ;;  %v3178_v37 = vmul.f32 %v3170_v47, %v7035_v40  ;;  %v5391_v40 = vld [vmem:[%s7350_s21 + $0x10] sm:$0xff]   ;;  %v4649_v31 = vld [vmem:[%s1480_s20] ss:$0 sm:$0xff]  ;;  %s7355_s20 = scalar_lea.vmem [#allocation24], %s6658_s0 }
 0xe6b   : > { %v3175_v57 = vmul.f32 0.5, %v3167_v49  ;;  %v3168_v58 = vadd.f32 1.0, %v5444_v50  ;;  %v3180_v1 = vmul.f32 %v3172_v59, %v7037_v41  ;;  %v5392_v41 = vld [vmem:[%s7350_s21 + $0x18] sm:$0xff]   ;;  %s7357_s0 = sld [smem:[#allocation66_spill]] (!%p4669_p0) }
 0xe6c   : > { %v3181_v61 = vmul.f32 %v3173_v53, %v7043_v12  ;;  %v3174_v62 = vmul.f32 0.5, %v3166_v56  ;;  %v5389_v12 = vld [vmem:[%s7350_s21] sm:$0xff]  }
 0xe6d   : > { %v3183_v4 = vmul.f32 %v3175_v57, %v7045_v43  ;;  %v3176_v5 = vmul.f32 0.5, %v3168_v58  ;;  %v5393_v43 = vld [vmem:[%s7350_s21 + $0x20] sm:$0xff]  }
 0xe6e   : > { %v3182_v46 = vmul.f32 %v3174_v62, %v7051_v51  ;;  %v3185_v0 = vpack.c.bf16 %v3181_v61, %v3177_v60  ;;  %v5394_v51 = vld [vmem:[%s7350_s21 + $0x28] sm:$0xff]  }
 0xe6f   : > { %v3184_v2 = vmul.f32 %v3176_v5, %v7053_v52  ;;  %v3187_v35 = vpack.c.bf16 %v3183_v4, %v3179_v63  ;;  %v5395_v52 = vld [vmem:[%s7350_s21 + $0x30] sm:$0xff]  }
 0xe70   : > { %v3186_v3 = vpack.c.bf16 %v3182_v46, %v3178_v37 }
 0xe71   : > { %v3188_v6 = vpack.c.bf16 %v3184_v2, %v3180_v1 }
 0xe72   : > { %3484 = vmatprep.mubr.bf16.mxu1 %v3186_v3 }
 0xe73   : > { %3525 = vmatprep.mubr.bf16.mxu0 %v3188_v6  ;;  %3485 = vmatmul.mubr.bf16.vlgmr.msra.gmra.mrb[36].mxu1 %v3185_v0 }
 0xe74   : > { %3526 = vmatmul.mubr.bf16.vlgmr.msra.gmra.mrb[24].mxu0 %v3187_v35  ;;  %4975 = vmatpush3.bf16.msra.mxu1 %v5389_v12  ;;  %v4658_v12 = vld [vmem:[%s7354_s19] ss:$0 sm:$0xff] }
 0xe75   : > { %4976 = vmatprep.subr.bf16.mxu1 %v6049_v48  ;;  %4990 = vmatprep.mubr.msk.bf16.mxu1 %vm6050_vm4, %v6049_v48 }
 0xe76   : > { %5010 = vmatprep.mubr.msk.bf16.mxu0 %vm6050_vm4, %v6049_v48  ;;  %4995 = vmatpush3.bf16.msra.mxu0 %v5397_v30  ;;  %v4668_v30 = vld [vmem:[%s1299_s13] ss:$0 sm:$0xff]  ;;  %s7358_s13 = smov (!%p4669_p0), %s7357_s0 }
 0xe77   : > { %4996 = vmatprep.subr.bf16.mxu0 %v6049_v48 }
 0xe78   : > { %4977 = vmatpush3.bf16.msra.mxu1 %v5390_v36 }
 0xe79   : > { %4978 = vmatprep.subr.bf16.mxu1 %v6049_v48 }
 0xe7a   : > { %4997 = vmatpush3.bf16.msra.mxu0 %v5398_v32 }
 0xe7b   : > { %4998 = vmatprep.subr.bf16.mxu0 %v6049_v48 }
 0xe7c   : > { %4979 = vmatpush3.bf16.msra.mxu1 %v5391_v40 }
 0xe7d   : > { %4980 = vmatprep.subr.bf16.mxu1 %v6049_v48 }
 0xe7e   : > { %4999 = vmatpush3.bf16.msra.mxu0 %v5399_v33 }
 0xe7f   : > { %5000 = vmatprep.subr.bf16.mxu0 %v6049_v48 }
 0xe80   : > { %4981 = vmatpush3.bf16.msra.mxu1 %v5392_v41 }
 0xe81   : > { %4982 = vmatprep.subr.bf16.mxu1 %v6049_v48 }
 0xe82   : > { %5001 = vmatpush3.bf16.msra.mxu0 %v5400_v34 }
 0xe83   : > { %5002 = vmatprep.subr.bf16.mxu0 %v6049_v48 }
 0xe84   : > { %4983 = vmatpush3.bf16.msra.mxu1 %v5393_v43 }
 0xe85   : > { %4984 = vmatprep.subr.bf16.mxu1 %v6049_v48 }
 0xe86   : > { %5003 = vmatpush3.bf16.msra.mxu0 %v5401_v38 }
 0xe87   : > { %5004 = vmatprep.subr.bf16.mxu0 %v6049_v48 }
 0xe88   : > { %4985 = vmatpush3.bf16.msra.mxu1 %v5394_v51 }
 0xe89   : > { %4986 = vmatprep.subr.bf16.mxu1 %v6049_v48 }
 0xe8a   : > { %5005 = vmatpush3.bf16.msra.mxu0 %v5402_v39 }
 0xe8b   : > { %5006 = vmatprep.subr.bf16.mxu0 %v6049_v48 }
 0xe8c   : > { %4987 = vmatpush3.bf16.msra.mxu1 %v5395_v52 }
 0xe8d   : > { %4988 = vmatprep.subr.bf16.mxu1 %v6049_v48 }
 0xe8e   : > { %5007 = vmatpush3.bf16.msra.mxu0 %v5403_v14  ;;  %v5455_v14 = vld [vmem:[#allocation9] sm:$0xff] (!%p4669_p0)  }
 0xe8f   : > { %5008 = vmatprep.subr.bf16.mxu0 %v6049_v48 }
 0xe90   : > { %4989 = vmatpush3.bf16.msra.mxu1 %v5396_v7 }
 0xe92   : > { %5009 = vmatpush3.bf16.msra.mxu0 %v5404_v42  ;;  %v6053_v42 = vmov (!%p4669_p0), 0.0  }
 0xe93   : > { %5014 = vmatprep.subr.bf16.mxu0 (!%p4669_p0), %v6053_v42 }
 0xf46   : > { %v4771_v8 = vpop.f32.mrb[36].mxu1 }
 0xf47   : > { %v4793_v9 = vpop.f32.mrb[24].mxu0  ;;  %v4772_v15 = vpop.f32.mrb[37].mxu1 }
 0xf48   : > { %v4773_v16 = vadd.f32 %v4772_v15, %v4771_v8  ;;  %v4794_v17 = vpop.f32.mrb[25].mxu0  ;;  %v4774_v18 = vpop.f32.mrb[38].mxu1 }
 0xf49   : > { %v4795_v19 = vadd.f32 %v4794_v17, %v4793_v9  ;;  %v4796_v20 = vpop.f32.mrb[26].mxu0  ;;  %v4775_v21 = vpop.f32.mrb[39].mxu1 }
 0xf4a   : > { %v3487_v22 = vadd.f32 %v4773_v16, %v4616_v13  ;;  %v4776_v23 = vadd.f32 %v4775_v21, %v4774_v18  ;;  %v4797_v24 = vpop.f32.mrb[27].mxu0 }
 0xf4b   : > { %v4798_v25 = vadd.f32 %v4797_v24, %v4796_v20 }
 0xf4c   : > { %v3528_v26 = vadd.f32 %v4795_v19, %v3487_v22  ;;  %v3490_v27 = vadd.f32 %v4776_v23, %v4616_v13 }
 0xf4e   : > { %v7109_v28 = vadd.f32 %v4798_v25, %v3490_v27  ;;  %v4667_v27 = vld [vmem:[%s7355_s20] ss:$0 sm:$0xff] }
 0xf50   : > { %v3534_v29 = vpack.c.bf16 %v7109_v28, %v3528_v26 }
 0xf52   : > { %4991 = vmatmul.mubr.bf16.vlgmr.msra.gmra.mrb[40].mxu1 %v3534_v29 }
0x1025   : > { %v3640_v11 = vpop.f32.mrb[40].mxu1 }
0x1026   : > { %v3641_v44 = vadd.f32 %v4649_v31, %v3640_v11  ;;  %v4992_v45 = vpop.f32.mrb[41].mxu1  ;;  %v5457_v11 = vld [vmem:[#allocation9 + $0x10] sm:$0xff] (!%p4669_p0)  }
0x1027   : > { %v3643_v49 = vpop.f32.mrb[42].mxu1  ;;  %v5459_v45 = vld [vmem:[#allocation9 + $0x20] sm:$0xff] (!%p4669_p0)  }
0x1028   : > { %v3647_v50 = vmul.f32 %v3641_v44, %v3641_v44  ;;  %v3644_v53 = vadd.f32 %v4649_v31, %v3643_v49  ;;  %v4993_v56 = vpop.f32.mrb[43].mxu1  ;;  %v5456_v31 = vld [vmem:[#allocation9 + $0x8] sm:$0xff] (!%p4669_p0)  }
0x1029   : > { %v5460_v49 = vld [vmem:[#allocation9 + $0x28] sm:$0xff] (!%p4669_p0)  }
0x102a   : > { %v3649_v47 = vmul.f32 %v3647_v50, %v3641_v44  ;;  %v3648_v57 = vmul.f32 %v3644_v53, %v3644_v53  ;;  %v5461_v50 = vld [vmem:[#allocation9 + $0x30] sm:$0xff] (!%p4669_p0)  }
0x102c   : > { %v3651_v58 = vmul.f32 0.044715, %v3649_v47  ;;  %v3650_v59 = vmul.f32 %v3648_v57, %v3644_v53  ;;  %v7150_v47 = vand.u32 (!%p4669_p0), 127, %v1689_v10  ;;  %v4670_v57 = vld [vmem:[#allocation11] ss:$0 sm:$0xff] (!%p4669_p0)  ;;  %v6055_v10 = vmov (!%p4669_p0), 0  }
0x102d   : > { %5453 = vset.pattern.permute.xlu0 (!%p4669_p0), %v6055_v10  ;;  %5454 = vset.pattern.permute.xlu1 (!%p4669_p0), %v6055_v10 }
0x102e   : > { %v3653_v60 = vadd.f32 %v3651_v58, %v3641_v44  ;;  %v3652_v61 = vmul.f32 0.044715, %v3650_v59  ;;  %vm3945_vm9 = vcmp.lt.s32.totalorder (!%p4669_p0), %v7150_v47, 8 }
0x1030   : > { %v3655_v62 = vmul.f32 0.7978846, %v3653_v60  ;;  %v3654_v48 = vadd.f32 %v3652_v61, %v3644_v53 }
0x1032   : > { %5445 = vtanh.f32 %v3655_v62  ;;  %v3656_v63 = vmul.f32 0.7978846, %v3654_v48 }
0x1034   : > { %5447 = vtanh.f32 %v3656_v63 }
0x103c   : > { %v5446_v4 = vpop.eup %5445 }
0x103d   : > { %v3659_v5 = vadd.f32 1.0, %v5446_v4 }
0x103e   : > { %v5448_v37 = vpop.eup %5447 }
0x103f   : > { %v3661_v46 = vmul.f32 0.5, %v3659_v5  ;;  %v3660_v0 = vadd.f32 1.0, %v5448_v37  ;;  %v3970_v5 = vld [vmem:[%s7359_s25] sm:$0xff] (!%p4669_p0) }
0x1040   : > { %v3972_v37 = vld [vmem:[%s7360_s30] sm:$0xff] (!%p4669_p0) }
0x1041   : > { %v3662_v1 = vmul.f32 0.5, %v3660_v0  ;;  %v3663_v2 = vmul.f32 %v3661_v46, %v3641_v44  ;;  %v5458_v44 = vld [vmem:[#allocation9 + $0x18] sm:$0xff] (!%p4669_p0)   ;;  %vm3974_vm10 = vcmp.eq.f32.partialorder (!%p4669_p0), %v3972_v37, 1.0 }
0x1042   : > { %v3976_v46 = vsel (!%p4669_p0), %vm3974_vm10, %v3970_v5, 4294967196 }
0x1043   : > { %v3664_v35 = vmul.f32 %v3662_v1, %v3644_v53  ;;  %v5462_v53 = vld [vmem:[#allocation9 + $0x38] sm:$0xff] (!%p4669_p0)   ;;  %vm3998_vm12 = vcmp.ne.s32.totalorder (!%p4669_p0), %v3976_v46, 4294967196 }
0x1045   : > { %v3665_v3 = vpack.c.bf16 %v3664_v35, %v3663_v2 }
0x1047   : > { %5011 = vmatmul.mubr.bf16.vlgmr.msra.gmra.mrb[28].mxu0 %v3665_v3 }
0x1048   : > { %5015 = vmatpush3.bf16.msra.mxu0 (!%p4669_p0), %v5455_v14  ;;  %5030 = vmatprep.mubr.msk.bf16.mxu0 (!%p4669_p0), %vm6054_vm8, %v6053_v42 }
0x1049   : > { %5016 = vmatprep.subr.bf16.mxu0 (!%p4669_p0), %v6053_v42 }
0x104c   : > { %5017 = vmatpush3.bf16.msra.mxu0 (!%p4669_p0), %v5456_v31 }
0x104d   : > { %5018 = vmatprep.subr.bf16.mxu0 (!%p4669_p0), %v6053_v42 }
0x1050   : > { %5019 = vmatpush3.bf16.msra.mxu0 (!%p4669_p0), %v5457_v11 }
0x1051   : > { %5020 = vmatprep.subr.bf16.mxu0 (!%p4669_p0), %v6053_v42 }
0x1054   : > { %5021 = vmatpush3.bf16.msra.mxu0 (!%p4669_p0), %v5458_v44 }
0x1055   : > { %5022 = vmatprep.subr.bf16.mxu0 (!%p4669_p0), %v6053_v42 }
0x1058   : > { %5023 = vmatpush3.bf16.msra.mxu0 (!%p4669_p0), %v5459_v45 }
0x1059   : > { %5024 = vmatprep.subr.bf16.mxu0 (!%p4669_p0), %v6053_v42 }
0x105c   : > { %5025 = vmatpush3.bf16.msra.mxu0 (!%p4669_p0), %v5460_v49 }
0x105d   : > { %5026 = vmatprep.subr.bf16.mxu0 (!%p4669_p0), %v6053_v42 }
0x1060   : > { %5027 = vmatpush3.bf16.msra.mxu0 (!%p4669_p0), %v5461_v50 }
0x1061   : > { %5028 = vmatprep.subr.bf16.mxu0 (!%p4669_p0), %v6053_v42 }
0x1064   : > { %5029 = vmatpush3.bf16.msra.mxu0 (!%p4669_p0), %v5462_v53 }
0x111a   : > { %v3771_v6 = vpop.f32.mrb[28].mxu0 }
0x111b   : > { %v3772_v36 = vadd.f32 %v4658_v12, %v3771_v6  ;;  %v5012_v40 = vpop.f32.mrb[29].mxu0 }
0x111c   : > { %v3774_v41 = vpop.f32.mrb[30].mxu0  ;;  %v3973_v40 = vld [vmem:[%s7360_s30 + $0x8] sm:$0xff] (!%p4669_p0) }
0x111d   : > { %v3778_v43 = vadd.f32 %v3772_v36, %v3528_v26  ;;  %v3775_v51 = vadd.f32 %v4658_v12, %v3774_v41  ;;  %v5013_v52 = vpop.f32.mrb[31].mxu0  ;;  %v3971_v41 = vld [vmem:[%s7359_s25 + $0x8] sm:$0xff] (!%p4669_p0)  ;;  %vm3975_vm11 = vcmp.eq.f32.partialorder (!%p4669_p0), %v3973_v40, 1.0 }
0x111f   : > { %v3779_v7 = vadd.f32 %v3775_v51, %v7109_v28  ;;  %v3780_v8 = vadd.f32 %v3778_v43, %v6984_v54  ;;  %v3977_v43 = vsel (!%p4669_p0), %vm3975_vm11, %v3971_v41, 4294967196 }
0x1120   : > { %vm3999_vm13 = vcmp.ne.s32.totalorder (!%p4669_p0), %v3977_v43, 4294967196 }
0x1121   : > { %3784 = vadd.xlane.f32.xlu0 %v3780_v8  ;;  %v3781_v9 = vadd.f32 %v3779_v7, %v6986_v55 }
0x1123   : > { %3786 = vadd.xlane.f32.xlu1 %v3781_v9 }
0x11ae   : > { %v3785_v13 = vpop.xlane.xlu0 %3784 }
0x11af   : > { %v3788_v15 = vmul.f32 0.0078125, %v3785_v13 }
0x11b0   : > { %v3787_v16 = vpop.xlane.xlu1 %3786 }
0x11b1   : > { %v3790_v17 = vsub.f32 %v3780_v8, %v3788_v15  ;;  %v3789_v18 = vmul.f32 0.0078125, %v3787_v16  ;;  %v4681_v16 = vsel (!%p4669_p0), %vm3998_vm12, 1.0, %v6053_v42 }
0x11b3   : > { %v3791_v19 = vsub.f32 %v3781_v9, %v3789_v18  ;;  %v3792_v20 = vmul.f32 %v3790_v17, %v3790_v17 }
0x11b5   : > { %3794 = vadd.xlane.f32.xlu0 %v3792_v20  ;;  %v3793_v21 = vmul.f32 %v3791_v19, %v3791_v19 }
0x11b7   : > { %3796 = vadd.xlane.f32.xlu1 %v3793_v21 }
0x1242   : > { %v3795_v22 = vpop.xlane.xlu0 %3794 }
0x1243   : > { %v3798_v23 = vmul.f32 0.0078125, %v3795_v22  ;;  %v4005_v22 = vsel (!%p4669_p0), %vm4004_vm15, %v4681_v16, 0.0 }
0x1244   : > { %v3797_v24 = vpop.xlane.xlu1 %3796 }
0x1245   : > { %v3800_v54 = vadd.f32 1e-07, %v3798_v23  ;;  %v3799_v25 = vmul.f32 0.0078125, %v3797_v24 }
0x1247   : > { %5449 = vrsqrt.f32 %v3800_v54  ;;  %v3801_v55 = vadd.f32 1e-07, %v3799_v25 }
0x1249   : > { %5451 = vrsqrt.f32 %v3801_v55 }
0x1251   : > { %v5450_v26 = vpop.eup %5449 }
0x1252   : > { %v3804_v28 = vmul.f32 %v5450_v26, %v3790_v17  ;;  %v4682_v17 = vsel (!%p4669_p0), %vm3999_vm13, 1.0, %v6053_v42 }
0x1253   : > { %v5452_v29 = vpop.eup %5451  ;;  %v4006_v23 = vsel (!%p4669_p0), %vm4004_vm15, %v4682_v17, 0.0 }
0x1254   : > { %v3812_v32 = vmul.f32 %v4667_v27, %v3804_v28  ;;  %v3805_v33 = vmul.f32 %v5452_v29, %v3791_v19  ;;  %3827 = sbr.rel (%p4669_p0) target bundleno = 5594 (0x15da), region = 204  ;;  %v4007_v26 = vadd.f32 (!%p4669_p0), %v4006_v23, %v4005_v22 }
0x1256   : > { %v3820_v34 = vadd.f32 %v4668_v30, %v3812_v32  ;;  %v3813_v38 = vmul.f32 %v4667_v27, %v3805_v33 }
0x1258   : > { %3822 = vst [vmem:[#allocation2] sm:$0xff] %v3820_v34  ;;  %v3821_v39 = vadd.f32 %v4668_v30, %v3813_v38 }
0x125a   : > { %3823 = vst [vmem:[#allocation2 + $0x8] sm:$0xff] %v3821_v39  ;;  %v3828_v56 = vpack.c.bf16 (!%p4669_p0), %v3821_v39, %v3820_v34 }
0x125c   : > { %5031 = vmatmul.mubr.bf16.vlgmr.msra.gmra.mrb[0].mxu0 %v3828_v56 }
0x132f   : > { %v3934_v58 = vpop.f32.mrb[0].mxu0 }
0x1330   : > { %v3935_v59 = vadd.f32 %v4670_v57, %v3934_v58  ;;  %v5032_v60 = vpop.f32.mrb[1].mxu0 }
0x1331   : > { %v3937_v61 = vpop.f32.mrb[2].mxu0 }
0x1332   : > { %3941 = vst [vmem:[%s7357_s0] sm:$0xff] %v3935_v59  ;;  %v3938_v62 = vadd.f32 %v4670_v57, %v3937_v61  ;;  %v5033_v48 = vpop.f32.mrb[3].mxu0  ;;  %v3946_v63 = vsel %vm3945_vm9, %v3935_v59, -1e+09 }
0x1333   : > { %3948 = vmax.xlane.f32.xlu0 %v3946_v63 }
0x1334   : > { %3942 = vst [vmem:[%s7358_s13 + $0x8] sm:$0xff] %v3938_v62  ;;  %v3947_v4 = vsel %vm3945_vm9, %v3938_v62, -1e+09 }
0x1337   : > { %3950 = vmax.xlane.f32.xlu0 %v3947_v4 }
0x134d   : > { %3979 = vperm.xlu0 %5453, %v3976_v46  }
0x13c0   : > { %v3949_v0 = vpop.xlane.xlu0 %3948 }
0x13c1   : > { %v3952_v1 = vsub.f32 %v3946_v63, %v3949_v0 }
0x13c3   : > { %v3954_v2 = vmul.f32 1.442695, %v3952_v1 }
0x13c4   : > { %v3951_v35 = vpop.xlane.xlu0 %3950 }
0x13c5   : > { %v3953_v3 = vsub.f32 %v3947_v4, %v3951_v35  ;;  %5463 = vpow2.f32 %v3954_v2 }
0x13c7   : > { %v3956_v12 = vmul.f32 1.442695, %v3953_v3 }
0x13c9   : > { %5465 = vpow2.f32 %v3956_v12 }
0x13cc   : > { %v3980_v7 = vpop.permute.xlu0 %3979 }
0x13cd   : > { %vm3984_vm14 = vcmp.eq.s32.totalorder %v3980_v7, %v7150_v47 }
0x13ce   : > { %v4679_v19 = vsel %vm3984_vm14, 1.0, %v6053_v42 }
0x13cf   : > { %v5464_v6 = vpop.eup %5463 }
0x13d0   : > { %3958 = vadd.xlane.f32.xlu1 %v5464_v6 }
0x13d3   : > { %v5466_v36 = vpop.eup %5465 }
0x13d4   : > { %3960 = vadd.xlane.f32.xlu1 %v5466_v36 }
0x13e5   : > { %3982 = vperm.xlu1 %5454, %v3977_v43  }
0x145d   : > { %v3959_v51 = vpop.xlane.xlu1 %3958 }
0x145e   : > { %5467 = vlog2.f32 %v3959_v51 }
0x1461   : > { %v3961_v52 = vpop.xlane.xlu1 %3960 }
0x1462   : > { %5469 = vlog2.f32 %v3961_v52 }
0x1465   : > { %v3983_v13 = vpop.permute.xlu1 %3982 }
0x1466   : > { %vm3985_vm0 = vcmp.eq.s32.totalorder %v3983_v13, %v7150_v47 }
0x1467   : > { %v4680_v25 = vsel %vm3985_vm0, 1.0, %v6053_v42 }
0x1468   : > { %v5468_v8 = vpop.eup %5467 }
0x1469   : > { %v3963_v9 = vmul.f32 0.6931472, %v5468_v8 }
0x146b   : > { %v3966_v15 = vadd.f32 %v3963_v9, %v3949_v0 }
0x146c   : > { %v5470_v18 = vpop.eup %5469 }
0x146d   : > { %v3965_v20 = vmul.f32 0.6931472, %v5470_v18  ;;  %v3968_v21 = vsub.f32 %v3946_v63, %v3966_v15 }
0x146f   : > { %v3967_v24 = vadd.f32 %v3965_v20, %v3951_v35  ;;  %v3990_v54 = vmul.f32 %v4679_v19, %v3968_v21 }
0x1471   : > { %3992 = vadd.xlane.f32.xlu1 %v3990_v54  ;;  %v3969_v55 = vsub.f32 %v3947_v4, %v3967_v24 }
0x1473   : > { %v3991_v27 = vmul.f32 %v4680_v25, %v3969_v55 }
0x1475   : > { %3994 = vadd.xlane.f32.xlu0 %v3991_v27  ;;  %4008 = vadd.xlane.f32.xlu1 %v4007_v26 }
0x14fe   : > { %v3993_v28 = vpop.xlane.xlu1 %3992 }
0x14ff   : > { %v3996_v29 = vsub.f32 0.0, %v3993_v28 }
0x1501   : > { %v4018_v33 = vmul.f32 %v4681_v16, %v3996_v29 }
0x1502   : > { %v3995_v30 = vpop.xlane.xlu0 %3994  ;;  %v4009_v32 = vpop.xlane.xlu1 %4008 }
0x1503   : > { %v3997_v34 = vsub.f32 0.0, %v3995_v30  ;;  %v4010_v38 = vrot.slane %v4009_v32, 4  ;;  %v4020_v31 = vsel %vm4004_vm15, %v4018_v33, 0.0 }
0x1505   : > { %v4019_v39 = vmul.f32 %v4682_v17, %v3997_v34  ;;  %v4011_v14 = vadd.f32 %v4010_v38, %v4009_v32 }
0x1507   : > { %v4021_v11 = vsel %vm4004_vm15, %v4019_v39, 0.0  ;;  %v4012_v42 = vrot.slane %v4011_v14, 2 }
0x1508   : > { %v4022_v44 = vadd.f32 %v4021_v11, %v4020_v31 }
0x1509   : > { %v4013_v45 = vadd.f32 %v4012_v42, %v4011_v14 }
0x150a   : > { %4023 = vadd.xlane.f32.xlu1 %v4022_v44 }
0x150b   : > { %v4014_v49 = vrot.slane %v4013_v45, 1 }
0x150d   : > { %v4015_v50 = vadd.f32 %v4014_v49, %v4013_v45 }
0x150f   : > { %5038 = vpush %v4015_v50 }
0x1540   : > { %s5039_s22 = spop %5038 }
0x1541   : > { %s4017_s14 = smax.f32 %s6056_s9, %s5039_s22 }
0x1542   : > { %v4032_v53 = vstv %s4017_s14 }
0x1543   : > { %5471 = vrcp.f32 %v4032_v53 }
0x154d   : > { %v5472_v62 = vpop.eup %5471 }
0x1597   : > { %v4024_v56 = vpop.xlane.xlu1 %4023 }
0x1598   : > { %v4025_v47 = vrot.slane %v4024_v56, 4 }
0x159a   : > { %v4026_v57 = vadd.f32 %v4025_v47, %v4024_v56 }
0x159c   : > { %v4027_v58 = vrot.slane %v4026_v57, 2 }
0x159e   : > { %v4028_v59 = vadd.f32 %v4027_v58, %v4026_v57 }
0x15a0   : > { %v4029_v60 = vrot.slane %v4028_v59, 1 }
0x15a2   : > { %v4030_v61 = vadd.f32 %v4029_v60, %v4028_v59 }
0x15a4   : > { %5040 = vpush %v4030_v61 }
0x15a5   : > { %5042 = vpush %v5472_v62 }
0x15d5   : > { %s5041_s15 = spop %5040 }
0x15d6   : > { %s5043_s16 = spop %5042 }
0x15d7   : > { %s4035_s10 = smul.f32 %s5043_s16, %s5041_s15 }
0x15d9   : > { %4037 = sst [smem:[#allocation27]] %s4035_s10 }
0x15da PF: > { %s7361_s24 = sld [smem:[#allocation70_spill]]  ;;  %s7362_s1 = sld [smem:[#allocation67_spill]] }
0x15e0   : > { %p5146_p5 = scmp.eq.s32.totalorder %s7361_s24, 1  ;;  %s5913_s7 = scalar_lea.hbm %s7362_s1, 16 }
0x15e1   : > { %p5914_p7 = scmp.ne.s32.totalorder %s7362_s1, %s5913_s7  ;;  %p5919_p9 = scmp.lt.u32.totalorder %s5913_s7, %s7362_s1 }
0x15e3   : > { %p5915_p8 = pnand %p5914_p7, %p5146_p5 }
0x15e5   : > { %p5916_p6 = pneg %p5915_p8 }
0x15e7   : > { %p5921_p1 = pnand %p5919_p9, %p5916_p6 }
0x15e9   : > { %5924 = shalt.err (!%p5921_p1)
}
0x15ea   : > { %s6057_s18 = smov [#allocation27]  }
0x15eb   : > { %5085 = dma.smem_to_hbm (%p5146_p5), %s6057_s18, 16, %s7362_s1, [#allocation5]  }
0x15ec   : > { %5974 = dma.done.wait (%p5146_p5), [#allocation5], 16  }
0x15ed   : > { %5976 = vsyncadd (%p5146_p5), [#allocation5], 4294967280 }
0x15ee   : > { %4057 = sfence }
0x15ef PF: > { %s7363_s18 = sld [smem:[#allocation73_spill]]  ;;  %s7364_s15 = sld [smem:[#allocation68_spill]] }
0x15f0   : > { %s7365_s16 = sld [smem:[#allocation69_spill]]  ;;  %s7366_s0 = sld [smem:[#allocation74_spill]] }
0x15f5   : > { %p88_p3 = scmp.ge.s32.totalorder %s7363_s18, 4  }
0x15f7   :  { %90 = sbr.rel (!%p88_p3) target bundleno = 81 (0x51), region = 378 }
0x15fe   :  { %4063 = vsyncpa [#allocation4], 1 }
0x15ff   :  { %4065 = vsyncpa [#allocation4 + $0x1], 1 }
0x1600   :  { %4066 = vsyncpa [#allocation7], 1 }
0x1601   :  { %4067 = vsyncpa [#allocation10], 1 }
0x1602   :  { %4068 = vsyncpa [#allocation13], 1 }
0x1603   :  { %4070 = vsyncpa [#allocation13 + $0x1], 1 }
0x1604   :  { %4071 = vsyncpa [#allocation16], 1 }
0x1605   :  { %4073 = vsyncpa [#allocation16 + $0x1], 1 }
0x1606   :  { %4074 = vsyncpa [#allocation19], 1 }
0x1607   :  { %4076 = vsyncpa [#allocation19 + $0x1], 1 }
0x1608   :  { %4077 = vsyncpa [#allocation22], 1 }
0x1609   :  { %4079 = vsyncpa [#allocation22 + $0x1], 1 }
0x160a   :  { %4080 = vsyncpa [#allocation25], 1 }
0x160b   :  { %4082 = vsyncpa [#allocation25 + $0x1], 1 }
0x160c   :  { %4083 = vsyncpa [#allocation5], 1 }
0x160d   :  { %4085 = vsyncpa [#allocation5 + $0x1], 1 }

</bundles_post_ra>
